<compile_context>
chip_gen: v7x
topology: tpu7x:2x2x1
jax: 0.10.0
libtpu: 0.0.40
codegen_flags: <defaults>
</compile_context>

<pallas_src>
import math
from functools import partial

import jax
import jax.numpy as jnp
from jax import lax
from jax.experimental import pallas as pl
from jax.experimental.pallas import tpu as pltpu


# -----------------------------------------------------------------------------
# Shared helpers
# -----------------------------------------------------------------------------
def _layer_norm(z, gamma, beta, eps=1e-5):
    # f32, biased variance, eps=1e-5 -> matches torch.nn.LayerNorm defaults.
    mu = jnp.mean(z, axis=-1, keepdims=True)
    var = jnp.mean((z - mu) ** 2, axis=-1, keepdims=True)
    return (z - mu) * lax.rsqrt(var + eps) * gamma + beta


# -----------------------------------------------------------------------------
# Pallas kernel 1: full BERT encoder (all layers fused, batch-folded rows)
# -----------------------------------------------------------------------------
def bert_encoder_kernel(
    x_ref,                           # (nb*T, H) f32 activations for this block
    mask_ref,                        # (nb*nh, 1, T) f32 key-validity mask (1/0)
    wq_ref, bq_ref, wk_ref, bk_ref,  # stacked (L, H, H) bf16 / (L, 1, H) f32
    wv_ref, bv_ref, wo_ref, bo_ref,
    g1_ref, be1_ref,                 # (L, 1, H) f32 LayerNorm 1
    w1_ref, b1_ref,                  # (L, H, Fh) bf16 / (L, 1, Fh) f32
    w2_ref, b2_ref,                  # (L, Fh, H) bf16 / (L, 1, H) f32
    g2_ref, be2_ref,                 # (L, 1, H) f32 LayerNorm 2
    out_ref,                         # (nb*T, H) f32
    *, num_layers, num_heads, batches_per_block, seq_len):

    nb, nh, T = batches_per_block, num_heads, seq_len
    x = x_ref[...]                                   # (M, H) f32, M = nb*T
    M, H = x.shape
    dh = H // nh
    scale = 1.0 / math.sqrt(dh)

    # Mask loaded once per grid step (hoisted out of layer/head loops).
    kmask = mask_ref[...] > 0.5                      # (nb*nh, 1, T) bool

    def to_heads(z):
        # (M, H) -> (nb*nh, T, dh): pure layout (lane/sublane slices stacked
        # along a new leading dim) so the attention matmuls are head-batched.
        return jnp.stack(
            [z[b * T:(b + 1) * T, h * dh:(h + 1) * dh]
             for b in range(nb) for h in range(nh)], axis=0)

    for l in range(num_layers):                      # static unroll over layers
        xb = x.astype(jnp.bfloat16)

        # --- QKV projections: one big (M,H)x(H,H) bf16 matmul each ------------
        q = jnp.dot(xb, wq_ref[l], preferred_element_type=jnp.float32) + bq_ref[l]
        k = jnp.dot(xb, wk_ref[l], preferred_element_type=jnp.float32) + bk_ref[l]
        v = jnp.dot(xb, wv_ref[l], preferred_element_type=jnp.float32) + bv_ref[l]
        q = q * scale                                # fold 1/sqrt(dh) in f32

        qh = to_heads(q).astype(jnp.bfloat16)        # (nb*nh, T, dh)
        kh = to_heads(k).astype(jnp.bfloat16)
        vh = to_heads(v).astype(jnp.bfloat16)

        # --- batched attention over (batch x head) ----------------------------
        s = jnp.einsum('nqd,nkd->nqk', qh, kh,
                       preferred_element_type=jnp.float32)       # (nb*nh, T, T)
        s = jnp.where(kmask, s, -1e6)                # d2l masked_softmax fill
        s = s - jnp.max(s, axis=-1, keepdims=True)
        p = jnp.exp(s)
        p = p * pl.reciprocal(jnp.sum(p, axis=-1, keepdims=True), approx=True)
        o = jnp.einsum('nqk,nkd->nqd', p.astype(jnp.bfloat16), vh,
                       preferred_element_type=jnp.float32)       # (nb*nh, T, dh)

        # heads back to (M, H): lane-concat heads, sublane-concat batches
        attn = jnp.concatenate(
            [jnp.concatenate([o[b * nh + h] for h in range(nh)], axis=-1)
             for b in range(nb)], axis=0)                        # (M, H) f32
        attn = jnp.dot(attn.astype(jnp.bfloat16), wo_ref[l],
                       preferred_element_type=jnp.float32) + bo_ref[l]

        # --- AddNorm 1 ---------------------------------------------------------
        y = _layer_norm(x + attn, g1_ref[l], be1_ref[l])

        # --- Position-wise FFN -------------------------------------------------
        hdn = jnp.dot(y.astype(jnp.bfloat16), w1_ref[l],
                      preferred_element_type=jnp.float32) + b1_ref[l]
        hdn = jnp.maximum(hdn, 0.0)                  # ReLU
        ffn = jnp.dot(hdn.astype(jnp.bfloat16), w2_ref[l],
                      preferred_element_type=jnp.float32) + b2_ref[l]

        # --- AddNorm 2 ---------------------------------------------------------
        x = _layer_norm(y + ffn, g2_ref[l], be2_ref[l])

    out_ref[...] = x


_ENC_PARAM_ORDER = ("wq", "bq", "wk", "bk", "wv", "bv", "wo", "bo",
                    "g1", "be1", "w1", "b1", "w2", "b2", "g2", "be2")


def encoder_forward(x_bth, valid_lens, enc_params, num_heads):
    B, T, H = x_bth.shape
    nh = num_heads
    assert H % nh == 0
    L = enc_params["wq"].shape[0]

    # Row-tile policy: pack as many batches per block as needed to reach a
    # reasonable matmul M (>=256 rows) while keeping >=2 parallel blocks when
    # B*T is large (feeds both v7x TensorCores). For the toy shape this
    # collapses to a single grid step (all of B*T in one block).
    bpb = B
    if T % 8 == 0:
        for d in range(1, B + 1):
            if B % d == 0 and d * T >= min(256, B * T):
                bpb = d
                break
    grid = (B // bpb,)

    x2 = x_bth.reshape(B * T, H).astype(jnp.float32)

    # Key-validity mask built ONCE on the host side, replicated per head.
    kmask = (jnp.arange(T, dtype=jnp.int32)[None, :]
             < valid_lens.astype(jnp.int32)[:, None]).astype(jnp.float32)  # (B,T)
    kmask = jnp.repeat(kmask, nh, axis=0)[:, None, :]                      # (B*nh,1,T)

    weights = [enc_params[k] for k in _ENC_PARAM_ORDER]

    def const_spec(a):
        nd = a.ndim
        return pl.BlockSpec(a.shape, lambda i, _nd=nd: (0,) * _nd)

    in_specs = ([pl.BlockSpec((bpb * T, H), lambda i: (i, 0)),
                 pl.BlockSpec((bpb * nh, 1, T), lambda i: (i, 0, 0))]
                + [const_spec(w) for w in weights])

    out2 = pl.pallas_call(
        partial(bert_encoder_kernel, num_layers=L, num_heads=nh,
                batches_per_block=bpb, seq_len=T),
        grid=grid,
        in_specs=in_specs,
        out_specs=pl.BlockSpec((bpb * T, H), lambda i: (i, 0)),
        out_shape=jax.ShapeDtypeStruct((B * T, H), jnp.float32),
        compiler_params=pltpu.CompilerParams(
            dimension_semantics=("parallel",),
            vmem_limit_bytes=48 * 1024 * 1024),   # headroom under v7x 64 MiB
    )(x2, kmask, *weights)
    return out2.reshape(B, T, H)


# -----------------------------------------------------------------------------
# Pallas kernel 2: MLM head + pooler/NSP head (small dense stacks)
# -----------------------------------------------------------------------------
def bert_heads_kernel(mx_ref, cls_ref,
                      wm1_ref, bm1_ref, gm_ref, bem_ref, wm2_ref, bm2_ref,
                      wh_ref, bh_ref, wn_ref, bn_ref,
                      mlm_ref, nsp_ref):
    # MaskLM MLP: Linear -> ReLU -> LayerNorm -> Linear(vocab)
    mx = mx_ref[...].astype(jnp.bfloat16)                       # (B*P, H)
    h1 = jnp.dot(mx, wm1_ref[...], preferred_element_type=jnp.float32) + bm1_ref[...]
    h1 = jnp.maximum(h1, 0.0)
    h1 = _layer_norm(h1, gm_ref[...], bem_ref[...])
    mlm_ref[...] = (jnp.dot(h1.astype(jnp.bfloat16), wm2_ref[...],
                            preferred_element_type=jnp.float32) + bm2_ref[...])

    # hidden (pooler): Tanh(Linear) ; NextSentencePred: Linear(-> 2)
    cls = cls_ref[...].astype(jnp.bfloat16)                     # (B, H)
    hc = jnp.tanh(jnp.dot(cls, wh_ref[...],
                          preferred_element_type=jnp.float32) + bh_ref[...])
    nsp_ref[...] = (jnp.dot(hc.astype(jnp.bfloat16), wn_ref[...],
                            preferred_element_type=jnp.float32) + bn_ref[...])


_HEAD_PARAM_ORDER = ("wm1", "bm1", "gm", "bem", "wm2", "bm2",
                     "wh", "bh", "wn", "bn")


def heads_forward(encoded, pred_positions, head_params):
    B, T, H = encoded.shape
    P = pred_positions.shape[1]
    V = head_params["wm2"].shape[-1]

    # Data-dependent gather of masked positions: plain-JAX glue (same as the
    # module's advanced indexing), fed to the Pallas head kernel.
    batch_idx = jnp.repeat(jnp.arange(B, dtype=jnp.int32), P)
    masked_x = encoded[batch_idx, pred_positions.reshape(-1)]    # (B*P, H)
    cls_x = encoded[:, 0, :]                                     # (B, H)

    args = [masked_x, cls_x] + [head_params[k] for k in _HEAD_PARAM_ORDER]
    mlm2, nsp = pl.pallas_call(
        bert_heads_kernel,
        out_shape=(jax.ShapeDtypeStruct((B * P, V), jnp.float32),
                   jax.ShapeDtypeStruct((B, 2), jnp.float32)),
    )(*args)
    return mlm2.reshape(B, P, V), nsp


# -----------------------------------------------------------------------------
# Full BERTModel forward
# -----------------------------------------------------------------------------
def bert_model_forward(tokens, segments, valid_lens, pred_positions,
                       params, num_heads):
    T = tokens.shape[1]
    # Embedding gathers + positional add: plain-JAX glue.
    x = params["token_emb"][tokens] + params["seg_emb"][segments]
    x = x + params["pos_emb"][:, :T, :]
    encoded = encoder_forward(x, valid_lens, params["encoder"], num_heads)
    mlm_y_hat, nsp_y_hat = heads_forward(encoded, pred_positions,
                                         params["heads"])
    return encoded, mlm_y_hat, nsp_y_hat


# -----------------------------------------------------------------------------
# Parameter construction (deterministic, synthetic weights).
# Linear weights stored as (in, out) == torch weight (out, in) transposed;
# matmul weights cast to bf16, biases / LayerNorm params kept in f32.
# -----------------------------------------------------------------------------
def init_bert_params(key, vocab_size, num_hiddens, ffn_num_hiddens,
                     num_heads, num_layers, max_len):
    H, Fh, V = num_hiddens, ffn_num_hiddens, vocab_size
    n_keys = 3 + num_layers * 12 + 8
    keys = iter(jax.random.split(key, n_keys))

    def nrm(shape, scale=0.02):
        return (scale * jax.random.normal(next(keys), shape)).astype(jnp.float32)

    token_emb = nrm((V, H), 1.0)
    seg_emb = nrm((2, H), 1.0)
    pos_emb = nrm((1, max_len, H), 1.0)          # nn.Parameter(torch.randn(...))

    enc_lists = {k: [] for k in _ENC_PARAM_ORDER}
    for _ in range(num_layers):
        enc_lists["wq"].append(nrm((H, H)));  enc_lists["bq"].append(nrm((1, H)))
        enc_lists["wk"].append(nrm((H, H)));  enc_lists["bk"].append(nrm((1, H)))
        enc_lists["wv"].append(nrm((H, H)));  enc_lists["bv"].append(nrm((1, H)))
        enc_lists["wo"].append(nrm((H, H)));  enc_lists["bo"].append(nrm((1, H)))
        enc_lists["g1"].append(jnp.ones((1, H), jnp.float32))
        enc_lists["be1"].append(jnp.zeros((1, H), jnp.float32))
        enc_lists["w1"].append(nrm((H, Fh))); enc_lists["b1"].append(nrm((1, Fh)))
        enc_lists["w2"].append(nrm((Fh, H))); enc_lists["b2"].append(nrm((1, H)))
        enc_lists["g2"].append(jnp.ones((1, H), jnp.float32))
        enc_lists["be2"].append(jnp.zeros((1, H), jnp.float32))

    matmul_keys = {"wq", "wk", "wv", "wo", "w1", "w2"}
    encoder = {k: jnp.stack(vs, axis=0).astype(
                   jnp.bfloat16 if k in matmul_keys else jnp.float32)
               for k, vs in enc_lists.items()}

    heads = {
        "wm1": nrm((H, H)).astype(jnp.bfloat16), "bm1": nrm((1, H)),
        "gm": jnp.ones((1, H), jnp.float32), "bem": jnp.zeros((1, H), jnp.float32),
        "wm2": nrm((H, V)).astype(jnp.bfloat16), "bm2": nrm((1, V)),
        "wh": nrm((H, H)).astype(jnp.bfloat16), "bh": nrm((1, H)),
        "wn": nrm((H, 2)).astype(jnp.bfloat16), "bn": nrm((1, 2)),
    }
    return {"token_emb": token_emb, "seg_emb": seg_emb, "pos_emb": pos_emb,
            "encoder": encoder, "heads": heads}


# -----------------------------------------------------------------------------
if __name__ == "__main__":
    vocab_size = 128
    num_hiddens = 32          # key_size = query_size = value_size = num_hiddens
    ffn_num_hiddens = 64
    num_heads = 4
    num_layers = 2
    max_len = 64
    batch, seq, num_preds = 2, 8, 3

    key = jax.random.PRNGKey(0)
    k_params, k_tok, k_seg, k_pos = jax.random.split(key, 4)

    params = init_bert_params(k_params, vocab_size, num_hiddens,
                              ffn_num_hiddens, num_heads, num_layers, max_len)

    tokens = jax.random.randint(k_tok, (batch, seq), 0, vocab_size, dtype=jnp.int32)
    segments = jax.random.randint(k_seg, (batch, seq), 0, 2, dtype=jnp.int32)
    valid_lens = jnp.array([seq, 5], dtype=jnp.int32)
    pred_positions = jax.random.randint(k_pos, (batch, num_preds), 0, seq,
                                        dtype=jnp.int32)

    encoded, mlm_logits, nsp_logits = bert_model_forward(
        tokens, segments, valid_lens, pred_positions, params, num_heads)
    encoded, mlm_logits, nsp_logits = jax.block_until_ready(
        (encoded, mlm_logits, nsp_logits))

    assert encoded.shape == (batch, seq, num_hiddens)
    assert mlm_logits.shape == (batch, num_preds, vocab_size)
    assert nsp_logits.shape == (batch, 2)
    assert bool(jnp.all(jnp.isfinite(encoded)))
    assert bool(jnp.all(jnp.isfinite(mlm_logits)))
    assert bool(jnp.all(jnp.isfinite(nsp_logits)))
    print("KERNEL_OK")
</pallas_src>

<mosaic_0001>
module attributes {stable_mosaic.version = 11 : i64} {
  func.func @bert_encoder_kernel(%arg0: i32, %arg1: memref<16x32xf32, #tpu.memory_space<vmem>>, %arg2: memref<8x1x8xf32, #tpu.memory_space<vmem>>, %arg3: memref<2x32x32xbf16, #tpu.memory_space<vmem>>, %arg4: memref<2x1x32xf32, #tpu.memory_space<vmem>>, %arg5: memref<2x32x32xbf16, #tpu.memory_space<vmem>>, %arg6: memref<2x1x32xf32, #tpu.memory_space<vmem>>, %arg7: memref<2x32x32xbf16, #tpu.memory_space<vmem>>, %arg8: memref<2x1x32xf32, #tpu.memory_space<vmem>>, %arg9: memref<2x32x32xbf16, #tpu.memory_space<vmem>>, %arg10: memref<2x1x32xf32, #tpu.memory_space<vmem>>, %arg11: memref<2x1x32xf32, #tpu.memory_space<vmem>>, %arg12: memref<2x1x32xf32, #tpu.memory_space<vmem>>, %arg13: memref<2x32x64xbf16, #tpu.memory_space<vmem>>, %arg14: memref<2x1x64xf32, #tpu.memory_space<vmem>>, %arg15: memref<2x64x32xbf16, #tpu.memory_space<vmem>>, %arg16: memref<2x1x32xf32, #tpu.memory_space<vmem>>, %arg17: memref<2x1x32xf32, #tpu.memory_space<vmem>>, %arg18: memref<2x1x32xf32, #tpu.memory_space<vmem>>, %arg19: memref<16x32xf32, #tpu.memory_space<vmem>>) attributes {dimension_semantics = [#tpu.dimension_semantics<parallel>], iteration_bounds = array<i64: 1>, scalar_prefetch = 0 : i64, scratch_operands = 0 : i64, tpu.core_type = #tpu.core_type<tc>, window_params = [{transform_indices = @transform_0, window_bounds = array<i64: 16, 32>}, {transform_indices = @transform_1, window_bounds = array<i64: 8, 1, 8>}, {pipeline_mode = #tpu.pipeline_mode<synchronous>, transform_indices = @transform_2, window_bounds = array<i64: 2, 32, 32>}, {pipeline_mode = #tpu.pipeline_mode<synchronous>, transform_indices = @transform_3, window_bounds = array<i64: 2, 1, 32>}, {pipeline_mode = #tpu.pipeline_mode<synchronous>, transform_indices = @transform_4, window_bounds = array<i64: 2, 32, 32>}, {pipeline_mode = #tpu.pipeline_mode<synchronous>, transform_indices = @transform_5, window_bounds = array<i64: 2, 1, 32>}, {pipeline_mode = #tpu.pipeline_mode<synchronous>, transform_indices = @transform_6, window_bounds = array<i64: 2, 32, 32>}, {pipeline_mode = #tpu.pipeline_mode<synchronous>, transform_indices = @transform_7, window_bounds = array<i64: 2, 1, 32>}, {pipeline_mode = #tpu.pipeline_mode<synchronous>, transform_indices = @transform_8, window_bounds = array<i64: 2, 32, 32>}, {pipeline_mode = #tpu.pipeline_mode<synchronous>, transform_indices = @transform_9, window_bounds = array<i64: 2, 1, 32>}, {pipeline_mode = #tpu.pipeline_mode<synchronous>, transform_indices = @transform_10, window_bounds = array<i64: 2, 1, 32>}, {pipeline_mode = #tpu.pipeline_mode<synchronous>, transform_indices = @transform_11, window_bounds = array<i64: 2, 1, 32>}, {pipeline_mode = #tpu.pipeline_mode<synchronous>, transform_indices = @transform_12, window_bounds = array<i64: 2, 32, 64>}, {pipeline_mode = #tpu.pipeline_mode<synchronous>, transform_indices = @transform_13, window_bounds = array<i64: 2, 1, 64>}, {pipeline_mode = #tpu.pipeline_mode<synchronous>, transform_indices = @transform_14, window_bounds = array<i64: 2, 64, 32>}, {pipeline_mode = #tpu.pipeline_mode<synchronous>, transform_indices = @transform_15, window_bounds = array<i64: 2, 1, 32>}, {pipeline_mode = #tpu.pipeline_mode<synchronous>, transform_indices = @transform_16, window_bounds = array<i64: 2, 1, 32>}, {pipeline_mode = #tpu.pipeline_mode<synchronous>, transform_indices = @transform_17, window_bounds = array<i64: 2, 1, 32>}, {transform_indices = @transform_18, window_bounds = array<i64: 16, 32>}]} {
    %c0 = arith.constant 0 : index
    %c0_0 = arith.constant 0 : index
    %0 = vector.load %arg1[%c0, %c0_0] : memref<16x32xf32, #tpu.memory_space<vmem>>, vector<16x32xf32>
    %c0_1 = arith.constant 0 : index
    %c0_2 = arith.constant 0 : index
    %c0_3 = arith.constant 0 : index
    %1 = vector.load %arg2[%c0_1, %c0_2, %c0_3] : memref<8x1x8xf32, #tpu.memory_space<vmem>>, vector<8x1x8xf32>
    %cst = arith.constant 5.000000e-01 : f32
    %2 = vector.broadcast %cst : f32 to vector<8x1x8xf32>
    %3 = arith.cmpf ogt, %1, %2 : vector<8x1x8xf32>
    %4 = arith.truncf %0 : vector<16x32xf32> to vector<16x32xbf16>
    %c0_4 = arith.constant 0 : index
    %c0_5 = arith.constant 0 : index
    %c0_6 = arith.constant 0 : index
    %5 = vector.load %arg3[%c0_4, %c0_5, %c0_6] : memref<2x32x32xbf16, #tpu.memory_space<vmem>>, vector<1x32x32xbf16>
    %6 = vector.shape_cast %5 : vector<1x32x32xbf16> to vector<32x32xbf16>
    %cst_7 = arith.constant dense<0.000000e+00> : vector<16x32xf32>
    %7 = tpu.matmul %4, %6, %cst_7 {dimension_numbers = #tpu.dot_dimension_numbers<[1], [0], [0], [1], [0, 0, 1, 1], [], []>} : vector<16x32xbf16>, vector<32x32xbf16>, vector<16x32xf32> -> vector<16x32xf32>
    %c0_8 = arith.constant 0 : index
    %c0_9 = arith.constant 0 : index
    %c0_10 = arith.constant 0 : index
    %8 = vector.load %arg4[%c0_8, %c0_9, %c0_10] : memref<2x1x32xf32, #tpu.memory_space<vmem>>, vector<1x1x32xf32>
    %9 = vector.shape_cast %8 : vector<1x1x32xf32> to vector<1x32xf32>
    %10 = vector.broadcast %9 : vector<1x32xf32> to vector<16x32xf32>
    %11 = arith.addf %7, %10 : vector<16x32xf32>
    %c0_11 = arith.constant 0 : index
    %c0_12 = arith.constant 0 : index
    %c0_13 = arith.constant 0 : index
    %12 = vector.load %arg5[%c0_11, %c0_12, %c0_13] : memref<2x32x32xbf16, #tpu.memory_space<vmem>>, vector<1x32x32xbf16>
    %13 = vector.shape_cast %12 : vector<1x32x32xbf16> to vector<32x32xbf16>
    %cst_14 = arith.constant dense<0.000000e+00> : vector<16x32xf32>
    %14 = tpu.matmul %4, %13, %cst_14 {dimension_numbers = #tpu.dot_dimension_numbers<[1], [0], [0], [1], [0, 0, 1, 1], [], []>} : vector<16x32xbf16>, vector<32x32xbf16>, vector<16x32xf32> -> vector<16x32xf32>
    %c0_15 = arith.constant 0 : index
    %c0_16 = arith.constant 0 : index
    %c0_17 = arith.constant 0 : index
    %15 = vector.load %arg6[%c0_15, %c0_16, %c0_17] : memref<2x1x32xf32, #tpu.memory_space<vmem>>, vector<1x1x32xf32>
    %16 = vector.shape_cast %15 : vector<1x1x32xf32> to vector<1x32xf32>
    %17 = vector.broadcast %16 : vector<1x32xf32> to vector<16x32xf32>
    %18 = arith.addf %14, %17 : vector<16x32xf32>
    %c0_18 = arith.constant 0 : index
    %c0_19 = arith.constant 0 : index
    %c0_20 = arith.constant 0 : index
    %19 = vector.load %arg7[%c0_18, %c0_19, %c0_20] : memref<2x32x32xbf16, #tpu.memory_space<vmem>>, vector<1x32x32xbf16>
    %20 = vector.shape_cast %19 : vector<1x32x32xbf16> to vector<32x32xbf16>
    %cst_21 = arith.constant dense<0.000000e+00> : vector<16x32xf32>
    %21 = tpu.matmul %4, %20, %cst_21 {dimension_numbers = #tpu.dot_dimension_numbers<[1], [0], [0], [1], [0, 0, 1, 1], [], []>} : vector<16x32xbf16>, vector<32x32xbf16>, vector<16x32xf32> -> vector<16x32xf32>
    %c0_22 = arith.constant 0 : index
    %c0_23 = arith.constant 0 : index
    %c0_24 = arith.constant 0 : index
    %22 = vector.load %arg8[%c0_22, %c0_23, %c0_24] : memref<2x1x32xf32, #tpu.memory_space<vmem>>, vector<1x1x32xf32>
    %23 = vector.shape_cast %22 : vector<1x1x32xf32> to vector<1x32xf32>
    %24 = vector.broadcast %23 : vector<1x32xf32> to vector<16x32xf32>
    %25 = arith.addf %21, %24 : vector<16x32xf32>
    %cst_25 = arith.constant 0.353553385 : f32
    %26 = vector.broadcast %cst_25 : f32 to vector<16x32xf32>
    %27 = arith.mulf %11, %26 : vector<16x32xf32>
    %28 = vector.extract_strided_slice %27 {offsets = [0, 0], sizes = [8, 8], strides = [1, 1]} : vector<16x32xf32> to vector<8x8xf32>
    %29 = vector.extract_strided_slice %27 {offsets = [0, 8], sizes = [8, 8], strides = [1, 1]} : vector<16x32xf32> to vector<8x8xf32>
    %30 = vector.extract_strided_slice %27 {offsets = [0, 16], sizes = [8, 8], strides = [1, 1]} : vector<16x32xf32> to vector<8x8xf32>
    %31 = vector.extract_strided_slice %27 {offsets = [0, 24], sizes = [8, 8], strides = [1, 1]} : vector<16x32xf32> to vector<8x8xf32>
    %32 = vector.extract_strided_slice %27 {offsets = [8, 0], sizes = [8, 8], strides = [1, 1]} : vector<16x32xf32> to vector<8x8xf32>
    %33 = vector.extract_strided_slice %27 {offsets = [8, 8], sizes = [8, 8], strides = [1, 1]} : vector<16x32xf32> to vector<8x8xf32>
    %34 = vector.extract_strided_slice %27 {offsets = [8, 16], sizes = [8, 8], strides = [1, 1]} : vector<16x32xf32> to vector<8x8xf32>
    %35 = vector.extract_strided_slice %27 {offsets = [8, 24], sizes = [8, 8], strides = [1, 1]} : vector<16x32xf32> to vector<8x8xf32>
    %36 = vector.shape_cast %28 : vector<8x8xf32> to vector<1x8x8xf32>
    %37 = vector.shape_cast %29 : vector<8x8xf32> to vector<1x8x8xf32>
    %38 = vector.shape_cast %30 : vector<8x8xf32> to vector<1x8x8xf32>
    %39 = vector.shape_cast %31 : vector<8x8xf32> to vector<1x8x8xf32>
    %40 = vector.shape_cast %32 : vector<8x8xf32> to vector<1x8x8xf32>
    %41 = vector.shape_cast %33 : vector<8x8xf32> to vector<1x8x8xf32>
    %42 = vector.shape_cast %34 : vector<8x8xf32> to vector<1x8x8xf32>
    %43 = vector.shape_cast %35 : vector<8x8xf32> to vector<1x8x8xf32>
    %44 = tpu.concatenate %36, %37, %38, %39, %40, %41, %42, %43 in 0 : vector<1x8x8xf32>, vector<1x8x8xf32>, vector<1x8x8xf32>, vector<1x8x8xf32>, vector<1x8x8xf32>, vector<1x8x8xf32>, vector<1x8x8xf32>, vector<1x8x8xf32> -> vector<8x8x8xf32>
    %45 = arith.truncf %44 : vector<8x8x8xf32> to vector<8x8x8xbf16>
    %46 = vector.extract_strided_slice %18 {offsets = [0, 0], sizes = [8, 8], strides = [1, 1]} : vector<16x32xf32> to vector<8x8xf32>
    %47 = vector.extract_strided_slice %18 {offsets = [0, 8], sizes = [8, 8], strides = [1, 1]} : vector<16x32xf32> to vector<8x8xf32>
    %48 = vector.extract_strided_slice %18 {offsets = [0, 16], sizes = [8, 8], strides = [1, 1]} : vector<16x32xf32> to vector<8x8xf32>
    %49 = vector.extract_strided_slice %18 {offsets = [0, 24], sizes = [8, 8], strides = [1, 1]} : vector<16x32xf32> to vector<8x8xf32>
    %50 = vector.extract_strided_slice %18 {offsets = [8, 0], sizes = [8, 8], strides = [1, 1]} : vector<16x32xf32> to vector<8x8xf32>
    %51 = vector.extract_strided_slice %18 {offsets = [8, 8], sizes = [8, 8], strides = [1, 1]} : vector<16x32xf32> to vector<8x8xf32>
    %52 = vector.extract_strided_slice %18 {offsets = [8, 16], sizes = [8, 8], strides = [1, 1]} : vector<16x32xf32> to vector<8x8xf32>
    %53 = vector.extract_strided_slice %18 {offsets = [8, 24], sizes = [8, 8], strides = [1, 1]} : vector<16x32xf32> to vector<8x8xf32>
    %54 = vector.shape_cast %46 : vector<8x8xf32> to vector<1x8x8xf32>
    %55 = vector.shape_cast %47 : vector<8x8xf32> to vector<1x8x8xf32>
    %56 = vector.shape_cast %48 : vector<8x8xf32> to vector<1x8x8xf32>
    %57 = vector.shape_cast %49 : vector<8x8xf32> to vector<1x8x8xf32>
    %58 = vector.shape_cast %50 : vector<8x8xf32> to vector<1x8x8xf32>
    %59 = vector.shape_cast %51 : vector<8x8xf32> to vector<1x8x8xf32>
    %60 = vector.shape_cast %52 : vector<8x8xf32> to vector<1x8x8xf32>
    %61 = vector.shape_cast %53 : vector<8x8xf32> to vector<1x8x8xf32>
    %62 = tpu.concatenate %54, %55, %56, %57, %58, %59, %60, %61 in 0 : vector<1x8x8xf32>, vector<1x8x8xf32>, vector<1x8x8xf32>, vector<1x8x8xf32>, vector<1x8x8xf32>, vector<1x8x8xf32>, vector<1x8x8xf32>, vector<1x8x8xf32> -> vector<8x8x8xf32>
    %63 = arith.truncf %62 : vector<8x8x8xf32> to vector<8x8x8xbf16>
    %64 = vector.extract_strided_slice %25 {offsets = [0, 0], sizes = [8, 8], strides = [1, 1]} : vector<16x32xf32> to vector<8x8xf32>
    %65 = vector.extract_strided_slice %25 {offsets = [0, 8], sizes = [8, 8], strides = [1, 1]} : vector<16x32xf32> to vector<8x8xf32>
    %66 = vector.extract_strided_slice %25 {offsets = [0, 16], sizes = [8, 8], strides = [1, 1]} : vector<16x32xf32> to vector<8x8xf32>
    %67 = vector.extract_strided_slice %25 {offsets = [0, 24], sizes = [8, 8], strides = [1, 1]} : vector<16x32xf32> to vector<8x8xf32>
    %68 = vector.extract_strided_slice %25 {offsets = [8, 0], sizes = [8, 8], strides = [1, 1]} : vector<16x32xf32> to vector<8x8xf32>
    %69 = vector.extract_strided_slice %25 {offsets = [8, 8], sizes = [8, 8], strides = [1, 1]} : vector<16x32xf32> to vector<8x8xf32>
    %70 = vector.extract_strided_slice %25 {offsets = [8, 16], sizes = [8, 8], strides = [1, 1]} : vector<16x32xf32> to vector<8x8xf32>
    %71 = vector.extract_strided_slice %25 {offsets = [8, 24], sizes = [8, 8], strides = [1, 1]} : vector<16x32xf32> to vector<8x8xf32>
    %72 = vector.shape_cast %64 : vector<8x8xf32> to vector<1x8x8xf32>
    %73 = vector.shape_cast %65 : vector<8x8xf32> to vector<1x8x8xf32>
    %74 = vector.shape_cast %66 : vector<8x8xf32> to vector<1x8x8xf32>
    %75 = vector.shape_cast %67 : vector<8x8xf32> to vector<1x8x8xf32>
    %76 = vector.shape_cast %68 : vector<8x8xf32> to vector<1x8x8xf32>
    %77 = vector.shape_cast %69 : vector<8x8xf32> to vector<1x8x8xf32>
    %78 = vector.shape_cast %70 : vector<8x8xf32> to vector<1x8x8xf32>
    %79 = vector.shape_cast %71 : vector<8x8xf32> to vector<1x8x8xf32>
    %80 = tpu.concatenate %72, %73, %74, %75, %76, %77, %78, %79 in 0 : vector<1x8x8xf32>, vector<1x8x8xf32>, vector<1x8x8xf32>, vector<1x8x8xf32>, vector<1x8x8xf32>, vector<1x8x8xf32>, vector<1x8x8xf32>, vector<1x8x8xf32> -> vector<8x8x8xf32>
    %81 = arith.truncf %80 : vector<8x8x8xf32> to vector<8x8x8xbf16>
    "tpu.trace_start"() <{level = 10 : i32, message = "nqd,nkd->nqk"}> : () -> ()
    %cst_26 = arith.constant dense<0.000000e+00> : vector<8x8x8xf32>
    %82 = tpu.matmul %45, %63, %cst_26 {dimension_numbers = #tpu.dot_dimension_numbers<[2], [2], [1], [1], [0, 0, 0, 1, 1, 1], [0], [0]>} : vector<8x8x8xbf16>, vector<8x8x8xbf16>, vector<8x8x8xf32> -> vector<8x8x8xf32>
    %cst_27 = arith.constant -1.000000e+06 : f32
    "tpu.trace_stop"() : () -> ()
    %83 = vector.shape_cast %3 : vector<8x1x8xi1> to vector<8x1x8xi1>
    %84 = vector.broadcast %83 : vector<8x1x8xi1> to vector<8x8x8xi1>
    %85 = vector.broadcast %cst_27 : f32 to vector<8x8x8xf32>
    %86 = arith.select %84, %82, %85 : vector<8x8x8xi1>, vector<8x8x8xf32>
    %cst_28 = arith.constant dense<0xFF800000> : vector<8x8xf32>
    %87 = vector.multi_reduction <maximumf>, %86, %cst_28 [2] : vector<8x8x8xf32> to vector<8x8xf32>
    %88 = vector.shape_cast %87 : vector<8x8xf32> to vector<8x8x1xf32>
    %89 = vector.broadcast %88 : vector<8x8x1xf32> to vector<8x8x8xf32>
    %90 = arith.subf %86, %89 : vector<8x8x8xf32>
    %91 = math.exp %90 : vector<8x8x8xf32>
    %cst_29 = arith.constant dense<0.000000e+00> : vector<8x8xf32>
    %92 = vector.multi_reduction <add>, %91, %cst_29 [2] : vector<8x8x8xf32> to vector<8x8xf32>
    %93 = vector.shape_cast %92 : vector<8x8xf32> to vector<8x8x1xf32>
    %94 = tpu.reciprocal %93 {approx = true} : vector<8x8x1xf32> -> vector<8x8x1xf32>
    %95 = vector.broadcast %94 : vector<8x8x1xf32> to vector<8x8x8xf32>
    %96 = arith.mulf %91, %95 : vector<8x8x8xf32>
    %97 = arith.truncf %96 : vector<8x8x8xf32> to vector<8x8x8xbf16>
    "tpu.trace_start"() <{level = 10 : i32, message = "nqk,nkd->nqd"}> : () -> ()
    %cst_30 = arith.constant dense<0.000000e+00> : vector<8x8x8xf32>
    %98 = tpu.matmul %97, %81, %cst_30 {dimension_numbers = #tpu.dot_dimension_numbers<[2], [1], [1], [2], [0, 0, 0, 1, 1, 2], [0], [0]>} : vector<8x8x8xbf16>, vector<8x8x8xbf16>, vector<8x8x8xf32> -> vector<8x8x8xf32>
    "tpu.trace_stop"() : () -> ()
    %99 = vector.extract_strided_slice %98 {offsets = [0, 0, 0], sizes = [1, 8, 8], strides = [1, 1, 1]} : vector<8x8x8xf32> to vector<1x8x8xf32>
    %100 = vector.shape_cast %99 : vector<1x8x8xf32> to vector<8x8xf32>
    %101 = vector.extract_strided_slice %98 {offsets = [1, 0, 0], sizes = [1, 8, 8], strides = [1, 1, 1]} : vector<8x8x8xf32> to vector<1x8x8xf32>
    %102 = vector.shape_cast %101 : vector<1x8x8xf32> to vector<8x8xf32>
    %103 = vector.extract_strided_slice %98 {offsets = [2, 0, 0], sizes = [1, 8, 8], strides = [1, 1, 1]} : vector<8x8x8xf32> to vector<1x8x8xf32>
    %104 = vector.shape_cast %103 : vector<1x8x8xf32> to vector<8x8xf32>
    %105 = vector.extract_strided_slice %98 {offsets = [3, 0, 0], sizes = [1, 8, 8], strides = [1, 1, 1]} : vector<8x8x8xf32> to vector<1x8x8xf32>
    %106 = vector.shape_cast %105 : vector<1x8x8xf32> to vector<8x8xf32>
    %107 = tpu.concatenate %100, %102, %104, %106 in 1 : vector<8x8xf32>, vector<8x8xf32>, vector<8x8xf32>, vector<8x8xf32> -> vector<8x32xf32>
    %108 = vector.extract_strided_slice %98 {offsets = [4, 0, 0], sizes = [1, 8, 8], strides = [1, 1, 1]} : vector<8x8x8xf32> to vector<1x8x8xf32>
    %109 = vector.shape_cast %108 : vector<1x8x8xf32> to vector<8x8xf32>
    %110 = vector.extract_strided_slice %98 {offsets = [5, 0, 0], sizes = [1, 8, 8], strides = [1, 1, 1]} : vector<8x8x8xf32> to vector<1x8x8xf32>
    %111 = vector.shape_cast %110 : vector<1x8x8xf32> to vector<8x8xf32>
    %112 = vector.extract_strided_slice %98 {offsets = [6, 0, 0], sizes = [1, 8, 8], strides = [1, 1, 1]} : vector<8x8x8xf32> to vector<1x8x8xf32>
    %113 = vector.shape_cast %112 : vector<1x8x8xf32> to vector<8x8xf32>
    %114 = vector.extract_strided_slice %98 {offsets = [7, 0, 0], sizes = [1, 8, 8], strides = [1, 1, 1]} : vector<8x8x8xf32> to vector<1x8x8xf32>
    %115 = vector.shape_cast %114 : vector<1x8x8xf32> to vector<8x8xf32>
    %116 = tpu.concatenate %109, %111, %113, %115 in 1 : vector<8x8xf32>, vector<8x8xf32>, vector<8x8xf32>, vector<8x8xf32> -> vector<8x32xf32>
    %117 = tpu.concatenate %107, %116 in 0 : vector<8x32xf32>, vector<8x32xf32> -> vector<16x32xf32>
    %118 = arith.truncf %117 : vector<16x32xf32> to vector<16x32xbf16>
    %c0_31 = arith.constant 0 : index
    %c0_32 = arith.constant 0 : index
    %c0_33 = arith.constant 0 : index
    %119 = vector.load %arg9[%c0_31, %c0_32, %c0_33] : memref<2x32x32xbf16, #tpu.memory_space<vmem>>, vector<1x32x32xbf16>
    %120 = vector.shape_cast %119 : vector<1x32x32xbf16> to vector<32x32xbf16>
    %cst_34 = arith.constant dense<0.000000e+00> : vector<16x32xf32>
    %121 = tpu.matmul %118, %120, %cst_34 {dimension_numbers = #tpu.dot_dimension_numbers<[1], [0], [0], [1], [0, 0, 1, 1], [], []>} : vector<16x32xbf16>, vector<32x32xbf16>, vector<16x32xf32> -> vector<16x32xf32>
    %c0_35 = arith.constant 0 : index
    %c0_36 = arith.constant 0 : index
    %c0_37 = arith.constant 0 : index
    %122 = vector.load %arg10[%c0_35, %c0_36, %c0_37] : memref<2x1x32xf32, #tpu.memory_space<vmem>>, vector<1x1x32xf32>
    %123 = vector.shape_cast %122 : vector<1x1x32xf32> to vector<1x32xf32>
    %124 = vector.broadcast %123 : vector<1x32xf32> to vector<16x32xf32>
    %125 = arith.addf %121, %124 : vector<16x32xf32>
    %126 = arith.addf %0, %125 : vector<16x32xf32>
    %c0_38 = arith.constant 0 : index
    %c0_39 = arith.constant 0 : index
    %c0_40 = arith.constant 0 : index
    %127 = vector.load %arg11[%c0_38, %c0_39, %c0_40] : memref<2x1x32xf32, #tpu.memory_space<vmem>>, vector<1x1x32xf32>
    %128 = vector.shape_cast %127 : vector<1x1x32xf32> to vector<1x32xf32>
    %c0_41 = arith.constant 0 : index
    %c0_42 = arith.constant 0 : index
    %c0_43 = arith.constant 0 : index
    %129 = vector.load %arg12[%c0_41, %c0_42, %c0_43] : memref<2x1x32xf32, #tpu.memory_space<vmem>>, vector<1x1x32xf32>
    %130 = vector.shape_cast %129 : vector<1x1x32xf32> to vector<1x32xf32>
    %cst_44 = arith.constant dense<0.000000e+00> : vector<16xf32>
    %131 = vector.multi_reduction <add>, %126, %cst_44 [1] : vector<16x32xf32> to vector<16xf32>
    %132 = vector.shape_cast %131 : vector<16xf32> to vector<16x1xf32>
    %cst_45 = arith.constant 3.200000e+01 : f32
    %133 = vector.broadcast %cst_45 : f32 to vector<16x1xf32>
    %134 = arith.divf %132, %133 : vector<16x1xf32>
    %135 = vector.broadcast %134 : vector<16x1xf32> to vector<16x32xf32>
    %136 = arith.subf %126, %135 : vector<16x32xf32>
    %137 = arith.mulf %136, %136 : vector<16x32xf32>
    %cst_46 = arith.constant dense<0.000000e+00> : vector<16xf32>
    %138 = vector.multi_reduction <add>, %137, %cst_46 [1] : vector<16x32xf32> to vector<16xf32>
    %139 = vector.shape_cast %138 : vector<16xf32> to vector<16x1xf32>
    %cst_47 = arith.constant 3.200000e+01 : f32
    %140 = vector.broadcast %cst_47 : f32 to vector<16x1xf32>
    %141 = arith.divf %139, %140 : vector<16x1xf32>
    %142 = vector.broadcast %134 : vector<16x1xf32> to vector<16x32xf32>
    %143 = arith.subf %126, %142 : vector<16x32xf32>
    %cst_48 = arith.constant 9.99999974E-6 : f32
    %144 = vector.broadcast %cst_48 : f32 to vector<16x1xf32>
    %145 = arith.addf %141, %144 : vector<16x1xf32>
    %146 = math.rsqrt %145 : vector<16x1xf32>
    %147 = vector.broadcast %146 : vector<16x1xf32> to vector<16x32xf32>
    %148 = arith.mulf %143, %147 : vector<16x32xf32>
    %149 = vector.broadcast %128 : vector<1x32xf32> to vector<16x32xf32>
    %150 = arith.mulf %148, %149 : vector<16x32xf32>
    %151 = vector.broadcast %130 : vector<1x32xf32> to vector<16x32xf32>
    %152 = arith.addf %150, %151 : vector<16x32xf32>
    %153 = arith.truncf %152 : vector<16x32xf32> to vector<16x32xbf16>
    %c0_49 = arith.constant 0 : index
    %c0_50 = arith.constant 0 : index
    %c0_51 = arith.constant 0 : index
    %154 = vector.load %arg13[%c0_49, %c0_50, %c0_51] : memref<2x32x64xbf16, #tpu.memory_space<vmem>>, vector<1x32x64xbf16>
    %155 = vector.shape_cast %154 : vector<1x32x64xbf16> to vector<32x64xbf16>
    %cst_52 = arith.constant dense<0.000000e+00> : vector<16x64xf32>
    %156 = tpu.matmul %153, %155, %cst_52 {dimension_numbers = #tpu.dot_dimension_numbers<[1], [0], [0], [1], [0, 0, 1, 1], [], []>} : vector<16x32xbf16>, vector<32x64xbf16>, vector<16x64xf32> -> vector<16x64xf32>
    %c0_53 = arith.constant 0 : index
    %c0_54 = arith.constant 0 : index
    %c0_55 = arith.constant 0 : index
    %157 = vector.load %arg14[%c0_53, %c0_54, %c0_55] : memref<2x1x64xf32, #tpu.memory_space<vmem>>, vector<1x1x64xf32>
    %158 = vector.shape_cast %157 : vector<1x1x64xf32> to vector<1x64xf32>
    %159 = vector.broadcast %158 : vector<1x64xf32> to vector<16x64xf32>
    %160 = arith.addf %156, %159 : vector<16x64xf32>
    %cst_56 = arith.constant 0.000000e+00 : f32
    %161 = vector.broadcast %cst_56 : f32 to vector<16x64xf32>
    %162 = arith.maximumf %160, %161 : vector<16x64xf32>
    %163 = arith.truncf %162 : vector<16x64xf32> to vector<16x64xbf16>
    %c0_57 = arith.constant 0 : index
    %c0_58 = arith.constant 0 : index
    %c0_59 = arith.constant 0 : index
    %164 = vector.load %arg15[%c0_57, %c0_58, %c0_59] : memref<2x64x32xbf16, #tpu.memory_space<vmem>>, vector<1x64x32xbf16>
    %165 = vector.shape_cast %164 : vector<1x64x32xbf16> to vector<64x32xbf16>
    %cst_60 = arith.constant dense<0.000000e+00> : vector<16x32xf32>
    %166 = tpu.matmul %163, %165, %cst_60 {dimension_numbers = #tpu.dot_dimension_numbers<[1], [0], [0], [1], [0, 0, 1, 1], [], []>} : vector<16x64xbf16>, vector<64x32xbf16>, vector<16x32xf32> -> vector<16x32xf32>
    %c0_61 = arith.constant 0 : index
    %c0_62 = arith.constant 0 : index
    %c0_63 = arith.constant 0 : index
    %167 = vector.load %arg16[%c0_61, %c0_62, %c0_63] : memref<2x1x32xf32, #tpu.memory_space<vmem>>, vector<1x1x32xf32>
    %168 = vector.shape_cast %167 : vector<1x1x32xf32> to vector<1x32xf32>
    %169 = vector.broadcast %168 : vector<1x32xf32> to vector<16x32xf32>
    %170 = arith.addf %166, %169 : vector<16x32xf32>
    %171 = arith.addf %152, %170 : vector<16x32xf32>
    %c0_64 = arith.constant 0 : index
    %c0_65 = arith.constant 0 : index
    %c0_66 = arith.constant 0 : index
    %172 = vector.load %arg17[%c0_64, %c0_65, %c0_66] : memref<2x1x32xf32, #tpu.memory_space<vmem>>, vector<1x1x32xf32>
    %173 = vector.shape_cast %172 : vector<1x1x32xf32> to vector<1x32xf32>
    %c0_67 = arith.constant 0 : index
    %c0_68 = arith.constant 0 : index
    %c0_69 = arith.constant 0 : index
    %174 = vector.load %arg18[%c0_67, %c0_68, %c0_69] : memref<2x1x32xf32, #tpu.memory_space<vmem>>, vector<1x1x32xf32>
    %175 = vector.shape_cast %174 : vector<1x1x32xf32> to vector<1x32xf32>
    %cst_70 = arith.constant dense<0.000000e+00> : vector<16xf32>
    %176 = vector.multi_reduction <add>, %171, %cst_70 [1] : vector<16x32xf32> to vector<16xf32>
    %177 = vector.shape_cast %176 : vector<16xf32> to vector<16x1xf32>
    %cst_71 = arith.constant 3.200000e+01 : f32
    %178 = vector.broadcast %cst_71 : f32 to vector<16x1xf32>
    %179 = arith.divf %177, %178 : vector<16x1xf32>
    %180 = vector.broadcast %179 : vector<16x1xf32> to vector<16x32xf32>
    %181 = arith.subf %171, %180 : vector<16x32xf32>
    %182 = arith.mulf %181, %181 : vector<16x32xf32>
    %cst_72 = arith.constant dense<0.000000e+00> : vector<16xf32>
    %183 = vector.multi_reduction <add>, %182, %cst_72 [1] : vector<16x32xf32> to vector<16xf32>
    %184 = vector.shape_cast %183 : vector<16xf32> to vector<16x1xf32>
    %cst_73 = arith.constant 3.200000e+01 : f32
    %185 = vector.broadcast %cst_73 : f32 to vector<16x1xf32>
    %186 = arith.divf %184, %185 : vector<16x1xf32>
    %187 = vector.broadcast %179 : vector<16x1xf32> to vector<16x32xf32>
    %188 = arith.subf %171, %187 : vector<16x32xf32>
    %cst_74 = arith.constant 9.99999974E-6 : f32
    %189 = vector.broadcast %cst_74 : f32 to vector<16x1xf32>
    %190 = arith.addf %186, %189 : vector<16x1xf32>
    %191 = math.rsqrt %190 : vector<16x1xf32>
    %192 = vector.broadcast %191 : vector<16x1xf32> to vector<16x32xf32>
    %193 = arith.mulf %188, %192 : vector<16x32xf32>
    %194 = vector.broadcast %173 : vector<1x32xf32> to vector<16x32xf32>
    %195 = arith.mulf %193, %194 : vector<16x32xf32>
    %196 = vector.broadcast %175 : vector<1x32xf32> to vector<16x32xf32>
    %197 = arith.addf %195, %196 : vector<16x32xf32>
    %198 = arith.truncf %197 : vector<16x32xf32> to vector<16x32xbf16>
    %c1 = arith.constant 1 : index
    %c0_75 = arith.constant 0 : index
    %c0_76 = arith.constant 0 : index
    %199 = vector.load %arg3[%c1, %c0_75, %c0_76] : memref<2x32x32xbf16, #tpu.memory_space<vmem>>, vector<1x32x32xbf16>
    %200 = vector.shape_cast %199 : vector<1x32x32xbf16> to vector<32x32xbf16>
    %cst_77 = arith.constant dense<0.000000e+00> : vector<16x32xf32>
    %201 = tpu.matmul %198, %200, %cst_77 {dimension_numbers = #tpu.dot_dimension_numbers<[1], [0], [0], [1], [0, 0, 1, 1], [], []>} : vector<16x32xbf16>, vector<32x32xbf16>, vector<16x32xf32> -> vector<16x32xf32>
    %c1_78 = arith.constant 1 : index
    %c0_79 = arith.constant 0 : index
    %c0_80 = arith.constant 0 : index
    %202 = vector.load %arg4[%c1_78, %c0_79, %c0_80] : memref<2x1x32xf32, #tpu.memory_space<vmem>>, vector<1x1x32xf32>
    %203 = vector.shape_cast %202 : vector<1x1x32xf32> to vector<1x32xf32>
    %204 = vector.broadcast %203 : vector<1x32xf32> to vector<16x32xf32>
    %205 = arith.addf %201, %204 : vector<16x32xf32>
    %c1_81 = arith.constant 1 : index
    %c0_82 = arith.constant 0 : index
    %c0_83 = arith.constant 0 : index
    %206 = vector.load %arg5[%c1_81, %c0_82, %c0_83] : memref<2x32x32xbf16, #tpu.memory_space<vmem>>, vector<1x32x32xbf16>
    %207 = vector.shape_cast %206 : vector<1x32x32xbf16> to vector<32x32xbf16>
    %cst_84 = arith.constant dense<0.000000e+00> : vector<16x32xf32>
    %208 = tpu.matmul %198, %207, %cst_84 {dimension_numbers = #tpu.dot_dimension_numbers<[1], [0], [0], [1], [0, 0, 1, 1], [], []>} : vector<16x32xbf16>, vector<32x32xbf16>, vector<16x32xf32> -> vector<16x32xf32>
    %c1_85 = arith.constant 1 : index
    %c0_86 = arith.constant 0 : index
    %c0_87 = arith.constant 0 : index
    %209 = vector.load %arg6[%c1_85, %c0_86, %c0_87] : memref<2x1x32xf32, #tpu.memory_space<vmem>>, vector<1x1x32xf32>
    %210 = vector.shape_cast %209 : vector<1x1x32xf32> to vector<1x32xf32>
    %211 = vector.broadcast %210 : vector<1x32xf32> to vector<16x32xf32>
    %212 = arith.addf %208, %211 : vector<16x32xf32>
    %c1_88 = arith.constant 1 : index
    %c0_89 = arith.constant 0 : index
    %c0_90 = arith.constant 0 : index
    %213 = vector.load %arg7[%c1_88, %c0_89, %c0_90] : memref<2x32x32xbf16, #tpu.memory_space<vmem>>, vector<1x32x32xbf16>
    %214 = vector.shape_cast %213 : vector<1x32x32xbf16> to vector<32x32xbf16>
    %cst_91 = arith.constant dense<0.000000e+00> : vector<16x32xf32>
    %215 = tpu.matmul %198, %214, %cst_91 {dimension_numbers = #tpu.dot_dimension_numbers<[1], [0], [0], [1], [0, 0, 1, 1], [], []>} : vector<16x32xbf16>, vector<32x32xbf16>, vector<16x32xf32> -> vector<16x32xf32>
    %c1_92 = arith.constant 1 : index
    %c0_93 = arith.constant 0 : index
    %c0_94 = arith.constant 0 : index
    %216 = vector.load %arg8[%c1_92, %c0_93, %c0_94] : memref<2x1x32xf32, #tpu.memory_space<vmem>>, vector<1x1x32xf32>
    %217 = vector.shape_cast %216 : vector<1x1x32xf32> to vector<1x32xf32>
    %218 = vector.broadcast %217 : vector<1x32xf32> to vector<16x32xf32>
    %219 = arith.addf %215, %218 : vector<16x32xf32>
    %cst_95 = arith.constant 0.353553385 : f32
    %220 = vector.broadcast %cst_95 : f32 to vector<16x32xf32>
    %221 = arith.mulf %205, %220 : vector<16x32xf32>
    %222 = vector.extract_strided_slice %221 {offsets = [0, 0], sizes = [8, 8], strides = [1, 1]} : vector<16x32xf32> to vector<8x8xf32>
    %223 = vector.extract_strided_slice %221 {offsets = [0, 8], sizes = [8, 8], strides = [1, 1]} : vector<16x32xf32> to vector<8x8xf32>
    %224 = vector.extract_strided_slice %221 {offsets = [0, 16], sizes = [8, 8], strides = [1, 1]} : vector<16x32xf32> to vector<8x8xf32>
    %225 = vector.extract_strided_slice %221 {offsets = [0, 24], sizes = [8, 8], strides = [1, 1]} : vector<16x32xf32> to vector<8x8xf32>
    %226 = vector.extract_strided_slice %221 {offsets = [8, 0], sizes = [8, 8], strides = [1, 1]} : vector<16x32xf32> to vector<8x8xf32>
    %227 = vector.extract_strided_slice %221 {offsets = [8, 8], sizes = [8, 8], strides = [1, 1]} : vector<16x32xf32> to vector<8x8xf32>
    %228 = vector.extract_strided_slice %221 {offsets = [8, 16], sizes = [8, 8], strides = [1, 1]} : vector<16x32xf32> to vector<8x8xf32>
    %229 = vector.extract_strided_slice %221 {offsets = [8, 24], sizes = [8, 8], strides = [1, 1]} : vector<16x32xf32> to vector<8x8xf32>
    %230 = vector.shape_cast %222 : vector<8x8xf32> to vector<1x8x8xf32>
    %231 = vector.shape_cast %223 : vector<8x8xf32> to vector<1x8x8xf32>
    %232 = vector.shape_cast %224 : vector<8x8xf32> to vector<1x8x8xf32>
    %233 = vector.shape_cast %225 : vector<8x8xf32> to vector<1x8x8xf32>
    %234 = vector.shape_cast %226 : vector<8x8xf32> to vector<1x8x8xf32>
    %235 = vector.shape_cast %227 : vector<8x8xf32> to vector<1x8x8xf32>
    %236 = vector.shape_cast %228 : vector<8x8xf32> to vector<1x8x8xf32>
    %237 = vector.shape_cast %229 : vector<8x8xf32> to vector<1x8x8xf32>
    %238 = tpu.concatenate %230, %231, %232, %233, %234, %235, %236, %237 in 0 : vector<1x8x8xf32>, vector<1x8x8xf32>, vector<1x8x8xf32>, vector<1x8x8xf32>, vector<1x8x8xf32>, vector<1x8x8xf32>, vector<1x8x8xf32>, vector<1x8x8xf32> -> vector<8x8x8xf32>
    %239 = arith.truncf %238 : vector<8x8x8xf32> to vector<8x8x8xbf16>
    %240 = vector.extract_strided_slice %212 {offsets = [0, 0], sizes = [8, 8], strides = [1, 1]} : vector<16x32xf32> to vector<8x8xf32>
    %241 = vector.extract_strided_slice %212 {offsets = [0, 8], sizes = [8, 8], strides = [1, 1]} : vector<16x32xf32> to vector<8x8xf32>
    %242 = vector.extract_strided_slice %212 {offsets = [0, 16], sizes = [8, 8], strides = [1, 1]} : vector<16x32xf32> to vector<8x8xf32>
    %243 = vector.extract_strided_slice %212 {offsets = [0, 24], sizes = [8, 8], strides = [1, 1]} : vector<16x32xf32> to vector<8x8xf32>
    %244 = vector.extract_strided_slice %212 {offsets = [8, 0], sizes = [8, 8], strides = [1, 1]} : vector<16x32xf32> to vector<8x8xf32>
    %245 = vector.extract_strided_slice %212 {offsets = [8, 8], sizes = [8, 8], strides = [1, 1]} : vector<16x32xf32> to vector<8x8xf32>
    %246 = vector.extract_strided_slice %212 {offsets = [8, 16], sizes = [8, 8], strides = [1, 1]} : vector<16x32xf32> to vector<8x8xf32>
    %247 = vector.extract_strided_slice %212 {offsets = [8, 24], sizes = [8, 8], strides = [1, 1]} : vector<16x32xf32> to vector<8x8xf32>
    %248 = vector.shape_cast %240 : vector<8x8xf32> to vector<1x8x8xf32>
    %249 = vector.shape_cast %241 : vector<8x8xf32> to vector<1x8x8xf32>
    %250 = vector.shape_cast %242 : vector<8x8xf32> to vector<1x8x8xf32>
    %251 = vector.shape_cast %243 : vector<8x8xf32> to vector<1x8x8xf32>
    %252 = vector.shape_cast %244 : vector<8x8xf32> to vector<1x8x8xf32>
    %253 = vector.shape_cast %245 : vector<8x8xf32> to vector<1x8x8xf32>
    %254 = vector.shape_cast %246 : vector<8x8xf32> to vector<1x8x8xf32>
    %255 = vector.shape_cast %247 : vector<8x8xf32> to vector<1x8x8xf32>
    %256 = tpu.concatenate %248, %249, %250, %251, %252, %253, %254, %255 in 0 : vector<1x8x8xf32>, vector<1x8x8xf32>, vector<1x8x8xf32>, vector<1x8x8xf32>, vector<1x8x8xf32>, vector<1x8x8xf32>, vector<1x8x8xf32>, vector<1x8x8xf32> -> vector<8x8x8xf32>
    %257 = arith.truncf %256 : vector<8x8x8xf32> to vector<8x8x8xbf16>
    %258 = vector.extract_strided_slice %219 {offsets = [0, 0], sizes = [8, 8], strides = [1, 1]} : vector<16x32xf32> to vector<8x8xf32>
    %259 = vector.extract_strided_slice %219 {offsets = [0, 8], sizes = [8, 8], strides = [1, 1]} : vector<16x32xf32> to vector<8x8xf32>
    %260 = vector.extract_strided_slice %219 {offsets = [0, 16], sizes = [8, 8], strides = [1, 1]} : vector<16x32xf32> to vector<8x8xf32>
    %261 = vector.extract_strided_slice %219 {offsets = [0, 24], sizes = [8, 8], strides = [1, 1]} : vector<16x32xf32> to vector<8x8xf32>
    %262 = vector.extract_strided_slice %219 {offsets = [8, 0], sizes = [8, 8], strides = [1, 1]} : vector<16x32xf32> to vector<8x8xf32>
    %263 = vector.extract_strided_slice %219 {offsets = [8, 8], sizes = [8, 8], strides = [1, 1]} : vector<16x32xf32> to vector<8x8xf32>
    %264 = vector.extract_strided_slice %219 {offsets = [8, 16], sizes = [8, 8], strides = [1, 1]} : vector<16x32xf32> to vector<8x8xf32>
    %265 = vector.extract_strided_slice %219 {offsets = [8, 24], sizes = [8, 8], strides = [1, 1]} : vector<16x32xf32> to vector<8x8xf32>
    %266 = vector.shape_cast %258 : vector<8x8xf32> to vector<1x8x8xf32>
    %267 = vector.shape_cast %259 : vector<8x8xf32> to vector<1x8x8xf32>
    %268 = vector.shape_cast %260 : vector<8x8xf32> to vector<1x8x8xf32>
    %269 = vector.shape_cast %261 : vector<8x8xf32> to vector<1x8x8xf32>
    %270 = vector.shape_cast %262 : vector<8x8xf32> to vector<1x8x8xf32>
    %271 = vector.shape_cast %263 : vector<8x8xf32> to vector<1x8x8xf32>
    %272 = vector.shape_cast %264 : vector<8x8xf32> to vector<1x8x8xf32>
    %273 = vector.shape_cast %265 : vector<8x8xf32> to vector<1x8x8xf32>
    %274 = tpu.concatenate %266, %267, %268, %269, %270, %271, %272, %273 in 0 : vector<1x8x8xf32>, vector<1x8x8xf32>, vector<1x8x8xf32>, vector<1x8x8xf32>, vector<1x8x8xf32>, vector<1x8x8xf32>, vector<1x8x8xf32>, vector<1x8x8xf32> -> vector<8x8x8xf32>
    %275 = arith.truncf %274 : vector<8x8x8xf32> to vector<8x8x8xbf16>
    "tpu.trace_start"() <{level = 10 : i32, message = "nqd,nkd->nqk"}> : () -> ()
    %cst_96 = arith.constant dense<0.000000e+00> : vector<8x8x8xf32>
    %276 = tpu.matmul %239, %257, %cst_96 {dimension_numbers = #tpu.dot_dimension_numbers<[2], [2], [1], [1], [0, 0, 0, 1, 1, 1], [0], [0]>} : vector<8x8x8xbf16>, vector<8x8x8xbf16>, vector<8x8x8xf32> -> vector<8x8x8xf32>
    %cst_97 = arith.constant -1.000000e+06 : f32
    "tpu.trace_stop"() : () -> ()
    %277 = vector.shape_cast %3 : vector<8x1x8xi1> to vector<8x1x8xi1>
    %278 = vector.broadcast %277 : vector<8x1x8xi1> to vector<8x8x8xi1>
    %279 = vector.broadcast %cst_97 : f32 to vector<8x8x8xf32>
    %280 = arith.select %278, %276, %279 : vector<8x8x8xi1>, vector<8x8x8xf32>
    %cst_98 = arith.constant dense<0xFF800000> : vector<8x8xf32>
    %281 = vector.multi_reduction <maximumf>, %280, %cst_98 [2] : vector<8x8x8xf32> to vector<8x8xf32>
    %282 = vector.shape_cast %281 : vector<8x8xf32> to vector<8x8x1xf32>
    %283 = vector.broadcast %282 : vector<8x8x1xf32> to vector<8x8x8xf32>
    %284 = arith.subf %280, %283 : vector<8x8x8xf32>
    %285 = math.exp %284 : vector<8x8x8xf32>
    %cst_99 = arith.constant dense<0.000000e+00> : vector<8x8xf32>
    %286 = vector.multi_reduction <add>, %285, %cst_99 [2] : vector<8x8x8xf32> to vector<8x8xf32>
    %287 = vector.shape_cast %286 : vector<8x8xf32> to vector<8x8x1xf32>
    %288 = tpu.reciprocal %287 {approx = true} : vector<8x8x1xf32> -> vector<8x8x1xf32>
    %289 = vector.broadcast %288 : vector<8x8x1xf32> to vector<8x8x8xf32>
    %290 = arith.mulf %285, %289 : vector<8x8x8xf32>
    %291 = arith.truncf %290 : vector<8x8x8xf32> to vector<8x8x8xbf16>
    "tpu.trace_start"() <{level = 10 : i32, message = "nqk,nkd->nqd"}> : () -> ()
    %cst_100 = arith.constant dense<0.000000e+00> : vector<8x8x8xf32>
    %292 = tpu.matmul %291, %275, %cst_100 {dimension_numbers = #tpu.dot_dimension_numbers<[2], [1], [1], [2], [0, 0, 0, 1, 1, 2], [0], [0]>} : vector<8x8x8xbf16>, vector<8x8x8xbf16>, vector<8x8x8xf32> -> vector<8x8x8xf32>
    "tpu.trace_stop"() : () -> ()
    %293 = vector.extract_strided_slice %292 {offsets = [0, 0, 0], sizes = [1, 8, 8], strides = [1, 1, 1]} : vector<8x8x8xf32> to vector<1x8x8xf32>
    %294 = vector.shape_cast %293 : vector<1x8x8xf32> to vector<8x8xf32>
    %295 = vector.extract_strided_slice %292 {offsets = [1, 0, 0], sizes = [1, 8, 8], strides = [1, 1, 1]} : vector<8x8x8xf32> to vector<1x8x8xf32>
    %296 = vector.shape_cast %295 : vector<1x8x8xf32> to vector<8x8xf32>
    %297 = vector.extract_strided_slice %292 {offsets = [2, 0, 0], sizes = [1, 8, 8], strides = [1, 1, 1]} : vector<8x8x8xf32> to vector<1x8x8xf32>
    %298 = vector.shape_cast %297 : vector<1x8x8xf32> to vector<8x8xf32>
    %299 = vector.extract_strided_slice %292 {offsets = [3, 0, 0], sizes = [1, 8, 8], strides = [1, 1, 1]} : vector<8x8x8xf32> to vector<1x8x8xf32>
    %300 = vector.shape_cast %299 : vector<1x8x8xf32> to vector<8x8xf32>
    %301 = tpu.concatenate %294, %296, %298, %300 in 1 : vector<8x8xf32>, vector<8x8xf32>, vector<8x8xf32>, vector<8x8xf32> -> vector<8x32xf32>
    %302 = vector.extract_strided_slice %292 {offsets = [4, 0, 0], sizes = [1, 8, 8], strides = [1, 1, 1]} : vector<8x8x8xf32> to vector<1x8x8xf32>
    %303 = vector.shape_cast %302 : vector<1x8x8xf32> to vector<8x8xf32>
    %304 = vector.extract_strided_slice %292 {offsets = [5, 0, 0], sizes = [1, 8, 8], strides = [1, 1, 1]} : vector<8x8x8xf32> to vector<1x8x8xf32>
    %305 = vector.shape_cast %304 : vector<1x8x8xf32> to vector<8x8xf32>
    %306 = vector.extract_strided_slice %292 {offsets = [6, 0, 0], sizes = [1, 8, 8], strides = [1, 1, 1]} : vector<8x8x8xf32> to vector<1x8x8xf32>
    %307 = vector.shape_cast %306 : vector<1x8x8xf32> to vector<8x8xf32>
    %308 = vector.extract_strided_slice %292 {offsets = [7, 0, 0], sizes = [1, 8, 8], strides = [1, 1, 1]} : vector<8x8x8xf32> to vector<1x8x8xf32>
    %309 = vector.shape_cast %308 : vector<1x8x8xf32> to vector<8x8xf32>
    %310 = tpu.concatenate %303, %305, %307, %309 in 1 : vector<8x8xf32>, vector<8x8xf32>, vector<8x8xf32>, vector<8x8xf32> -> vector<8x32xf32>
    %311 = tpu.concatenate %301, %310 in 0 : vector<8x32xf32>, vector<8x32xf32> -> vector<16x32xf32>
    %312 = arith.truncf %311 : vector<16x32xf32> to vector<16x32xbf16>
    %c1_101 = arith.constant 1 : index
    %c0_102 = arith.constant 0 : index
    %c0_103 = arith.constant 0 : index
    %313 = vector.load %arg9[%c1_101, %c0_102, %c0_103] : memref<2x32x32xbf16, #tpu.memory_space<vmem>>, vector<1x32x32xbf16>
    %314 = vector.shape_cast %313 : vector<1x32x32xbf16> to vector<32x32xbf16>
    %cst_104 = arith.constant dense<0.000000e+00> : vector<16x32xf32>
    %315 = tpu.matmul %312, %314, %cst_104 {dimension_numbers = #tpu.dot_dimension_numbers<[1], [0], [0], [1], [0, 0, 1, 1], [], []>} : vector<16x32xbf16>, vector<32x32xbf16>, vector<16x32xf32> -> vector<16x32xf32>
    %c1_105 = arith.constant 1 : index
    %c0_106 = arith.constant 0 : index
    %c0_107 = arith.constant 0 : index
    %316 = vector.load %arg10[%c1_105, %c0_106, %c0_107] : memref<2x1x32xf32, #tpu.memory_space<vmem>>, vector<1x1x32xf32>
    %317 = vector.shape_cast %316 : vector<1x1x32xf32> to vector<1x32xf32>
    %318 = vector.broadcast %317 : vector<1x32xf32> to vector<16x32xf32>
    %319 = arith.addf %315, %318 : vector<16x32xf32>
    %320 = arith.addf %197, %319 : vector<16x32xf32>
    %c1_108 = arith.constant 1 : index
    %c0_109 = arith.constant 0 : index
    %c0_110 = arith.constant 0 : index
    %321 = vector.load %arg11[%c1_108, %c0_109, %c0_110] : memref<2x1x32xf32, #tpu.memory_space<vmem>>, vector<1x1x32xf32>
    %322 = vector.shape_cast %321 : vector<1x1x32xf32> to vector<1x32xf32>
    %c1_111 = arith.constant 1 : index
    %c0_112 = arith.constant 0 : index
    %c0_113 = arith.constant 0 : index
    %323 = vector.load %arg12[%c1_111, %c0_112, %c0_113] : memref<2x1x32xf32, #tpu.memory_space<vmem>>, vector<1x1x32xf32>
    %324 = vector.shape_cast %323 : vector<1x1x32xf32> to vector<1x32xf32>
    %cst_114 = arith.constant dense<0.000000e+00> : vector<16xf32>
    %325 = vector.multi_reduction <add>, %320, %cst_114 [1] : vector<16x32xf32> to vector<16xf32>
    %326 = vector.shape_cast %325 : vector<16xf32> to vector<16x1xf32>
    %cst_115 = arith.constant 3.200000e+01 : f32
    %327 = vector.broadcast %cst_115 : f32 to vector<16x1xf32>
    %328 = arith.divf %326, %327 : vector<16x1xf32>
    %329 = vector.broadcast %328 : vector<16x1xf32> to vector<16x32xf32>
    %330 = arith.subf %320, %329 : vector<16x32xf32>
    %331 = arith.mulf %330, %330 : vector<16x32xf32>
    %cst_116 = arith.constant dense<0.000000e+00> : vector<16xf32>
    %332 = vector.multi_reduction <add>, %331, %cst_116 [1] : vector<16x32xf32> to vector<16xf32>
    %333 = vector.shape_cast %332 : vector<16xf32> to vector<16x1xf32>
    %cst_117 = arith.constant 3.200000e+01 : f32
    %334 = vector.broadcast %cst_117 : f32 to vector<16x1xf32>
    %335 = arith.divf %333, %334 : vector<16x1xf32>
    %336 = vector.broadcast %328 : vector<16x1xf32> to vector<16x32xf32>
    %337 = arith.subf %320, %336 : vector<16x32xf32>
    %cst_118 = arith.constant 9.99999974E-6 : f32
    %338 = vector.broadcast %cst_118 : f32 to vector<16x1xf32>
    %339 = arith.addf %335, %338 : vector<16x1xf32>
    %340 = math.rsqrt %339 : vector<16x1xf32>
    %341 = vector.broadcast %340 : vector<16x1xf32> to vector<16x32xf32>
    %342 = arith.mulf %337, %341 : vector<16x32xf32>
    %343 = vector.broadcast %322 : vector<1x32xf32> to vector<16x32xf32>
    %344 = arith.mulf %342, %343 : vector<16x32xf32>
    %345 = vector.broadcast %324 : vector<1x32xf32> to vector<16x32xf32>
    %346 = arith.addf %344, %345 : vector<16x32xf32>
    %347 = arith.truncf %346 : vector<16x32xf32> to vector<16x32xbf16>
    %c1_119 = arith.constant 1 : index
    %c0_120 = arith.constant 0 : index
    %c0_121 = arith.constant 0 : index
    %348 = vector.load %arg13[%c1_119, %c0_120, %c0_121] : memref<2x32x64xbf16, #tpu.memory_space<vmem>>, vector<1x32x64xbf16>
    %349 = vector.shape_cast %348 : vector<1x32x64xbf16> to vector<32x64xbf16>
    %cst_122 = arith.constant dense<0.000000e+00> : vector<16x64xf32>
    %350 = tpu.matmul %347, %349, %cst_122 {dimension_numbers = #tpu.dot_dimension_numbers<[1], [0], [0], [1], [0, 0, 1, 1], [], []>} : vector<16x32xbf16>, vector<32x64xbf16>, vector<16x64xf32> -> vector<16x64xf32>
    %c1_123 = arith.constant 1 : index
    %c0_124 = arith.constant 0 : index
    %c0_125 = arith.constant 0 : index
    %351 = vector.load %arg14[%c1_123, %c0_124, %c0_125] : memref<2x1x64xf32, #tpu.memory_space<vmem>>, vector<1x1x64xf32>
    %352 = vector.shape_cast %351 : vector<1x1x64xf32> to vector<1x64xf32>
    %353 = vector.broadcast %352 : vector<1x64xf32> to vector<16x64xf32>
    %354 = arith.addf %350, %353 : vector<16x64xf32>
    %cst_126 = arith.constant 0.000000e+00 : f32
    %355 = vector.broadcast %cst_126 : f32 to vector<16x64xf32>
    %356 = arith.maximumf %354, %355 : vector<16x64xf32>
    %357 = arith.truncf %356 : vector<16x64xf32> to vector<16x64xbf16>
    %c1_127 = arith.constant 1 : index
    %c0_128 = arith.constant 0 : index
    %c0_129 = arith.constant 0 : index
    %358 = vector.load %arg15[%c1_127, %c0_128, %c0_129] : memref<2x64x32xbf16, #tpu.memory_space<vmem>>, vector<1x64x32xbf16>
    %359 = vector.shape_cast %358 : vector<1x64x32xbf16> to vector<64x32xbf16>
    %cst_130 = arith.constant dense<0.000000e+00> : vector<16x32xf32>
    %360 = tpu.matmul %357, %359, %cst_130 {dimension_numbers = #tpu.dot_dimension_numbers<[1], [0], [0], [1], [0, 0, 1, 1], [], []>} : vector<16x64xbf16>, vector<64x32xbf16>, vector<16x32xf32> -> vector<16x32xf32>
    %c1_131 = arith.constant 1 : index
    %c0_132 = arith.constant 0 : index
    %c0_133 = arith.constant 0 : index
    %361 = vector.load %arg16[%c1_131, %c0_132, %c0_133] : memref<2x1x32xf32, #tpu.memory_space<vmem>>, vector<1x1x32xf32>
    %362 = vector.shape_cast %361 : vector<1x1x32xf32> to vector<1x32xf32>
    %363 = vector.broadcast %362 : vector<1x32xf32> to vector<16x32xf32>
    %364 = arith.addf %360, %363 : vector<16x32xf32>
    %365 = arith.addf %346, %364 : vector<16x32xf32>
    %c1_134 = arith.constant 1 : index
    %c0_135 = arith.constant 0 : index
    %c0_136 = arith.constant 0 : index
    %366 = vector.load %arg17[%c1_134, %c0_135, %c0_136] : memref<2x1x32xf32, #tpu.memory_space<vmem>>, vector<1x1x32xf32>
    %367 = vector.shape_cast %366 : vector<1x1x32xf32> to vector<1x32xf32>
    %c1_137 = arith.constant 1 : index
    %c0_138 = arith.constant 0 : index
    %c0_139 = arith.constant 0 : index
    %368 = vector.load %arg18[%c1_137, %c0_138, %c0_139] : memref<2x1x32xf32, #tpu.memory_space<vmem>>, vector<1x1x32xf32>
    %369 = vector.shape_cast %368 : vector<1x1x32xf32> to vector<1x32xf32>
    %cst_140 = arith.constant dense<0.000000e+00> : vector<16xf32>
    %370 = vector.multi_reduction <add>, %365, %cst_140 [1] : vector<16x32xf32> to vector<16xf32>
    %371 = vector.shape_cast %370 : vector<16xf32> to vector<16x1xf32>
    %cst_141 = arith.constant 3.200000e+01 : f32
    %372 = vector.broadcast %cst_141 : f32 to vector<16x1xf32>
    %373 = arith.divf %371, %372 : vector<16x1xf32>
    %374 = vector.broadcast %373 : vector<16x1xf32> to vector<16x32xf32>
    %375 = arith.subf %365, %374 : vector<16x32xf32>
    %376 = arith.mulf %375, %375 : vector<16x32xf32>
    %cst_142 = arith.constant dense<0.000000e+00> : vector<16xf32>
    %377 = vector.multi_reduction <add>, %376, %cst_142 [1] : vector<16x32xf32> to vector<16xf32>
    %378 = vector.shape_cast %377 : vector<16xf32> to vector<16x1xf32>
    %cst_143 = arith.constant 3.200000e+01 : f32
    %379 = vector.broadcast %cst_143 : f32 to vector<16x1xf32>
    %380 = arith.divf %378, %379 : vector<16x1xf32>
    %381 = vector.broadcast %373 : vector<16x1xf32> to vector<16x32xf32>
    %382 = arith.subf %365, %381 : vector<16x32xf32>
    %cst_144 = arith.constant 9.99999974E-6 : f32
    %383 = vector.broadcast %cst_144 : f32 to vector<16x1xf32>
    %384 = arith.addf %380, %383 : vector<16x1xf32>
    %385 = math.rsqrt %384 : vector<16x1xf32>
    %386 = vector.broadcast %385 : vector<16x1xf32> to vector<16x32xf32>
    %387 = arith.mulf %382, %386 : vector<16x32xf32>
    %388 = vector.broadcast %367 : vector<1x32xf32> to vector<16x32xf32>
    %389 = arith.mulf %387, %388 : vector<16x32xf32>
    %390 = vector.broadcast %369 : vector<1x32xf32> to vector<16x32xf32>
    %391 = arith.addf %389, %390 : vector<16x32xf32>
    %c0_145 = arith.constant 0 : index
    %c0_146 = arith.constant 0 : index
    %392 = vector.load %arg19[%c0_145, %c0_146] : memref<16x32xf32, #tpu.memory_space<vmem>>, vector<16x32xf32>
    tpu.vector_store %arg19[%c0_145, %c0_146], %391 {strides = array<i32>} : memref<16x32xf32, #tpu.memory_space<vmem>>, vector<16x32xf32>,
    return
  }
  func.func @transform_0(%arg0: i32) -> (i32, i32) {
    %c0_i32 = arith.constant 0 : i32
    %c0_i32_0 = arith.constant 0 : i32
    return %arg0, %c0_i32 : i32, i32
  }
  func.func @transform_1(%arg0: i32) -> (i32, i32, i32) {
    %c0_i32 = arith.constant 0 : i32
    %c0_i32_0 = arith.constant 0 : i32
    %c0_i32_1 = arith.constant 0 : i32
    return %arg0, %c0_i32, %c0_i32_0 : i32, i32, i32
  }
  func.func @transform_2(%arg0: i32) -> (i32, i32, i32) {
    %c0_i32 = arith.constant 0 : i32
    %c0_i32_0 = arith.constant 0 : i32
    %c0_i32_1 = arith.constant 0 : i32
    %c0_i32_2 = arith.constant 0 : i32
    return %c0_i32, %c0_i32_0, %c0_i32_1 : i32, i32, i32
  }
  func.func @transform_3(%arg0: i32) -> (i32, i32, i32) {
    %c0_i32 = arith.constant 0 : i32
    %c0_i32_0 = arith.constant 0 : i32
    %c0_i32_1 = arith.constant 0 : i32
    %c0_i32_2 = arith.constant 0 : i32
    return %c0_i32, %c0_i32_0, %c0_i32_1 : i32, i32, i32
  }
  func.func @transform_4(%arg0: i32) -> (i32, i32, i32) {
    %c0_i32 = arith.constant 0 : i32
    %c0_i32_0 = arith.constant 0 : i32
    %c0_i32_1 = arith.constant 0 : i32
    %c0_i32_2 = arith.constant 0 : i32
    return %c0_i32, %c0_i32_0, %c0_i32_1 : i32, i32, i32
  }
  func.func @transform_5(%arg0: i32) -> (i32, i32, i32) {
    %c0_i32 = arith.constant 0 : i32
    %c0_i32_0 = arith.constant 0 : i32
    %c0_i32_1 = arith.constant 0 : i32
    %c0_i32_2 = arith.constant 0 : i32
    return %c0_i32, %c0_i32_0, %c0_i32_1 : i32, i32, i32
  }
  func.func @transform_6(%arg0: i32) -> (i32, i32, i32) {
    %c0_i32 = arith.constant 0 : i32
    %c0_i32_0 = arith.constant 0 : i32
    %c0_i32_1 = arith.constant 0 : i32
    %c0_i32_2 = arith.constant 0 : i32
    return %c0_i32, %c0_i32_0, %c0_i32_1 : i32, i32, i32
  }
  func.func @transform_7(%arg0: i32) -> (i32, i32, i32) {
    %c0_i32 = arith.constant 0 : i32
    %c0_i32_0 = arith.constant 0 : i32
    %c0_i32_1 = arith.constant 0 : i32
    %c0_i32_2 = arith.constant 0 : i32
    return %c0_i32, %c0_i32_0, %c0_i32_1 : i32, i32, i32
  }
  func.func @transform_8(%arg0: i32) -> (i32, i32, i32) {
    %c0_i32 = arith.constant 0 : i32
    %c0_i32_0 = arith.constant 0 : i32
    %c0_i32_1 = arith.constant 0 : i32
    %c0_i32_2 = arith.constant 0 : i32
    return %c0_i32, %c0_i32_0, %c0_i32_1 : i32, i32, i32
  }
  func.func @transform_9(%arg0: i32) -> (i32, i32, i32) {
    %c0_i32 = arith.constant 0 : i32
    %c0_i32_0 = arith.constant 0 : i32
    %c0_i32_1 = arith.constant 0 : i32
    %c0_i32_2 = arith.constant 0 : i32
    return %c0_i32, %c0_i32_0, %c0_i32_1 : i32, i32, i32
  }
  func.func @transform_10(%arg0: i32) -> (i32, i32, i32) {
    %c0_i32 = arith.constant 0 : i32
    %c0_i32_0 = arith.constant 0 : i32
    %c0_i32_1 = arith.constant 0 : i32
    %c0_i32_2 = arith.constant 0 : i32
    return %c0_i32, %c0_i32_0, %c0_i32_1 : i32, i32, i32
  }
  func.func @transform_11(%arg0: i32) -> (i32, i32, i32) {
    %c0_i32 = arith.constant 0 : i32
    %c0_i32_0 = arith.constant 0 : i32
    %c0_i32_1 = arith.constant 0 : i32
    %c0_i32_2 = arith.constant 0 : i32
    return %c0_i32, %c0_i32_0, %c0_i32_1 : i32, i32, i32
  }
  func.func @transform_12(%arg0: i32) -> (i32, i32, i32) {
    %c0_i32 = arith.constant 0 : i32
    %c0_i32_0 = arith.constant 0 : i32
    %c0_i32_1 = arith.constant 0 : i32
    %c0_i32_2 = arith.constant 0 : i32
    return %c0_i32, %c0_i32_0, %c0_i32_1 : i32, i32, i32
  }
  func.func @transform_13(%arg0: i32) -> (i32, i32, i32) {
    %c0_i32 = arith.constant 0 : i32
    %c0_i32_0 = arith.constant 0 : i32
    %c0_i32_1 = arith.constant 0 : i32
    %c0_i32_2 = arith.constant 0 : i32
    return %c0_i32, %c0_i32_0, %c0_i32_1 : i32, i32, i32
  }
  func.func @transform_14(%arg0: i32) -> (i32, i32, i32) {
    %c0_i32 = arith.constant 0 : i32
    %c0_i32_0 = arith.constant 0 : i32
    %c0_i32_1 = arith.constant 0 : i32
    %c0_i32_2 = arith.constant 0 : i32
    return %c0_i32, %c0_i32_0, %c0_i32_1 : i32, i32, i32
  }
  func.func @transform_15(%arg0: i32) -> (i32, i32, i32) {
    %c0_i32 = arith.constant 0 : i32
    %c0_i32_0 = arith.constant 0 : i32
    %c0_i32_1 = arith.constant 0 : i32
    %c0_i32_2 = arith.constant 0 : i32
    return %c0_i32, %c0_i32_0, %c0_i32_1 : i32, i32, i32
  }
  func.func @transform_16(%arg0: i32) -> (i32, i32, i32) {
    %c0_i32 = arith.constant 0 : i32
    %c0_i32_0 = arith.constant 0 : i32
    %c0_i32_1 = arith.constant 0 : i32
    %c0_i32_2 = arith.constant 0 : i32
    return %c0_i32, %c0_i32_0, %c0_i32_1 : i32, i32, i32
  }
  func.func @transform_17(%arg0: i32) -> (i32, i32, i32) {
    %c0_i32 = arith.constant 0 : i32
    %c0_i32_0 = arith.constant 0 : i32
    %c0_i32_1 = arith.constant 0 : i32
    %c0_i32_2 = arith.constant 0 : i32
    return %c0_i32, %c0_i32_0, %c0_i32_1 : i32, i32, i32
  }
  func.func @transform_18(%arg0: i32) -> (i32, i32) {
    %c0_i32 = arith.constant 0 : i32
    %c0_i32_0 = arith.constant 0 : i32
    return %arg0, %c0_i32 : i32, i32
  }
}

</mosaic_0001>

<bundles_post_ra>
// kernel: tpu_custom_call.1
= control target key start
LH: loop header
LB: loop body
LE: loop exit
PB: predicated region body
PF: predicated region fallthrough
CT: control target
= control target key end

     0   :  { %s4774_s0 = inlined_call_operand.hbm [shape: f32[16,32], index: 0, kind: input, shape index: {}]   ;;  %s4775_s1 = inlined_call_operand.hbm [shape: f32[8,1,8], index: 1, kind: input, shape index: {}]   ;;  %s4776_s2 = inlined_call_operand.vmem [shape: bf16[2,32,32], index: 2, kind: input, shape index: {}]   ;;  %s4777_s3 = inlined_call_operand.vmem [shape: f32[2,1,32], index: 3, kind: input, shape index: {}]   ;;  %s4778_s4 = inlined_call_operand.vmem [shape: bf16[2,32,32], index: 4, kind: input, shape index: {}]   ;;  %s4779_s5 = inlined_call_operand.vmem [shape: f32[2,1,32], index: 5, kind: input, shape index: {}]   ;;  %s4780_s6 = inlined_call_operand.vmem [shape: bf16[2,32,32], index: 6, kind: input, shape index: {}]   ;;  %s4781_s7 = inlined_call_operand.vmem [shape: f32[2,1,32], index: 7, kind: input, shape index: {}]   ;;  %s4782_s8 = inlined_call_operand.hbm [shape: bf16[2,32,32], index: 8, kind: input, shape index: {}]   ;;  %s4783_s9 = inlined_call_operand.vmem [shape: f32[2,1,32], index: 9, kind: input, shape index: {}]   ;;  %s4784_s10 = inlined_call_operand.vmem [shape: f32[2,1,32], index: 10, kind: input, shape index: {}]   ;;  %s4785_s11 = inlined_call_operand.vmem [shape: f32[2,1,32], index: 11, kind: input, shape index: {}]   ;;  %s4786_s12 = inlined_call_operand.hbm [shape: bf16[2,32,64], index: 12, kind: input, shape index: {}]   ;;  %s4787_s13 = inlined_call_operand.vmem [shape: f32[2,1,64], index: 13, kind: input, shape index: {}]   ;;  %s4788_s14 = inlined_call_operand.vmem [shape: bf16[2,64,32], index: 14, kind: input, shape index: {}]   ;;  %s4789_s15 = inlined_call_operand.vmem [shape: f32[2,1,32], index: 15, kind: input, shape index: {}]   ;;  %s4790_s16 = inlined_call_operand.vmem [shape: f32[2,1,32], index: 16, kind: input, shape index: {}]   ;;  %s4791_s17 = inlined_call_operand.vmem [shape: f32[2,1,32], index: 17, kind: input, shape index: {}]   ;;  %s4792_s18 = inlined_call_operand.hbm [shape: f32[16,32], index: 18, kind: output, shape index: {}]  }
   0x1   :  { %4799 = sst [smem:[#allocation15_spill]] %s4774_s0 }
   0x2   :  { %4800 = sst [smem:[#allocation16_spill]] %s4775_s1 }
   0x3   :  { %4801 = sst [smem:[#allocation17_spill]] %s4776_s2 }
   0x4   :  { %4802 = sst [smem:[#allocation18_spill]] %s4791_s17 }
   0x5   :  { %4803 = sst [smem:[#allocation19_spill]] %s4792_s18 }
   0x6   :  { %23 = vsyncpa [#allocation3], 0 }
   0x7   :  { %24 = vsyncpa [#allocation6], 0 }
   0x8   :  { %25 = vsyncpa [#allocation9], 0 }
   0x9   :  { %26 = vsyncpa [#allocation4], 0  ;;  %s3956_s27 = smov [#allocation5]   ;;  %s4804_s0 = sld [smem:[#allocation16_spill]] }
   0xa   :  { %s44_s28 = sshll.u32 %s3956_s27, 4  ;;  %s45_s28 = int_to_ptr.vmem [resolvable:$true] %s44_s28 }
   0xf   :  { %s3838_s19 = scalar_lea.hbm %s4804_s0, 128 }
  0x10   :  { %p3839_p0 = scmp.ne.s32.totalorder %s4804_s0, %s3838_s19  ;;  %p3842_p1 = scmp.lt.u32.totalorder %s3838_s19, %s4804_s0 }
  0x12   :  { %p3844_p2 = pnand %p3842_p1, %p3839_p0 }
  0x14   :  { %3847 = shalt.err (!%p3844_p2)
}
  0x15   :  { %s3848_s2 = scalar_lea.vmem %s45_s28, 128  ;;  %p3853_p4 = scmp.lt.s32.totalorder %s45_s28, %s45_s28 }
  0x16   :  { %p3849_p3 = scmp.ne.s32.totalorder %s45_s28, %s3848_s2  ;;  %p3854_p5 = scmp.lt.s32.totalorder %s3848_s2, %s3848_s2 }
  0x18   :  { %p3855_p6 = por %p3854_p5, %p3853_p4 }
  0x1a   :  { %p3856_p7 = pnand %p3855_p6, %p3849_p3 }
  0x1c   :  { %3859 = shalt.err (!%p3856_p7)
}
  0x1d   :  { %s3957_s23 = smov 16   ;;  %s3958_s24 = smov 1  }
  0x1e   :  { %50 = dma.hbm_to_vmem [thread:$0]  %s4804_s0, 128, %s45_s28, [#allocation6], %s3957_s23, %s3957_s23, %s3958_s24  }
  0x1f   :  { %s3959_s27 = smov [#allocation2]   ;;  %s4805_s1 = sld [smem:[#allocation15_spill]] }
  0x20   :  { %s32_s29 = sshll.u32 %s3959_s27, 4  ;;  %s33_s29 = int_to_ptr.vmem [resolvable:$true] %s32_s29 }
  0x25   :  { %s3860_s20 = scalar_lea.hbm %s4805_s1, 256 }
  0x26   :  { %p3861_p8 = scmp.ne.s32.totalorder %s4805_s1, %s3860_s20  ;;  %p3864_p9 = scmp.lt.u32.totalorder %s3860_s20, %s4805_s1 }
  0x28   :  { %p3866_p10 = pnand %p3864_p9, %p3861_p8 }
  0x2a   :  { %3869 = shalt.err (!%p3866_p10)
}
  0x2b   :  { %s3870_s17 = scalar_lea.vmem %s33_s29, 256  ;;  %p3875_p12 = scmp.lt.s32.totalorder %s33_s29, %s33_s29 }
  0x2c   :  { %p3871_p11 = scmp.ne.s32.totalorder %s33_s29, %s3870_s17  ;;  %p3876_p13 = scmp.lt.s32.totalorder %s3870_s17, %s3870_s17 }
  0x2e   :  { %p3877_p0 = por %p3876_p13, %p3875_p12 }
  0x30   :  { %p3878_p1 = pnand %p3877_p0, %p3871_p11 }
  0x32   :  { %3881 = shalt.err (!%p3878_p1)
}
  0x33   :  { %s4798_s28 = smov 128   ;;  %s3961_s0 = smov 8  }
  0x34   :  { %38 = dma.hbm_to_vmem [thread:$0]  %s4805_s1, 256, %s33_s29, [#allocation3], %s4798_s28, %s4798_s28, %s3961_s0  }
  0x35   :  { %s3962_s18 = smov [#allocation7]   ;;  %s3882_s19 = scalar_lea.hbm %s4782_s8, 512 }
  0x36   :  { %s68_s26 = sshll.u32 %s3962_s18, 4  ;;  %p3883_p2 = scmp.ne.s32.totalorder %s4782_s8, %s3882_s19  ;;  %s69_s26 = int_to_ptr.vmem [resolvable:$true] %s68_s26 }
  0x37   :  { %p3886_p3 = scmp.lt.u32.totalorder %s3882_s19, %s4782_s8 }
  0x39   :  { %p3888_p4 = pnand %p3886_p3, %p3883_p2 }
  0x3b   :  { %3891 = shalt.err (!%p3888_p4)
}
  0x3c   :  { %s3892_s2 = scalar_lea.vmem %s69_s26, 512  ;;  %p3897_p6 = scmp.lt.s32.totalorder %s69_s26, %s69_s26 }
  0x3d   :  { %p3893_p5 = scmp.ne.s32.totalorder %s69_s26, %s3892_s2  ;;  %p3898_p7 = scmp.lt.s32.totalorder %s3892_s2, %s3892_s2 }
  0x3f   :  { %p3899_p8 = por %p3898_p7, %p3897_p6 }
  0x41   :  { %p3900_p9 = pnand %p3899_p8, %p3893_p5 }
  0x43   :  { %3903 = shalt.err (!%p3900_p9)
}
  0x44   :  { %s3963_s29 = smov 64   ;;  %s3964_s1 = smov 4  }
  0x45   :  { %74 = dma.hbm_to_vmem [thread:$0]  %s4782_s8, 512, %s69_s26, [#allocation6], %s3963_s29, %s3963_s29, %s3964_s1  }
  0x46   :  { %s3965_s18 = smov [#allocation8]   ;;  %s3904_s17 = scalar_lea.hbm %s4786_s12, 512 }
  0x47   :  { %s86_s27 = sshll.u32 %s3965_s18, 4  ;;  %p3905_p10 = scmp.ne.s32.totalorder %s4786_s12, %s3904_s17  ;;  %s87_s27 = int_to_ptr.vmem [resolvable:$true] %s86_s27 }
  0x48   :  { %p3908_p11 = scmp.lt.u32.totalorder %s3904_s17, %s4786_s12 }
  0x4a   :  { %p3910_p12 = pnand %p3908_p11, %p3905_p10 }
  0x4c   :  { %3913 = shalt.err (!%p3910_p12)
}
  0x4d   :  { %s3914_s28 = scalar_lea.vmem %s87_s27, 512  ;;  %p3919_p0 = scmp.lt.s32.totalorder %s87_s27, %s87_s27 }
  0x4e   :  { %p3915_p13 = scmp.ne.s32.totalorder %s87_s27, %s3914_s28  ;;  %p3920_p1 = scmp.lt.s32.totalorder %s3914_s28, %s3914_s28 }
  0x50   :  { %p3921_p2 = por %p3920_p1, %p3919_p0 }
  0x52   :  { %p3922_p3 = pnand %p3921_p2, %p3915_p13 }
  0x54   :  { %3925 = shalt.err (!%p3922_p3)
}
  0x55   :  { %92 = dma.hbm_to_vmem [thread:$0]  %s4786_s12, 512, %s87_s27, [#allocation9], %s3963_s29, %s3963_s29, %s3964_s1  }
  0x56   :  { %3948 = dma.done.wait [#allocation3], 256  }
  0x57   :  { %3949 = vsyncadd [#allocation3], 4294967040 }
  0x58   :  { %3950 = dma.done.wait [#allocation6], 640  }
  0x59   :  { %3951 = vsyncadd [#allocation6], 4294966656 }
  0x5a   :  { %3952 = dma.done.wait [#allocation9], 512  }
  0x5b   :  { %3953 = vsyncadd [#allocation9], 4294966784  ;;  %v3966_v0 = vmov 0.0   ;;  %vm3967_vm0 = vmmov 0   ;;  %s4806_s29 = sld [smem:[#allocation17_spill]]  ;;  %v116_v3 = vld [vmem:[#allocation2] sm:$0xff] }
  0x5c   :  { %3384 = vmatprep.subr.bf16.mxu1 %v3966_v0  ;;  %3388 = vmatprep.mubr.msk.bf16.mxu1 %vm3967_vm0, %v3966_v0  ;;  %v117_v4 = vld [vmem:[#allocation2 + $0x8] sm:$0xff]  ;;  %vm158_vm1 = vcmask 261120   ;;  %v3730_v5 = vld [vmem:[%s4778_s4] sm:$0xff]   ;;  %s3968_s8 = smov 120   ;;  %vm417_vm2 = vcmask 64512   ;;  %s3969_s12 = smov 104  }
  0x5d   :  { %3400 = vmatprep.subr.bf16.mxu0 %v3966_v0  ;;  %3404 = vmatprep.mubr.msk.bf16.mxu0 %vm3967_vm0, %v3966_v0  ;;  %v134_v6 = vpack.c.bf16 %v117_v4, %v116_v3  ;;  %v3731_v7 = vld [vmem:[%s4778_s4 + $0x8] sm:$0xff]   ;;  %v3732_v8 = vld [vmem:[%s4780_s6] sm:$0xff]   ;;  %s3970_s1 = smov 112   ;;  %vm941_vm3 = vcmask 1043456   ;;  %s3972_s18 = smov 24  }
  0x5e   :  { %3401 = vmatpush3.bf16.msra.mxu0 %v3732_v8  ;;  %v3733_v9 = vld [vmem:[%s4780_s6 + $0x8] sm:$0xff]   ;;  %v3158_v10 = vld [vmem:[%s4777_s3] ss:$0 sm:$0xff]  ;;  %v794_v8 = vlaneseq  ;;  %s4823_s20 = sld [smem:[#allocation18_spill]] }
  0x5f   :  { %3402 = vmatprep.subr.bf16.mxu0 %v3966_v0  ;;  %v3162_v17 = vld [vmem:[%s4779_s5] ss:$0 sm:$0xff] }
  0x60   :  { %v3166_v62 = vld [vmem:[%s4781_s7] ss:$0 sm:$0xff] }
  0x61   :  { %v3728_v1 = vld [vmem:[%s4806_s29] sm:$0xff]   ;;  %v3729_v2 = vld [vmem:[%s4806_s29 + $0x8] sm:$0xff]  }
  0x62   :  { %3385 = vmatpush3.bf16.msra.mxu1 %v3728_v1  ;;  %3403 = vmatpush3.bf16.msra.mxu0 %v3733_v9  ;;  %v118_v9 = vld [vmem:[#allocation5] sm:$0x1] }
  0x63   :  { %3386 = vmatprep.subr.bf16.mxu1 %v3966_v0  ;;  %3414 = vmatprep.subr.bf16.mxu0 %v3966_v0  ;;  %vm126_vm4 = vcmp.gt.f32.partialorder %v118_v9, 0.5 }
  0x65   :  { %3405 = vmatmul.mubr.msk.bf16.vlgmr.msra.gmra.mrb[0].mxu0 %vm158_vm1, %v134_v6 }
  0x66   :  { %3387 = vmatpush3.bf16.msra.mxu1 %v3729_v2  ;;  %3416 = vmatprep.mubr.msk.bf16.mxu0 %vm3967_vm0, %v3966_v0 }
  0x67   :  { %3392 = vmatprep.subr.bf16.mxu1 %v3966_v0 }
  0x69   :  { %3389 = vmatmul.mubr.msk.bf16.vlgmr.msra.gmra.mrb[0].mxu1 %vm158_vm1, %v134_v6 }
  0x6a   :  { %3393 = vmatpush3.bf16.msra.mxu1 %v3730_v5  ;;  %3396 = vmatprep.mubr.msk.bf16.mxu1 %vm3967_vm0, %v3966_v0 }
  0x6b   :  { %3394 = vmatprep.subr.bf16.mxu1 %v3966_v0 }
  0x6e   :  { %3395 = vmatpush3.bf16.msra.mxu1 %v3731_v7 }
  0x6f   :  { %3408 = vmatprep.subr.bf16.mxu1 %v3966_v0 }
  0x71   :  { %3397 = vmatmul.mubr.msk.bf16.vlgmr.msra.gmra.mrb[4].mxu1 %vm158_vm1, %v134_v6 }
  0x72   :  { %3410 = vmatprep.mubr.msk.bf16.mxu1 %vm3967_vm0, %v3966_v0 }
 0x138   :  { %v324_v63 = vpop.f32.mrb[0].mxu0 }
 0x139   :  { %v4222_v1 = vadd.f32 %v3166_v62, %v324_v63  ;;  %v3406_v2 = vpop.f32.mrb[1].mxu0 }
 0x13a   :  { %v327_v3 = vpop.f32.mrb[2].mxu0 }
 0x13b   :  { %v4224_v4 = vadd.f32 %v3166_v62, %v327_v3  ;;  %v3407_v5 = vpop.f32.mrb[3].mxu0  ;;  %v409_v6 = vpack.c.bf16 %v4222_v1, %v4222_v1 }
 0x13c   :  { %v196_v11 = vpop.f32.mrb[0].mxu1 }
 0x13d   :  { %v197_v12 = vadd.f32 %v3158_v10, %v196_v11  ;;  %v3390_v13 = vpop.f32.mrb[1].mxu1  ;;  %v943_v7 = vsel %vm941_vm3, %v409_v6, 0 }
 0x13e   :  { %v199_v14 = vpop.f32.mrb[2].mxu1 }
 0x13f   :  { %v331_v15 = vmul.f32 0.35355338, %v197_v12  ;;  %v3391_v16 = vpop.f32.mrb[3].mxu1  ;;  %v200_v27 = vadd.f32 %v3158_v10, %v199_v14  ;;  %v795_v10 = vshrl.u32 %v794_v8, 7  ;;  %v3971_v12 = vmov 0  }
 0x140   :  { %v786_v13 = vsel %vm126_vm4, 1, %v3971_v12 }
 0x141   :  { %334 = vrot.lane.b32.xlu1 %v331_v15, %s3968_s8  ;;  %v353_v26 = vpack.c.bf16 %v331_v15, %v331_v15  ;;  %v332_v28 = vmul.f32 0.35355338, %v200_v27  ;;  %v4230_v11 = vsub.s32 0, %v795_v10 }
 0x143   :  { %v357_v53 = vpack.c.bf16 %v332_v28, %v332_v28  ;;  %v797_v14 = vrot.slane %v786_v13, %v4230_v11 }
 0x144   :  { %v260_v18 = vpop.f32.mrb[4].mxu1 }
 0x145   :  { %v261_v19 = vadd.f32 %v3162_v17, %v260_v18  ;;  %v3398_v20 = vpop.f32.mrb[5].mxu1  ;;  %vm4234_vm5 = vcmp.eq.s32.totalorder %v797_v14, 1 }
 0x146   :  { %v263_v21 = vpop.f32.mrb[6].mxu1 }
 0x147   :  { %368 = vrot.lane.b32.xlu1 %v261_v19, %s3969_s12  ;;  %362 = vrot.lane.b32.xlu0 %v261_v19, %s3968_s8  ;;  %v3399_v22 = vpop.f32.mrb[7].mxu1  ;;  %v381_v23 = vpack.c.bf16 %v261_v19, %v261_v19  ;;  %v264_v25 = vadd.f32 %v3162_v17, %v263_v21 }
 0x148   :  { %v119_v22 = vld [vmem:[#allocation5 + $0x1] sm:$0x1] }
 0x149   :  { %v422_v24 = vsel %vm417_vm2, %v381_v23, 0  ;;  %v385_v42 = vpack.c.bf16 %v264_v25, %v264_v25  ;;  %vm127_vm6 = vcmp.gt.f32.partialorder %v119_v22, 0.5  ;;  %v120_v23 = vld [vmem:[#allocation5 + $0x2] sm:$0x1] }
 0x14a   :  { %3409 = vmatpush3.bf16.xpose.msra.mxu1 %v422_v24  ;;  %v787_v24 = vsel %vm127_vm6, 1, %v3971_v12  ;;  %vm128_vm7 = vcmp.gt.f32.partialorder %v120_v23, 0.5 }
 0x14b   :  { %340 = vrot.lane.b32.xlu1 %v331_v15, %s3969_s12  ;;  %365 = vrot.lane.b32.xlu0 %v261_v19, %s3970_s1  ;;  %v606_v47 = vsel %vm417_vm2, %v385_v42, 0  ;;  %v788_v27 = vsel %vm128_vm7, 1, %v3971_v12 }
 0x14c   :  { %3420 = vmatprep.subr.bf16.mxu1 %v3966_v0 }
 0x14f   :  { %337 = vrot.lane.b32.xlu0 %v331_v15, %s3970_s1  ;;  %375 = vrot.lane.b32.xlu1 %v264_v25, %s3970_s1 }
 0x151   :  { %3411 = vmatmul.mubr.msk.bf16.vlgmr.msra.gmra.mrb[8].mxu1 %vm417_vm2, %v353_v26  ;;  %v801_v26 = vrot.slane %v787_v24, %v4230_v11 }
 0x152   :  { %3422 = vmatprep.mubr.msk.bf16.mxu1 %vm3967_vm0, %v3966_v0 }
 0x153   :  { %378 = vrot.lane.b32.xlu1 %v264_v25, %s3969_s12  ;;  %372 = vrot.lane.b32.xlu0 %v264_v25, %s3968_s8  ;;  %v121_v25 = vld [vmem:[#allocation5 + $0x3] sm:$0x1]  ;;  %vm4247_vm9 = vcmp.eq.s32.totalorder %v801_v26, 1 }
 0x154   :  { %vm129_vm8 = vcmp.gt.f32.partialorder %v121_v25, 0.5 }
 0x157   :  { %350 = vrot.lane.b32.xlu1 %v332_v28, %s3969_s12  ;;  %344 = vrot.lane.b32.xlu0 %v332_v28, %s3968_s8 }
 0x15b   :  { %347 = vrot.lane.b32.xlu0 %v332_v28, %s3970_s1  ;;  %v122_v28 = vld [vmem:[#allocation5 + $0x4] sm:$0x1] }
 0x15c   :  { %vm130_vm10 = vcmp.gt.f32.partialorder %v122_v28, 0.5 }
 0x1b3   :  { %v335_v29 = vpop.permute.xlu1 %334 }
 0x1b4   :  { %v354_v40 = vpack.c.bf16 %v335_v29, %v335_v29 }
 0x1b9   :  { %v363_v30 = vpop.permute.xlu0 %362  ;;  %v369_v32 = vpop.permute.xlu1 %368 }
 0x1ba   :  { %v382_v31 = vpack.c.bf16 %v363_v30, %v363_v30  ;;  %v384_v36 = vpack.c.bf16 %v369_v32, %v369_v32  ;;  %v805_v30 = vrot.slane %v788_v27, %v4230_v11 }
 0x1bc   :  { %v468_v33 = vsel %vm417_vm2, %v382_v31, 0  ;;  %v560_v41 = vsel %vm417_vm2, %v384_v36, 0  ;;  %v789_v31 = vsel %vm129_vm8, 1, %v3971_v12  ;;  %vm4259_vm11 = vcmp.eq.s32.totalorder %v805_v30, 1 }
 0x1bd   :  { %3415 = vmatpush3.bf16.xpose.msra.mxu0 %v468_v33  ;;  %v366_v34 = vpop.permute.xlu0 %365  ;;  %v341_v38 = vpop.permute.xlu1 %340 }
 0x1be   :  { %v383_v35 = vpack.c.bf16 %v366_v34, %v366_v34  ;;  %3426 = vmatprep.subr.bf16.mxu0 %v3966_v0  ;;  %v356_v48 = vpack.c.bf16 %v341_v38, %v341_v38 }
 0x1c0   :  { %v514_v37 = vsel %vm417_vm2, %v383_v35, 0  ;;  %v123_v35 = vld [vmem:[#allocation5 + $0x5] sm:$0x1] }
 0x1c1   :  { %v338_v39 = vpop.permute.xlu0 %337  ;;  %3421 = vmatpush3.bf16.xpose.msra.mxu1 %v514_v37  ;;  %v376_v45 = vpop.permute.xlu1 %375  ;;  %vm131_vm12 = vcmp.gt.f32.partialorder %v123_v35, 0.5 }
 0x1c2   :  { %3432 = vmatprep.subr.bf16.mxu1 %v3966_v0  ;;  %v355_v44 = vpack.c.bf16 %v338_v39, %v338_v39  ;;  %v387_v49 = vpack.c.bf16 %v376_v45, %v376_v45  ;;  %v809_v39 = vrot.slane %v789_v31, %v4230_v11  ;;  %v124_v45 = vld [vmem:[#allocation5 + $0x6] sm:$0x1] }
 0x1c3   :  { %vm132_vm14 = vcmp.gt.f32.partialorder %v124_v45, 0.5 }
 0x1c4   :  { %3417 = vmatmul.mubr.msk.bf16.vlgmr.msra.gmra.mrb[4].mxu0 %vm417_vm2, %v354_v40  ;;  %v698_v54 = vsel %vm417_vm2, %v387_v49, 0  ;;  %vm4271_vm13 = vcmp.eq.s32.totalorder %v809_v39, 1 }
 0x1c5   :  { %3427 = vmatpush3.bf16.xpose.msra.mxu0 %v560_v41  ;;  %v373_v43 = vpop.permute.xlu0 %372  ;;  %3428 = vmatprep.mubr.msk.bf16.mxu0 %vm3967_vm0, %v3966_v0  ;;  %v379_v51 = vpop.permute.xlu1 %378  ;;  %v790_v41 = vsel %vm130_vm10, 1, %v3971_v12  ;;  %vm1320_vm10 = vcmask 130048  }
 0x1c6   :  { %3438 = vmatprep.subr.bf16.mxu0 %v3966_v0  ;;  %v386_v46 = vpack.c.bf16 %v373_v43, %v373_v43  ;;  %v388_v55 = vpack.c.bf16 %v379_v51, %v379_v51  ;;  %v813_v49 = vrot.slane %v790_v41, %v4230_v11  ;;  %v791_v51 = vsel %vm131_vm12, 1, %v3971_v12 }
 0x1c7   :  { %vm1322_vm12 = vcmask 195584  }
 0x1c8   :  { %3423 = vmatmul.mubr.msk.bf16.vlgmr.msra.gmra.mrb[12].mxu1 %vm417_vm2, %v355_v44  ;;  %v652_v50 = vsel %vm417_vm2, %v386_v46, 0  ;;  %v744_v58 = vsel %vm417_vm2, %v388_v55, 0  ;;  %v125_v55 = vld [vmem:[#allocation5 + $0x7] sm:$0x1]  ;;  %vm4283_vm15 = vcmp.eq.s32.totalorder %v813_v49, 1 }
 0x1c9   :  { %3433 = vmatpush3.bf16.xpose.msra.mxu1 %v606_v47  ;;  %3434 = vmatprep.mubr.msk.bf16.mxu1 %vm3967_vm0, %v3966_v0  ;;  %v345_v52 = vpop.permute.xlu0 %344  ;;  %v351_v60 = vpop.permute.xlu1 %350  ;;  %vm133_vm4 = vcmp.gt.f32.partialorder %v125_v55, 0.5 }
 0x1ca   :  { %3444 = vmatprep.subr.bf16.mxu1 %v3966_v0  ;;  %v358_v56 = vpack.c.bf16 %v345_v52, %v345_v52  ;;  %v360_v61 = vpack.c.bf16 %v351_v60, %v351_v60  ;;  %v793_v9 = vsel %vm133_vm4, 1, %v3971_v12 }
 0x1cc   :  { %3429 = vmatmul.mubr.msk.bf16.vlgmr.msra.gmra.mrb[8].mxu0 %vm417_vm2, %v356_v48 }
 0x1cd   :  { %3439 = vmatpush3.bf16.xpose.msra.mxu0 %v652_v50  ;;  %3440 = vmatprep.mubr.msk.bf16.mxu0 %vm3967_vm0, %v3966_v0  ;;  %v348_v57 = vpop.permute.xlu0 %347 }
 0x1ce   :  { %3450 = vmatprep.subr.bf16.mxu0 %v3966_v0  ;;  %v359_v59 = vpack.c.bf16 %v348_v57, %v348_v57 }
 0x1d0   :  { %3435 = vmatmul.mubr.msk.bf16.vlgmr.msra.gmra.mrb[16].mxu1 %vm417_vm2, %v357_v53 }
 0x1d1   :  { %3445 = vmatpush3.bf16.xpose.msra.mxu1 %v698_v54  ;;  %3446 = vmatprep.mubr.msk.bf16.mxu1 %vm3967_vm0, %v3966_v0 }
 0x1d2   :  { %3456 = vmatprep.subr.bf16.mxu1 %v3966_v0 }
 0x1d4   :  { %3441 = vmatmul.mubr.msk.bf16.vlgmr.msra.gmra.mrb[12].mxu0 %vm417_vm2, %v358_v56 }
 0x1d5   :  { %3451 = vmatpush3.bf16.xpose.msra.mxu0 %v744_v58  ;;  %3452 = vmatprep.mubr.msk.bf16.mxu0 %vm3967_vm0, %v3966_v0 }
 0x1d6   :  { %3462 = vmatprep.subr.bf16.mxu0 %v3966_v0 }
 0x1d8   :  { %3447 = vmatmul.mubr.msk.bf16.vlgmr.msra.gmra.mrb[20].mxu1 %vm417_vm2, %v359_v59  ;;  %v817_v59 = vrot.slane %v791_v51, %v4230_v11 }
 0x1d9   :  { %3458 = vmatprep.mubr.msk.bf16.mxu1 %vm3967_vm0, %v3966_v0  ;;  %3457 = vmatpush3.bf16.msra.mxu1 %v943_v7 }
 0x1da   :  { %3468 = vmatprep.subr.bf16.mxu1 %v3966_v0  ;;  %vm4292_vm6 = vcmp.eq.s32.totalorder %v817_v59, 1 }
 0x1dc   :  { %3453 = vmatmul.mubr.msk.bf16.vlgmr.msra.gmra.mrb[16].mxu0 %vm417_vm2, %v360_v61  ;;  %v792_v61 = vsel %vm132_vm14, 1, %v3971_v12  ;;  %vm1564_vm14 = vcmask 523264  }
 0x1dd   :  { %3464 = vmatprep.mubr.msk.bf16.mxu0 %vm3967_vm0, %v3966_v0  ;;  %v821_v7 = vrot.slane %v792_v61, %v4230_v11 }
 0x1df   :  { %vm4301_vm7 = vcmp.eq.s32.totalorder %v821_v7, 1 }
 0x224   :  { %v458_v16 = vpop.f32.mrb[8].mxu1 }
 0x225   :  { %v4240_v17 = vsel %vm4234_vm5, %v458_v16, -1000000.0  ;;  %v3412_v18 = vpop.f32.mrb[9].mxu1 }
 0x226   :  { %v461_v19 = vpop.f32.mrb[10].mxu1  ;;  %v842_v20 = vsel %vm417_vm2, %v4240_v17, -inf }
 0x227   :  { %843 = vmax.xlane.f32.xlu0 %v842_v20  ;;  %v3413_v21 = vpop.f32.mrb[11].mxu1  ;;  %v825_v20 = vrot.slane %v793_v9, %v4230_v11 }
 0x229   :  { %vm4309_vm8 = vcmp.eq.s32.totalorder %v825_v20, 1 }
 0x297   :  { %v504_v32 = vpop.f32.mrb[4].mxu0 }
 0x298   :  { %v4255_v33 = vsel %vm4247_vm9, %v504_v32, -1000000.0  ;;  %v3418_v34 = vpop.f32.mrb[5].mxu0 }
 0x299   :  { %v507_v36 = vpop.f32.mrb[6].mxu0  ;;  %v845_v37 = vsel %vm417_vm2, %v4255_v33, -inf }
 0x29a   :  { %v3419_v40 = vpop.f32.mrb[7].mxu0  ;;  %846 = vmax.xlane.f32.xlu1 %v845_v37 }
 0x29b   :  { %v550_v42 = vpop.f32.mrb[12].mxu1 }
 0x29c   :  { %v4267_v43 = vsel %vm4259_vm11, %v550_v42, -1000000.0  ;;  %v3424_v44 = vpop.f32.mrb[13].mxu1 }
 0x29d   :  { %v553_v46 = vpop.f32.mrb[14].mxu1  ;;  %v848_v47 = vsel %vm417_vm2, %v4267_v43, -inf }
 0x29e   :  { %849 = vmax.xlane.f32.xlu0 %v848_v47  ;;  %v3425_v50 = vpop.f32.mrb[15].mxu1 }
 0x29f   :  { %v596_v52 = vpop.f32.mrb[8].mxu0 }
 0x2a0   :  { %v4279_v53 = vsel %vm4271_vm13, %v596_v52, -1000000.0  ;;  %v3430_v54 = vpop.f32.mrb[9].mxu0 }
 0x2a1   :  { %v599_v56 = vpop.f32.mrb[10].mxu0  ;;  %v851_v57 = vsel %vm417_vm2, %v4279_v53, -inf }
 0x2a2   :  { %v3431_v60 = vpop.f32.mrb[11].mxu0  ;;  %852 = vmax.xlane.f32.xlu0 %v851_v57 }
 0x2a3   :  { %v642_v62 = vpop.f32.mrb[16].mxu1 }
 0x2a4   :  { %v838_v63 = vsel %vm4283_vm15, %v642_v62, -1000000.0  ;;  %v3436_v2 = vpop.f32.mrb[17].mxu1 }
 0x2a5   :  { %v645_v3 = vpop.f32.mrb[18].mxu1  ;;  %v854_v5 = vsel %vm417_vm2, %v838_v63, -inf }
 0x2a6   :  { %855 = vmax.xlane.f32.xlu1 %v854_v5  ;;  %v3437_v8 = vpop.f32.mrb[19].mxu1 }
 0x2a7   :  { %v688_v10 = vpop.f32.mrb[12].mxu0 }
 0x2a8   :  { %v839_v13 = vsel %vm4292_vm6, %v688_v10, -1000000.0  ;;  %v3442_v14 = vpop.f32.mrb[13].mxu0 }
 0x2a9   :  { %v691_v16 = vpop.f32.mrb[14].mxu0  ;;  %v857_v18 = vsel %vm417_vm2, %v839_v13, -inf }
 0x2aa   :  { %v3443_v21 = vpop.f32.mrb[15].mxu0  ;;  %858 = vmax.xlane.f32.xlu0 %v857_v18 }
 0x2ab   :  { %v734_v22 = vpop.f32.mrb[20].mxu1 }
 0x2ac   :  { %v840_v12 = vsel %vm4301_vm7, %v734_v22, -1000000.0  ;;  %v3448_v23 = vpop.f32.mrb[21].mxu1 }
 0x2ad   :  { %v737_v24 = vpop.f32.mrb[22].mxu1  ;;  %v860_v25 = vsel %vm417_vm2, %v840_v12, -inf }
 0x2ae   :  { %861 = vmax.xlane.f32.xlu1 %v860_v25  ;;  %v3449_v27 = vpop.f32.mrb[23].mxu1 }
 0x2af   :  { %v780_v28 = vpop.f32.mrb[16].mxu0 }
 0x2b0   :  { %v841_v11 = vsel %vm4309_vm8, %v780_v28, -1000000.0  ;;  %v3454_v30 = vpop.f32.mrb[17].mxu0 }
 0x2b1   :  { %v783_v31 = vpop.f32.mrb[18].mxu0  ;;  %v863_v32 = vsel %vm417_vm2, %v841_v11, -inf }
 0x2b2   :  { %v3455_v34 = vpop.f32.mrb[19].mxu0  ;;  %864 = vmax.xlane.f32.xlu0 %v863_v32 }
 0x2b4   :  { %v844_v35 = vpop.xlane.xlu0 %843 }
 0x2b5   :  { %v866_v36 = vsub.f32 %v4240_v17, %v844_v35 }
 0x2b7   :  { %v874_v37 = vmul.f32 1.442695, %v866_v36 }
 0x2b9   :  { %3756 = vpow2.f32 %v874_v37 }
 0x2bf   :  { %390 = vrot.lane.b32.xlu1 %v4222_v1, %s3968_s8 }
 0x2c3   :  { %v4319_v39 = vpop.eup %3756 }
 0x2c4   :  { %v890_v40 = vsel %vm417_vm2, %v4319_v39, 0.0 }
 0x2e3   :  { %891 = vadd.xlane.f32.xlu1 %v890_v40 }
 0x327   :  { %v847_v41 = vpop.xlane.xlu1 %846 }
 0x328   :  { %v867_v42 = vsub.f32 %v4255_v33, %v847_v41 }
 0x32a   :  { %v876_v44 = vmul.f32 1.442695, %v867_v42 }
 0x32b   :  { %v850_v45 = vpop.xlane.xlu0 %849 }
 0x32c   :  { %3758 = vpow2.f32 %v876_v44  ;;  %v868_v46 = vsub.f32 %v4267_v43, %v850_v45 }
 0x32e   :  { %v878_v47 = vmul.f32 1.442695, %v868_v46 }
 0x32f   :  { %v853_v49 = vpop.xlane.xlu0 %852 }
 0x330   :  { %3760 = vpow2.f32 %v878_v47  ;;  %v869_v17 = vsub.f32 %v4279_v53, %v853_v49 }
 0x332   :  { %v880_v50 = vmul.f32 1.442695, %v869_v17 }
 0x333   :  { %v856_v51 = vpop.xlane.xlu1 %855 }
 0x334   :  { %3762 = vpow2.f32 %v880_v50  ;;  %v870_v52 = vsub.f32 %v838_v63, %v856_v51 }
 0x336   :  { %v3759_v54 = vpop.eup %3758  ;;  %v882_v55 = vmul.f32 1.442695, %v870_v52 }
 0x337   :  { %v859_v56 = vpop.xlane.xlu0 %858  ;;  %v893_v57 = vsel %vm417_vm2, %v3759_v54, 0.0 }
 0x338   :  { %3764 = vpow2.f32 %v882_v55  ;;  %v871_v33 = vsub.f32 %v839_v13, %v859_v56  ;;  %894 = vadd.xlane.f32.xlu0 %v893_v57 }
 0x33a   :  { %v4327_v59 = vpop.eup %3760  ;;  %v884_v43 = vmul.f32 1.442695, %v871_v33 }
 0x33b   :  { %v862_v60 = vpop.xlane.xlu1 %861  ;;  %v896_v61 = vsel %vm417_vm2, %v4327_v59, 0.0 }
 0x33c   :  { %3766 = vpow2.f32 %v884_v43  ;;  %v872_v53 = vsub.f32 %v840_v12, %v862_v60  ;;  %897 = vadd.xlane.f32.xlu1 %v896_v61 }
 0x33e   :  { %v3763_v62 = vpop.eup %3762  ;;  %v886_v63 = vmul.f32 1.442695, %v872_v53  ;;  %v413_v53 = vpack.c.bf16 %v4224_v4, %v4224_v4 }
 0x33f   :  { %v865_v2 = vpop.xlane.xlu0 %864  ;;  %v391_v3 = vpop.permute.xlu1 %390  ;;  %v899_v5 = vsel %vm417_vm2, %v3763_v62, 0.0 }
 0x340   :  { %3768 = vpow2.f32 %v886_v63  ;;  %v873_v7 = vsub.f32 %v841_v11, %v865_v2  ;;  %v410_v8 = vpack.c.bf16 %v391_v3, %v391_v3  ;;  %900 = vadd.xlane.f32.xlu0 %v899_v5  ;;  %v1127_v2 = vsel %vm941_vm3, %v413_v53, 0 }
 0x342   :  { %v4332_v9 = vpop.eup %3764  ;;  %v888_v10 = vmul.f32 1.442695, %v873_v7  ;;  %v989_v13 = vsel %vm941_vm3, %v410_v8, 0 }
 0x343   :  { %3463 = vmatpush3.bf16.msra.mxu0 %v989_v13  ;;  %v902_v14 = vsel %vm417_vm2, %v4332_v9, 0.0 }
 0x344   :  { %3770 = vpow2.f32 %v888_v10  ;;  %903 = vadd.xlane.f32.xlu1 %v902_v14  ;;  %3474 = vmatprep.subr.bf16.mxu0 %v3966_v0 }
 0x346   :  { %v3767_v16 = vpop.eup %3766 }
 0x347   :  { %v905_v18 = vsel %vm417_vm2, %v3767_v16, 0.0 }
 0x348   :  { %906 = vadd.xlane.f32.xlu0 %v905_v18 }
 0x34a   :  { %v4339_v20 = vpop.eup %3768 }
 0x34b   :  { %v908_v21 = vsel %vm417_vm2, %v4339_v20, 0.0 }
 0x34c   :  { %909 = vadd.xlane.f32.xlu0 %v908_v21 }
 0x34e   :  { %v4343_v22 = vpop.eup %3770 }
 0x34f   :  { %v911_v12 = vsel %vm417_vm2, %v4343_v22, 0.0 }
 0x350   :  { %912 = vadd.xlane.f32.xlu0 %v911_v12 }
 0x355   :  { %396 = vrot.lane.b32.xlu1 %v4222_v1, %s3969_s12 }
 0x359   :  { %400 = vrot.lane.b32.xlu1 %v4224_v4, %s3968_s8 }
 0x35d   :  { %403 = vrot.lane.b32.xlu1 %v4224_v4, %s3970_s1 }
 0x361   :  { %406 = vrot.lane.b32.xlu1 %v4224_v4, %s3969_s12 }
 0x366   :  { %393 = vrot.lane.b32.xlu0 %v4222_v1, %s3970_s1 }
 0x370   :  { %v892_v23 = vpop.xlane.xlu1 %891 }
 0x371   :  { %3772 = vrcp.f32 %v892_v23 }
 0x37b   :  { %v3773_v24 = vpop.eup %3772 }
 0x37c   :  { %v922_v25 = vmul.f32 %v3773_v24, %v4319_v39 }
 0x37e   :  { %v930_v27 = vpack.c.bf16 %v922_v25, %v922_v25 }
 0x380   :  { %3459 = vmatmul.mubr.msk.bf16.vlgmr.msra.gmra.mrb[24].mxu1 %vm417_vm2, %v930_v27 }
 0x381   :  { %3470 = vmatprep.mubr.msk.bf16.mxu1 %vm3967_vm0, %v3966_v0 }
 0x3c5   :  { %v895_v28 = vpop.xlane.xlu0 %894 }
 0x3c6   :  { %3774 = vrcp.f32 %v895_v28 }
 0x3c9   :  { %v898_v11 = vpop.xlane.xlu1 %897 }
 0x3cd   :  { %v901_v30 = vpop.xlane.xlu0 %900 }
 0x3ce   :  { %3776 = vrcp.f32 %v901_v30  ;;  %v3734_v30 = vld [vmem:[#allocation7] sm:$0xff]  }
 0x3cf   :  { %3778 = vrcp.f32 %v898_v11 }
 0x3d0   :  { %v3775_v31 = vpop.eup %3774 }
 0x3d1   :  { %v923_v32 = vmul.f32 %v3775_v31, %v3759_v54  ;;  %v904_v34 = vpop.xlane.xlu1 %903 }
 0x3d3   :  { %v931_v1 = vpack.c.bf16 %v923_v32, %v923_v32 }
 0x3d5   :  { %v907_v35 = vpop.xlane.xlu0 %906  ;;  %3465 = vmatmul.mubr.msk.bf16.vlgmr.msra.gmra.mrb[20].mxu0 %vm417_vm2, %v931_v1  ;;  %v397_v36 = vpop.permute.xlu1 %396 }
 0x3d6   :  { %3780 = vrcp.f32 %v907_v35  ;;  %v412_v37 = vpack.c.bf16 %v397_v36, %v397_v36  ;;  %3476 = vmatprep.mubr.msk.bf16.mxu0 %vm3967_vm0, %v3966_v0 }
 0x3d7   :  { %3782 = vrcp.f32 %v904_v34 }
 0x3d8   :  { %v3777_v39 = vpop.eup %3776  ;;  %v1081_v40 = vsel %vm941_vm3, %v412_v37, 0 }
 0x3d9   :  { %v925_v41 = vmul.f32 %v3777_v39, %v3763_v62  ;;  %v910_v42 = vpop.xlane.xlu0 %909  ;;  %3475 = vmatpush3.bf16.msra.mxu0 %v1081_v40  ;;  %v401_v44 = vpop.permute.xlu1 %400 }
 0x3da   :  { %v414_v45 = vpack.c.bf16 %v401_v44, %v401_v44  ;;  %3486 = vmatprep.subr.bf16.mxu0 %v3966_v0  ;;  %v3779_v50 = vpop.eup %3778 }
 0x3db   :  { %v933_v46 = vpack.c.bf16 %v925_v41, %v925_v41  ;;  %v924_v56 = vmul.f32 %v3779_v50, %v4327_v59 }
 0x3dc   :  { %v1173_v47 = vsel %vm941_vm3, %v414_v45, 0 }
 0x3dd   :  { %v913_v49 = vpop.xlane.xlu0 %912  ;;  %3477 = vmatmul.mubr.msk.bf16.vlgmr.msra.gmra.mrb[24].mxu0 %vm417_vm2, %v933_v46  ;;  %v404_v17 = vpop.permute.xlu1 %403  ;;  %v932_v62 = vpack.c.bf16 %v924_v56, %v924_v56 }
 0x3de   :  { %3784 = vrcp.f32 %v913_v49  ;;  %3487 = vmatpush3.bf16.msra.mxu0 %v1173_v47  ;;  %3488 = vmatprep.mubr.msk.bf16.mxu0 %vm3967_vm0, %v3966_v0  ;;  %v415_v7 = vpack.c.bf16 %v404_v17, %v404_v17  ;;  %v3735_v49 = vld [vmem:[#allocation7 + $0x8] sm:$0xff]  }
 0x3df   :  { %3498 = vmatprep.subr.bf16.mxu0 %v3966_v0  ;;  %3786 = vrcp.f32 %v910_v42 }
 0x3e0   :  { %v3781_v51 = vpop.eup %3780  ;;  %v1219_v13 = vsel %vm941_vm3, %v415_v7, 0 }
 0x3e1   :  { %v927_v52 = vmul.f32 %v3781_v51, %v3767_v16  ;;  %v394_v54 = vpop.permute.xlu0 %393  ;;  %v407_v55 = vpop.permute.xlu1 %406 }
 0x3e2   :  { %v411_v57 = vpack.c.bf16 %v394_v54, %v394_v54  ;;  %v416_v33 = vpack.c.bf16 %v407_v55, %v407_v55  ;;  %v3783_v63 = vpop.eup %3782 }
 0x3e3   :  { %v935_v43 = vpack.c.bf16 %v927_v52, %v927_v52  ;;  %v926_v3 = vmul.f32 %v3783_v63, %v4332_v9 }
 0x3e4   :  { %v1035_v60 = vsel %vm941_vm3, %v411_v57, 0  ;;  %v1265_v61 = vsel %vm941_vm3, %v416_v33, 0 }
 0x3e5   :  { %3469 = vmatpush3.bf16.msra.mxu1 %v1035_v60  ;;  %3489 = vmatmul.mubr.msk.bf16.vlgmr.msra.gmra.mrb[28].mxu0 %vm417_vm2, %v935_v43  ;;  %v934_v8 = vpack.c.bf16 %v926_v3, %v926_v3 }
 0x3e6   :  { %3499 = vmatpush3.bf16.msra.mxu0 %v1265_v61  ;;  %3480 = vmatprep.subr.bf16.mxu1 %v3966_v0 }
 0x3e7   :  { %3500 = vmatprep.mubr.msk.bf16.mxu0 %vm3967_vm0, %v3966_v0  ;;  %3512 = vmatprep.subr.bf16.mxu0 %v3966_v0 }
 0x3e8   :  { %v3785_v59 = vpop.eup %3784  ;;  %3471 = vmatmul.mubr.msk.bf16.vlgmr.msra.gmra.mrb[28].mxu1 %vm417_vm2, %v932_v62 }
 0x3e9   :  { %v929_v4 = vmul.f32 %v3785_v59, %v4343_v22  ;;  %3481 = vmatpush3.bf16.msra.mxu1 %v1127_v2  ;;  %3482 = vmatprep.mubr.msk.bf16.mxu1 %vm3967_vm0, %v3966_v0  ;;  %v3787_v10 = vpop.eup %3786 }
 0x3ea   :  { %3492 = vmatprep.subr.bf16.mxu1 %v3966_v0  ;;  %v928_v9 = vmul.f32 %v3787_v10, %v4339_v20 }
 0x3eb   :  { %v937_v5 = vpack.c.bf16 %v929_v4, %v929_v4 }
 0x3ec   :  { %v936_v14 = vpack.c.bf16 %v928_v9, %v928_v9  ;;  %v3186_v9 = vld [vmem:[%s4783_s9] ss:$0 sm:$0xff] }
 0x3ed   :  { %3501 = vmatmul.mubr.msk.bf16.vlgmr.msra.gmra.mrb[32].mxu0 %vm417_vm2, %v937_v5 }
 0x3ee   :  { %3516 = vmatprep.mubr.msk.bf16.mxu0 %vm3967_vm0, %v3966_v0 }
 0x3f0   :  { %3483 = vmatmul.mubr.msk.bf16.vlgmr.msra.gmra.mrb[32].mxu1 %vm417_vm2, %v934_v8 }
 0x3f1   :  { %3493 = vmatpush3.bf16.msra.mxu1 %v1219_v13  ;;  %3494 = vmatprep.mubr.msk.bf16.mxu1 %vm3967_vm0, %v3966_v0 }
 0x3f2   :  { %3504 = vmatprep.subr.bf16.mxu1 %v3966_v0 }
 0x3f8   :  { %3495 = vmatmul.mubr.msk.bf16.vlgmr.msra.gmra.mrb[36].mxu1 %vm417_vm2, %v936_v14 }
 0x3f9   :  { %3508 = vmatprep.mubr.msk.bf16.mxu1 %vm3967_vm0, %v3966_v0  ;;  %3505 = vmatpush3.bf16.msra.mxu1 %v3734_v30 }
 0x3fa   :  { %3506 = vmatprep.subr.bf16.mxu1 %v3966_v0 }
 0x3fd   :  { %3507 = vmatpush3.bf16.msra.mxu1 %v3735_v49 }
 0x3fe   :  { %3520 = vmatprep.subr.bf16.mxu1 %v3966_v0 }
 0x453   :  { %v979_v16 = vpop.f32.mrb[24].mxu1 }
 0x454   :  { %v3460_v18 = vpop.f32.mrb[25].mxu1 }
 0x455   :  { %v982_v21 = vpop.f32.mrb[26].mxu1 }
 0x456   :  { %v3461_v22 = vpop.f32.mrb[27].mxu1 }
 0x4a8   :  { %v1025_v12 = vpop.f32.mrb[20].mxu0 }
 0x4a9   :  { %v3466_v23 = vpop.f32.mrb[21].mxu0 }
 0x4aa   :  { %v1028_v24 = vpop.f32.mrb[22].mxu0  ;;  %v3836_v23 = vld [vmem:[#allocation2] sm:$0xff] }
 0x4ab   :  { %v3467_v25 = vpop.f32.mrb[23].mxu0 }
 0x4b0   :  { %v1117_v27 = vpop.f32.mrb[24].mxu0 }
 0x4b1   :  { %v3478_v28 = vpop.f32.mrb[25].mxu0 }
 0x4b2   :  { %v1120_v11 = vpop.f32.mrb[26].mxu0 }
 0x4b3   :  { %v3479_v20 = vpop.f32.mrb[27].mxu0 }
 0x4b8   :  { %v1209_v31 = vpop.f32.mrb[28].mxu0 }
 0x4b9   :  { %v3698_v32 = vpack.i.bf16 %v1209_v31, %v1025_v12  ;;  %v3490_v34 = vpop.f32.mrb[29].mxu0 }
 0x4ba   :  { %v1212_v1 = vpop.f32.mrb[30].mxu0 }
 0x4bb   :  { %3699 = vrot.lane.b32.xlu0 %v3698_v32, %s3961_s0  ;;  %v1071_v35 = vpop.f32.mrb[28].mxu1  ;;  %v3491_v36 = vpop.f32.mrb[31].mxu0 }
 0x4bc   :  { %v3472_v37 = vpop.f32.mrb[29].mxu1 }
 0x4bd   :  { %v1074_v39 = vpop.f32.mrb[30].mxu1 }
 0x4be   :  { %v3473_v40 = vpop.f32.mrb[31].mxu1 }
 0x4bf   :  { %v3736_v40 = vld [vmem:[#allocation8] sm:$0xff]  }
 0x4c0   :  { %v1301_v41 = vpop.f32.mrb[32].mxu0  ;;  %3513 = vmatpush3.bf16.msra.mxu0 %v3736_v40  ;;  %v3743_v40 = vld [vmem:[%s4780_s6 + $0x10] sm:$0xff]  }
 0x4c1   :  { %v3708_v42 = vpack.i.bf16 %v1301_v41, %v1117_v27  ;;  %v3502_v44 = vpop.f32.mrb[33].mxu0  ;;  %v3837_v27 = vld [vmem:[#allocation2 + $0x8] sm:$0xff]  ;;  %v3737_v41 = vld [vmem:[#allocation8 + $0x8] sm:$0xff]   ;;  %3514 = vmatprep.subr.bf16.mxu0 %v3966_v0 }
 0x4c2   :  { %v1304_v45 = vpop.f32.mrb[34].mxu0  ;;  %v3739_v44 = vld [vmem:[%s4788_s14 + $0x8] sm:$0xff]  }
 0x4c3   :  { %3709 = vrot.lane.b32.xlu0 %v3708_v42, %s3972_s18  ;;  %v1163_v46 = vpop.f32.mrb[32].mxu1  ;;  %v3503_v47 = vpop.f32.mrb[35].mxu0  ;;  %v3738_v42 = vld [vmem:[%s4788_s14] sm:$0xff]  }
 0x4c4   :  { %v3484_v17 = vpop.f32.mrb[33].mxu1  ;;  %3515 = vmatpush3.bf16.msra.mxu0 %v3737_v41  ;;  %v3744_v41 = vld [vmem:[%s4806_s29 + $0x18] sm:$0xff]  }
 0x4c5   :  { %v1166_v50 = vpop.f32.mrb[34].mxu1  ;;  %3532 = vmatprep.subr.bf16.mxu0 %v3966_v0 }
 0x4c6   :  { %v3485_v51 = vpop.f32.mrb[35].mxu1 }
 0x4cb   :  { %v1255_v52 = vpop.f32.mrb[36].mxu1 }
 0x4cc   :  { %v3703_v54 = vpack.i.bf16 %v1255_v52, %v1071_v35  ;;  %v3496_v55 = vpop.f32.mrb[37].mxu1  ;;  %v3190_v52 = vld [vmem:[%s4784_s10] ss:$0 sm:$0xff] }
 0x4cd   :  { %v1258_v56 = vpop.f32.mrb[38].mxu1 }
 0x4ce   :  { %3704 = vrot.lane.b32.xlu1 %v3703_v54, %s3957_s23  ;;  %v3497_v57 = vpop.f32.mrb[39].mxu1 }
 0x52d   :  { %v3700_v33 = vpop.permute.xlu0 %3699 }
 0x52e   :  { %v3702_v43 = vunpack.i.h.bf16 %v3700_v33  ;;  %v3701_v60 = vunpack.i.l.bf16 %v3700_v33  ;;  %v3191_v33 = vld [vmem:[%s4785_s11] ss:$0 sm:$0xff] }
 0x530   :  { %v1319_v59 = vsel %vm417_vm2, %v979_v16, %v3701_v60  ;;  %v1336_v2 = vsel %vm417_vm2, %v1163_v46, %v3702_v43 }
 0x535   :  { %v3710_v61 = vpop.permute.xlu0 %3709 }
 0x536   :  { %v3712_v4 = vunpack.i.h.bf16 %v3710_v61  ;;  %v3711_v3 = vunpack.i.l.bf16 %v3710_v61 }
 0x540   :  { %v3705_v53 = vpop.permute.xlu1 %3704 }
 0x541   :  { %v3707_v62 = vunpack.i.h.bf16 %v3705_v53  ;;  %v3706_v63 = vunpack.i.l.bf16 %v3705_v53 }
 0x543   :  { %v1337_v5 = vsel %vm1320_vm10, %v1336_v2, %v3707_v62  ;;  %v1321_v7 = vsel %vm1320_vm10, %v1319_v59, %v3706_v63  ;;  %v3740_v62 = vld [vmem:[%s4788_s14 + $0x10] sm:$0xff]   ;;  %v3741_v63 = vld [vmem:[%s4788_s14 + $0x18] sm:$0xff]   ;;  %v3192_v59 = vld [vmem:[%s4787_s13] ss:$0 sm:$0xff] }
 0x544   :  { %v1338_v8 = vsel %vm1322_vm12, %v1337_v5, %v3712_v4  ;;  %v1323_v10 = vsel %vm1322_vm12, %v1321_v7, %v3711_v3 }
 0x545   :  { %v1339_v13 = vpack.c.bf16 %v1338_v8, %v1323_v10 }
 0x547   :  { %3509 = vmatmul.mubr.msk.bf16.vlgmr.msra.gmra.mrb[40].mxu1 %vm158_vm1, %v1339_v13 }
 0x548   :  { %3528 = vmatprep.mubr.msk.bf16.mxu1 %vm3967_vm0, %v3966_v0  ;;  %3521 = vmatpush3.bf16.msra.mxu1 %v3738_v42  ;;  %v3745_v42 = vld [vmem:[%s4780_s6 + $0x18] sm:$0xff]  }
 0x549   :  { %3522 = vmatprep.subr.bf16.mxu1 %v3966_v0 }
 0x54c   :  { %3523 = vmatpush3.bf16.msra.mxu1 %v3739_v44 }
 0x54d   :  { %3524 = vmatprep.subr.bf16.mxu1 %v3966_v0 }
 0x550   :  { %3525 = vmatpush3.bf16.msra.mxu1 %v3740_v62  ;;  %v3747_v62 = vld [vmem:[%s4778_s4 + $0x18] sm:$0xff]  }
 0x551   :  { %3526 = vmatprep.subr.bf16.mxu1 %v3966_v0 }
 0x554   :  { %3527 = vmatpush3.bf16.msra.mxu1 %v3741_v63 }
 0x555   :  { %3548 = vmatprep.subr.bf16.mxu1 %v3966_v0 }
 0x61a   :  { %v1400_v14 = vpop.f32.mrb[40].mxu1 }
 0x61b   :  { %v1401_v16 = vadd.f32 %v3186_v9, %v1400_v14  ;;  %v3510_v18 = vpop.f32.mrb[41].mxu1  ;;  %v3196_v14 = vld [vmem:[%s4789_s15] ss:$0 sm:$0xff] }
 0x61c   :  { %v1403_v21 = vpop.f32.mrb[42].mxu1 }
 0x61d   :  { %v1404_v22 = vadd.f32 %v3186_v9, %v1403_v21  ;;  %v3511_v12 = vpop.f32.mrb[43].mxu1  ;;  %v1407_v24 = vadd.f32 %v3836_v23, %v1401_v16 }
 0x61f   :  { %v1411_v25 = vsel %vm158_vm1, %v1407_v24, 0.0  ;;  %v1408_v28 = vadd.f32 %v3837_v27, %v1404_v22 }
 0x620   :  { %1412 = vadd.xlane.f32.xlu1 %v1411_v25 }
 0x621   :  { %v1414_v11 = vsel %vm158_vm1, %v1408_v28, 0.0 }
 0x622   :  { %1415 = vadd.xlane.f32.xlu0 %v1414_v11 }
 0x6ad   :  { %v1413_v20 = vpop.xlane.xlu1 %1412 }
 0x6ae   :  { %v1418_v30 = vmul.f32 0.03125, %v1413_v20 }
 0x6af   :  { %v1416_v31 = vpop.xlane.xlu0 %1415 }
 0x6b0   :  { %v1420_v32 = vsub.f32 %v1407_v24, %v1418_v30  ;;  %v1419_v34 = vmul.f32 0.03125, %v1416_v31 }
 0x6b2   :  { %v1421_v1 = vsub.f32 %v1408_v28, %v1419_v34  ;;  %v1422_v35 = vmul.f32 %v1420_v32, %v1420_v32 }
 0x6b4   :  { %v1424_v36 = vsel %vm158_vm1, %v1422_v35, 0.0  ;;  %v1423_v37 = vmul.f32 %v1421_v1, %v1421_v1 }
 0x6b5   :  { %1425 = vadd.xlane.f32.xlu0 %v1424_v36 }
 0x6b6   :  { %v1427_v39 = vsel %vm158_vm1, %v1423_v37, 0.0 }
 0x6b7   :  { %1428 = vadd.xlane.f32.xlu1 %v1427_v39  ;;  %v3742_v39 = vld [vmem:[%s4806_s29 + $0x10] sm:$0xff]  }
 0x742   :  { %v1426_v45 = vpop.xlane.xlu0 %1425 }
 0x743   :  { %v1430_v46 = vmul.f32 0.03125, %v1426_v45 }
 0x744   :  { %v1429_v47 = vpop.xlane.xlu1 %1428 }
 0x745   :  { %v1432_v49 = vadd.f32 1e-05, %v1430_v46  ;;  %v1431_v17 = vmul.f32 0.03125, %v1429_v47 }
 0x747   :  { %3788 = vrsqrt.f32 %v1432_v49  ;;  %v1433_v50 = vadd.f32 1e-05, %v1431_v17 }
 0x749   :  { %3790 = vrsqrt.f32 %v1433_v50 }
 0x751   :  { %v3789_v51 = vpop.eup %3788 }
 0x752   :  { %v1436_v54 = vmul.f32 %v3789_v51, %v1420_v32  ;;  %v3202_v51 = vld [vmem:[%s4790_s16] ss:$0 sm:$0xff] }
 0x753   :  { %v3791_v55 = vpop.eup %3790 }
 0x754   :  { %v1444_v56 = vmul.f32 %v3190_v52, %v1436_v54  ;;  %v1437_v57 = vmul.f32 %v3791_v55, %v1421_v1 }
 0x756   :  { %v1445_v43 = vmul.f32 %v3190_v52, %v1437_v57  ;;  %v1452_v60 = vadd.f32 %v3191_v33, %v1444_v56  ;;  %v3203_v57 = vld [vmem:[%s4823_s20] ss:$0 sm:$0xff] }
 0x758   :  { %v1453_v61 = vadd.f32 %v3191_v33, %v1445_v43 }
 0x75a   :  { %v1454_v53 = vpack.c.bf16 %v1453_v61, %v1452_v60 }
 0x75c   :  { %3517 = vmatmul.mubr.msk.bf16.vlgmr.msra.gmra.mrb[36].mxu0 %vm158_vm1, %v1454_v53 }
 0x75d   :  { %3536 = vmatprep.mubr.msk.bf16.mxu0 %vm3967_vm0, %v3966_v0  ;;  %3533 = vmatpush3.bf16.msra.mxu0 %v3742_v39 }
 0x75e   :  { %3534 = vmatprep.subr.bf16.mxu0 %v3966_v0 }
 0x761   :  { %3535 = vmatpush3.bf16.msra.mxu0 %v3744_v41 }
 0x762   :  { %3540 = vmatprep.subr.bf16.mxu0 %v3966_v0 }
 0x82f   :  { %v1515_v2 = vpop.f32.mrb[36].mxu0 }
 0x830   :  { %v1516_v4 = vadd.f32 %v3192_v59, %v1515_v2  ;;  %v3518_v3 = vpop.f32.mrb[37].mxu0 }
 0x831   :  { %v1518_v5 = vpop.f32.mrb[38].mxu0  ;;  %v4511_v3 = vld [vmem:[%s4781_s7 + $0x1] ss:$0 sm:$0xff] }
 0x832   :  { %v1519_v7 = vadd.f32 %v3192_v59, %v1518_v5  ;;  %v3519_v8 = vpop.f32.mrb[39].mxu0  ;;  %v1522_v10 = vmax.f32 %v1516_v4, 0.0 }
 0x834   :  { %v1523_v13 = vmax.f32 %v1519_v7, 0.0 }
 0x836   :  { %v1524_v9 = vpack.c.bf16 %v1523_v13, %v1522_v10 }
 0x838   :  { %3529 = vmatmul.mubr.msk.bf16.vlgmr.msra.gmra.mrb[44].mxu1 %vm1564_vm14, %v1524_v9  ;;  %v3209_v9 = vld [vmem:[%s4777_s3 + $0x1] ss:$0 sm:$0xff] }
 0x839   :  { %3552 = vmatprep.mubr.msk.bf16.mxu1 %vm3967_vm0, %v3966_v0  ;;  %3549 = vmatpush3.bf16.msra.mxu1 %v3743_v40 }
 0x83a   :  { %3550 = vmatprep.subr.bf16.mxu1 %v3966_v0 }
 0x83d   :  { %3551 = vmatpush3.bf16.msra.mxu1 %v3745_v42 }
 0x83e   :  { %3562 = vmatprep.subr.bf16.mxu1 %v3966_v0 }
 0x90b   :  { %v1602_v16 = vpop.f32.mrb[44].mxu1 }
 0x90c   :  { %v1603_v18 = vadd.f32 %v3196_v14, %v1602_v16  ;;  %v3530_v21 = vpop.f32.mrb[45].mxu1 }
 0x90d   :  { %v1605_v22 = vpop.f32.mrb[46].mxu1 }
 0x90e   :  { %v1606_v12 = vadd.f32 %v3196_v14, %v1605_v22  ;;  %v3531_v23 = vpop.f32.mrb[47].mxu1  ;;  %v1609_v24 = vadd.f32 %v1603_v18, %v1452_v60  ;;  %v3218_v14 = vld [vmem:[%s4779_s5 + $0x1] ss:$0 sm:$0xff] }
 0x910   :  { %v1613_v25 = vsel %vm158_vm1, %v1609_v24, 0.0  ;;  %v1610_v27 = vadd.f32 %v1606_v12, %v1453_v61  ;;  %v3746_v61 = vld [vmem:[%s4778_s4 + $0x10] sm:$0xff]   ;;  %s3973_s4 = smov [#allocation10]  }
 0x911   :  { %1614 = vadd.xlane.f32.xlu0 %v1613_v25  ;;  %s3144_s28 = sshll.u32 %s3973_s4, 4  ;;  %s3145_s28 = int_to_ptr.vmem [resolvable:$true] %s3144_s28 }
 0x912   :  { %v1616_v28 = vsel %vm158_vm1, %v1610_v27, 0.0  ;;  %s3926_s24 = scalar_lea.vmem %s3145_s28, 256  ;;  %p3931_p5 = scmp.lt.s32.totalorder %s3145_s28, %s3145_s28 }
 0x913   :  { %1617 = vadd.xlane.f32.xlu1 %v1616_v28  ;;  %p3927_p4 = scmp.ne.s32.totalorder %s3145_s28, %s3926_s24  ;;  %p3932_p6 = scmp.lt.s32.totalorder %s3926_s24, %s3926_s24 }
 0x915   :  { %p3933_p7 = por %p3932_p6, %p3931_p5 }
 0x917   :  { %p3934_p8 = pnand %p3933_p7, %p3927_p4 }
 0x99e   :  { %v1615_v11 = vpop.xlane.xlu0 %1614 }
 0x99f   :  { %v1619_v20 = vmul.f32 0.03125, %v1615_v11 }
 0x9a0   :  { %v1618_v30 = vpop.xlane.xlu1 %1617 }
 0x9a1   :  { %v1621_v31 = vsub.f32 %v1609_v24, %v1619_v20  ;;  %v1620_v32 = vmul.f32 0.03125, %v1618_v30 }
 0x9a3   :  { %v1622_v34 = vsub.f32 %v1610_v27, %v1620_v32  ;;  %v1623_v1 = vmul.f32 %v1621_v31, %v1621_v31 }
 0x9a5   :  { %v1625_v35 = vsel %vm158_vm1, %v1623_v1, 0.0  ;;  %v1624_v36 = vmul.f32 %v1622_v34, %v1622_v34 }
 0x9a6   :  { %1626 = vadd.xlane.f32.xlu0 %v1625_v35 }
 0x9a7   :  { %v1628_v37 = vsel %vm158_vm1, %v1624_v36, 0.0 }
 0x9a8   :  { %1629 = vadd.xlane.f32.xlu1 %v1628_v37 }
 0xa33   :  { %v1627_v44 = vpop.xlane.xlu0 %1626 }
 0xa34   :  { %v1631_v45 = vmul.f32 0.03125, %v1627_v44 }
 0xa35   :  { %v1630_v46 = vpop.xlane.xlu1 %1629 }
 0xa36   :  { %v1633_v47 = vadd.f32 1e-05, %v1631_v45  ;;  %v1632_v49 = vmul.f32 0.03125, %v1630_v46 }
 0xa38   :  { %3792 = vrsqrt.f32 %v1633_v47  ;;  %v1634_v17 = vadd.f32 1e-05, %v1632_v49 }
 0xa3a   :  { %3794 = vrsqrt.f32 %v1634_v17 }
 0xa42   :  { %v3793_v50 = vpop.eup %3792 }
 0xa43   :  { %v1637_v52 = vmul.f32 %v3793_v50, %v1621_v31 }
 0xa44   :  { %v3795_v54 = vpop.eup %3794 }
 0xa45   :  { %v1645_v55 = vmul.f32 %v3202_v51, %v1637_v52  ;;  %v1638_v56 = vmul.f32 %v3795_v54, %v1622_v34 }
 0xa47   :  { %v1646_v33 = vmul.f32 %v3202_v51, %v1638_v56  ;;  %v4483_v43 = vadd.f32 %v3203_v57, %v1645_v55 }
 0xa49   :  { %v4485_v60 = vadd.f32 %v3203_v57, %v1646_v33 }
 0xa4b   :  { %v1655_v53 = vpack.c.bf16 %v4485_v60, %v4483_v43 }
 0xa4d   :  { %3537 = vmatmul.mubr.msk.bf16.vlgmr.msra.gmra.mrb[40].mxu0 %vm158_vm1, %v1655_v53  ;;  %3553 = vmatmul.mubr.msk.bf16.vlgmr.msra.gmra.mrb[48].mxu1 %vm158_vm1, %v1655_v53 }
 0xa4e   :  { %3541 = vmatpush3.bf16.msra.mxu0 %v3746_v61  ;;  %3544 = vmatprep.mubr.msk.bf16.mxu0 %vm3967_vm0, %v3966_v0 }
 0xa4f   :  { %3542 = vmatprep.subr.bf16.mxu0 %v3966_v0  ;;  %3564 = vmatprep.mubr.msk.bf16.mxu1 %vm3967_vm0, %v3966_v0 }
 0xa52   :  { %3543 = vmatpush3.bf16.msra.mxu0 %v3747_v62 }
 0xa53   :  { %3556 = vmatprep.subr.bf16.mxu0 %v3966_v0 }
 0xa55   :  { %3545 = vmatmul.mubr.msk.bf16.vlgmr.msra.gmra.mrb[44].mxu0 %vm158_vm1, %v1655_v53 }
 0xa56   :  { %3558 = vmatprep.mubr.msk.bf16.mxu0 %vm3967_vm0, %v3966_v0 }
 0xb20   :  { %v1718_v63 = vpop.f32.mrb[40].mxu0  ;;  %v4506_v59 = vpop.f32.mrb[48].mxu1 }
 0xb21   :  { %v3538_v2 = vpop.f32.mrb[41].mxu0  ;;  %v3554_v4 = vpop.f32.mrb[49].mxu1  ;;  %v1719_v18 = vadd.f32 %v3209_v9, %v1718_v63  ;;  %v4555_v57 = vadd.f32 %v4511_v3, %v4506_v59 }
 0xb22   :  { %v1721_v5 = vpop.f32.mrb[42].mxu0  ;;  %v1853_v7 = vpop.f32.mrb[50].mxu1 }
 0xb23   :  { %v4514_v8 = vadd.f32 %v4511_v3, %v1853_v7  ;;  %v3539_v10 = vpop.f32.mrb[43].mxu0  ;;  %v3555_v13 = vpop.f32.mrb[51].mxu1  ;;  %v1857_v25 = vmul.f32 0.35355338, %v1719_v18  ;;  %v1722_v11 = vadd.f32 %v3209_v9, %v1721_v5  ;;  %v1935_v59 = vpack.c.bf16 %v4555_v57, %v4555_v57 }
 0xb25   :  { %v1879_v28 = vpack.c.bf16 %v1857_v25, %v1857_v25  ;;  %v1858_v30 = vmul.f32 0.35355338, %v1722_v11  ;;  %v2419_v5 = vsel %vm941_vm3, %v1935_v59, 0 }
 0xb27   :  { %v1883_v55 = vpack.c.bf16 %v1858_v30, %v1858_v30 }
 0xb28   :  { %v1784_v16 = vpop.f32.mrb[44].mxu0 }
 0xb29   :  { %v1785_v21 = vadd.f32 %v3218_v14, %v1784_v16  ;;  %v3546_v22 = vpop.f32.mrb[45].mxu0 }
 0xb2a   :  { %v1787_v12 = vpop.f32.mrb[46].mxu0 }
 0xb2b   :  { %1891 = vrot.lane.b32.xlu1 %v1785_v21, %s3970_s1  ;;  %1888 = vrot.lane.b32.xlu0 %v1785_v21, %s3968_s8  ;;  %v3547_v23 = vpop.f32.mrb[47].mxu0  ;;  %v1907_v24 = vpack.c.bf16 %v1785_v21, %v1785_v21  ;;  %v1788_v20 = vadd.f32 %v3218_v14, %v1787_v12 }
 0xb2d   :  { %v1947_v27 = vsel %vm417_vm2, %v1907_v24, 0  ;;  %v1911_v41 = vpack.c.bf16 %v1788_v20, %v1788_v20 }
 0xb2e   :  { %3557 = vmatpush3.bf16.xpose.msra.mxu0 %v1947_v27 }
 0xb2f   :  { %1860 = vrot.lane.b32.xlu1 %v1857_v25, %s3968_s8  ;;  %1894 = vrot.lane.b32.xlu0 %v1785_v21, %s3969_s12  ;;  %v2131_v49 = vsel %vm417_vm2, %v1911_v41, 0 }
 0xb30   :  { %3568 = vmatprep.subr.bf16.mxu0 %v3966_v0 }
 0xb33   :  { %1863 = vrot.lane.b32.xlu1 %v1857_v25, %s3970_s1  ;;  %1866 = vrot.lane.b32.xlu0 %v1857_v25, %s3969_s12 }
 0xb35   :  { %3559 = vmatmul.mubr.msk.bf16.vlgmr.msra.gmra.mrb[48].mxu0 %vm417_vm2, %v1879_v28 }
 0xb36   :  { %3570 = vmatprep.mubr.msk.bf16.mxu0 %vm3967_vm0, %v3966_v0 }
 0xb37   :  { %1901 = vrot.lane.b32.xlu0 %v1788_v20, %s3970_s1  ;;  %1898 = vrot.lane.b32.xlu1 %v1788_v20, %s3968_s8 }
 0xb3b   :  { %1904 = vrot.lane.b32.xlu0 %v1788_v20, %s3969_s12  ;;  %1870 = vrot.lane.b32.xlu1 %v1858_v30, %s3968_s8 }
 0xb3f   :  { %1876 = vrot.lane.b32.xlu0 %v1858_v30, %s3969_s12  ;;  %1873 = vrot.lane.b32.xlu1 %v1858_v30, %s3970_s1 }
 0xb9d   :  { %v1892_v31 = vpop.permute.xlu1 %1891  ;;  %v1889_v32 = vpop.permute.xlu0 %1888 }
 0xb9e   :  { %v1909_v34 = vpack.c.bf16 %v1892_v31, %v1892_v31  ;;  %v1908_v1 = vpack.c.bf16 %v1889_v32, %v1889_v32 }
 0xba0   :  { %v2039_v35 = vsel %vm417_vm2, %v1909_v34, 0  ;;  %v1993_v36 = vsel %vm417_vm2, %v1908_v1, 0 }
 0xba1   :  { %v1861_v37 = vpop.permute.xlu1 %1860  ;;  %3563 = vmatpush3.bf16.xpose.msra.mxu1 %v1993_v36  ;;  %v1895_v39 = vpop.permute.xlu0 %1894  ;;  %3569 = vmatpush3.bf16.xpose.msra.mxu0 %v2039_v35 }
 0xba2   :  { %3574 = vmatprep.subr.bf16.mxu1 %v3966_v0  ;;  %3580 = vmatprep.subr.bf16.mxu0 %v3966_v0  ;;  %v1910_v40 = vpack.c.bf16 %v1895_v39, %v1895_v39  ;;  %v1880_v45 = vpack.c.bf16 %v1861_v37, %v1861_v37 }
 0xba4   :  { %v2085_v47 = vsel %vm417_vm2, %v1910_v40, 0 }
 0xba5   :  { %v1864_v42 = vpop.permute.xlu1 %1863  ;;  %v1867_v44 = vpop.permute.xlu0 %1866 }
 0xba6   :  { %v1881_v46 = vpack.c.bf16 %v1864_v42, %v1864_v42  ;;  %v1882_v56 = vpack.c.bf16 %v1867_v44, %v1867_v44 }
 0xba8   :  { %3565 = vmatmul.mubr.msk.bf16.vlgmr.msra.gmra.mrb[52].mxu1 %vm417_vm2, %v1880_v45  ;;  %3571 = vmatmul.mubr.msk.bf16.vlgmr.msra.gmra.mrb[52].mxu0 %vm417_vm2, %v1881_v46 }
 0xba9   :  { %3575 = vmatpush3.bf16.xpose.msra.mxu1 %v2085_v47  ;;  %v1902_v17 = vpop.permute.xlu0 %1901  ;;  %v1899_v50 = vpop.permute.xlu1 %1898  ;;  %3581 = vmatpush3.bf16.xpose.msra.mxu0 %v2131_v49 }
 0xbaa   :  { %3576 = vmatprep.mubr.msk.bf16.mxu1 %vm3967_vm0, %v3966_v0  ;;  %3582 = vmatprep.mubr.msk.bf16.mxu0 %vm3967_vm0, %v3966_v0  ;;  %v1913_v51 = vpack.c.bf16 %v1902_v17, %v1902_v17  ;;  %v1912_v52 = vpack.c.bf16 %v1899_v50, %v1899_v50 }
 0xbab   :  { %3586 = vmatprep.subr.bf16.mxu1 %v3966_v0  ;;  %3592 = vmatprep.subr.bf16.mxu0 %v3966_v0 }
 0xbac   :  { %v2223_v33 = vsel %vm417_vm2, %v1913_v51, 0  ;;  %v2177_v61 = vsel %vm417_vm2, %v1912_v52, 0 }
 0xbad   :  { %v1871_v54 = vpop.permute.xlu1 %1870  ;;  %v1905_v53 = vpop.permute.xlu0 %1904 }
 0xbae   :  { %v1914_v63 = vpack.c.bf16 %v1905_v53, %v1905_v53  ;;  %v1884_v2 = vpack.c.bf16 %v1871_v54, %v1871_v54 }
 0xbb0   :  { %3577 = vmatmul.mubr.msk.bf16.vlgmr.msra.gmra.mrb[56].mxu1 %vm417_vm2, %v1882_v56  ;;  %3583 = vmatmul.mubr.msk.bf16.vlgmr.msra.gmra.mrb[56].mxu0 %vm417_vm2, %v1883_v55  ;;  %v2269_v3 = vsel %vm417_vm2, %v1914_v63, 0 }
 0xbb1   :  { %3587 = vmatpush3.bf16.xpose.msra.mxu1 %v2177_v61  ;;  %3593 = vmatpush3.bf16.xpose.msra.mxu0 %v2223_v33  ;;  %v1874_v62 = vpop.permute.xlu1 %1873  ;;  %v1877_v7 = vpop.permute.xlu0 %1876 }
 0xbb2   :  { %3588 = vmatprep.mubr.msk.bf16.mxu1 %vm3967_vm0, %v3966_v0  ;;  %3594 = vmatprep.mubr.msk.bf16.mxu0 %vm3967_vm0, %v3966_v0  ;;  %v1885_v4 = vpack.c.bf16 %v1874_v62, %v1874_v62  ;;  %v1886_v10 = vpack.c.bf16 %v1877_v7, %v1877_v7 }
 0xbb3   :  { %3598 = vmatprep.subr.bf16.mxu1 %v3966_v0  ;;  %3604 = vmatprep.subr.bf16.mxu0 %v3966_v0 }
 0xbb8   :  { %3589 = vmatmul.mubr.msk.bf16.vlgmr.msra.gmra.mrb[60].mxu1 %vm417_vm2, %v1884_v2  ;;  %3595 = vmatmul.mubr.msk.bf16.vlgmr.msra.gmra.mrb[60].mxu0 %vm417_vm2, %v1885_v4 }
 0xbb9   :  { %3599 = vmatpush3.bf16.xpose.msra.mxu1 %v2269_v3  ;;  %3605 = vmatpush3.bf16.msra.mxu0 %v2419_v5 }
 0xbba   :  { %3600 = vmatprep.mubr.msk.bf16.mxu1 %vm3967_vm0, %v3966_v0  ;;  %3610 = vmatprep.subr.bf16.mxu1 %v3966_v0 }
 0xbbb   :  { %3606 = vmatprep.mubr.msk.bf16.mxu0 %vm3967_vm0, %v3966_v0  ;;  %3616 = vmatprep.subr.bf16.mxu0 %v3966_v0 }
 0xbc0   :  { %3601 = vmatmul.mubr.msk.bf16.vlgmr.msra.gmra.mrb[64].mxu1 %vm417_vm2, %v1886_v10 }
 0xbc1   :  { %3612 = vmatprep.mubr.msk.bf16.mxu1 %vm3967_vm0, %v3966_v0 }
 0xc08   :  { %v1983_v13 = vpop.f32.mrb[48].mxu0 }
 0xc09   :  { %v2311_v9 = vsel %vm4234_vm5, %v1983_v13, -1000000.0  ;;  %v3560_v14 = vpop.f32.mrb[49].mxu0 }
 0xc0a   :  { %v1986_v16 = vpop.f32.mrb[50].mxu0  ;;  %v2319_v18 = vsel %vm417_vm2, %v2311_v9, -inf }
 0xc0b   :  { %2320 = vmax.xlane.f32.xlu1 %v2319_v18  ;;  %v3561_v21 = vpop.f32.mrb[51].mxu0 }
 0xc7b   :  { %v2029_v22 = vpop.f32.mrb[52].mxu1  ;;  %v2075_v12 = vpop.f32.mrb[52].mxu0 }
 0xc7c   :  { %v2312_v23 = vsel %vm4247_vm9, %v2029_v22, -1000000.0  ;;  %v3566_v24 = vpop.f32.mrb[53].mxu1  ;;  %v3572_v25 = vpop.f32.mrb[53].mxu0  ;;  %v2313_v15 = vsel %vm4259_vm11, %v2075_v12, -1000000.0 }
 0xc7d   :  { %v2032_v27 = vpop.f32.mrb[54].mxu1  ;;  %v2078_v28 = vpop.f32.mrb[54].mxu0  ;;  %v2322_v11 = vsel %vm417_vm2, %v2312_v23, -inf  ;;  %v2325_v31 = vsel %vm417_vm2, %v2313_v15, -inf }
 0xc7e   :  { %v3573_v20 = vpop.f32.mrb[55].mxu0  ;;  %2323 = vmax.xlane.f32.xlu0 %v2322_v11  ;;  %v3567_v30 = vpop.f32.mrb[55].mxu1 }
 0xc82   :  { %2326 = vmax.xlane.f32.xlu0 %v2325_v31 }
 0xc83   :  { %v2121_v32 = vpop.f32.mrb[56].mxu1  ;;  %v2167_v34 = vpop.f32.mrb[56].mxu0 }
 0xc84   :  { %v2314_v29 = vsel %vm4271_vm13, %v2121_v32, -1000000.0  ;;  %v2315_v1 = vsel %vm4283_vm15, %v2167_v34, -1000000.0  ;;  %v3578_v35 = vpop.f32.mrb[57].mxu1  ;;  %v3584_v36 = vpop.f32.mrb[57].mxu0 }
 0xc85   :  { %v2124_v37 = vpop.f32.mrb[58].mxu1  ;;  %v2170_v39 = vpop.f32.mrb[58].mxu0  ;;  %v2331_v38 = vsel %vm417_vm2, %v2315_v1, -inf  ;;  %v2328_v40 = vsel %vm417_vm2, %v2314_v29, -inf }
 0xc86   :  { %v3585_v41 = vpop.f32.mrb[59].mxu0  ;;  %2332 = vmax.xlane.f32.xlu0 %v2331_v38  ;;  %2329 = vmax.xlane.f32.xlu1 %v2328_v40  ;;  %v3579_v42 = vpop.f32.mrb[59].mxu1 }
 0xc8b   :  { %v2213_v44 = vpop.f32.mrb[60].mxu1  ;;  %v2259_v45 = vpop.f32.mrb[60].mxu0 }
 0xc8c   :  { %v2316_v48 = vsel %vm4292_vm6, %v2213_v44, -1000000.0  ;;  %v2317_v58 = vsel %vm4301_vm7, %v2259_v45, -1000000.0  ;;  %v3590_v46 = vpop.f32.mrb[61].mxu1  ;;  %v3596_v47 = vpop.f32.mrb[61].mxu0 }
 0xc8d   :  { %v2216_v49 = vpop.f32.mrb[62].mxu1  ;;  %v2262_v17 = vpop.f32.mrb[62].mxu0  ;;  %v2337_v50 = vsel %vm417_vm2, %v2317_v58, -inf  ;;  %v2334_v51 = vsel %vm417_vm2, %v2316_v48, -inf }
 0xc8e   :  { %v3597_v52 = vpop.f32.mrb[63].mxu0  ;;  %2338 = vmax.xlane.f32.xlu0 %v2337_v50  ;;  %2335 = vmax.xlane.f32.xlu1 %v2334_v51  ;;  %v3591_v54 = vpop.f32.mrb[63].mxu1 }
 0xc93   :  { %v2305_v55 = vpop.f32.mrb[64].mxu1 }
 0xc94   :  { %v2318_v6 = vsel %vm4309_vm8, %v2305_v55, -1000000.0  ;;  %v3602_v56 = vpop.f32.mrb[65].mxu1 }
 0xc95   :  { %v2308_v33 = vpop.f32.mrb[66].mxu1  ;;  %v2340_v19 = vsel %vm417_vm2, %v2318_v6, -inf }
 0xc96   :  { %2341 = vmax.xlane.f32.xlu1 %v2340_v19  ;;  %v3603_v61 = vpop.f32.mrb[67].mxu1 }
 0xc98   :  { %v2321_v53 = vpop.xlane.xlu1 %2320 }
 0xc99   :  { %v2343_v62 = vsub.f32 %v2311_v9, %v2321_v53 }
 0xc9b   :  { %v2351_v63 = vmul.f32 1.442695, %v2343_v62 }
 0xc9d   :  { %3796 = vpow2.f32 %v2351_v63  ;;  %v1939_v63 = vpack.c.bf16 %v4514_v8, %v4514_v8 }
 0xca4   :  { %1916 = vrot.lane.b32.xlu0 %v4555_v57, %s3968_s8 }
 0xca7   :  { %1919 = vrot.lane.b32.xlu1 %v4555_v57, %s3970_s1  ;;  %v4610_v59 = vpop.eup %3796 }
 0xca8   :  { %v2367_v26 = vsel %vm417_vm2, %v4610_v59, 0.0 }
 0xcc3   :  { %2368 = vadd.xlane.f32.xlu0 %v2367_v26 }
 0xcd9   :  { %1922 = vrot.lane.b32.xlu0 %v4555_v57, %s3969_s12 }
 0xd0b   :  { %v2324_v2 = vpop.xlane.xlu0 %2323 }
 0xd0c   :  { %v2344_v4 = vsub.f32 %v2312_v23, %v2324_v2 }
 0xd0e   :  { %v2353_v3 = vmul.f32 1.442695, %v2344_v4 }
 0xd0f   :  { %v2327_v5 = vpop.xlane.xlu0 %2326 }
 0xd10   :  { %3798 = vpow2.f32 %v2353_v3  ;;  %v2345_v7 = vsub.f32 %v2313_v15, %v2327_v5  ;;  %v2603_v5 = vsel %vm941_vm3, %v1939_v63, 0 }
 0xd12   :  { %v2355_v10 = vmul.f32 1.442695, %v2345_v7 }
 0xd13   :  { %v2333_v13 = vpop.xlane.xlu0 %2332  ;;  %v2330_v9 = vpop.xlane.xlu1 %2329 }
 0xd14   :  { %3800 = vpow2.f32 %v2355_v10  ;;  %v2347_v14 = vsub.f32 %v2315_v1, %v2333_v13  ;;  %v2346_v16 = vsub.f32 %v2314_v29, %v2330_v9 }
 0xd16   :  { %v2359_v18 = vmul.f32 1.442695, %v2347_v14  ;;  %v2357_v21 = vmul.f32 1.442695, %v2346_v16 }
 0xd18   :  { %3802 = vpow2.f32 %v2359_v18 }
 0xd19   :  { %3804 = vpow2.f32 %v2357_v21 }
 0xd1a   :  { %v4616_v22 = vpop.eup %3798 }
 0xd1b   :  { %v2339_v12 = vpop.xlane.xlu0 %2338  ;;  %v2336_v57 = vpop.xlane.xlu1 %2335  ;;  %v2370_v23 = vsel %vm417_vm2, %v4616_v22, 0.0 }
 0xd1c   :  { %v2349_v24 = vsub.f32 %v2317_v58, %v2339_v12  ;;  %v2348_v25 = vsub.f32 %v2316_v48, %v2336_v57  ;;  %2371 = vadd.xlane.f32.xlu1 %v2370_v23 }
 0xd1e   :  { %v3801_v27 = vpop.eup %3800  ;;  %v2361_v28 = vmul.f32 1.442695, %v2348_v25  ;;  %v2363_v11 = vmul.f32 1.442695, %v2349_v24 }
 0xd1f   :  { %v1917_v15 = vpop.permute.xlu0 %1916  ;;  %v2373_v20 = vsel %vm417_vm2, %v3801_v27, 0.0 }
 0xd20   :  { %v1936_v30 = vpack.c.bf16 %v1917_v15, %v1917_v15  ;;  %2374 = vadd.xlane.f32.xlu0 %v2373_v20  ;;  %3806 = vpow2.f32 %v2361_v28 }
 0xd21   :  { %3808 = vpow2.f32 %v2363_v11 }
 0xd22   :  { %v4621_v31 = vpop.eup %3802  ;;  %v2465_v32 = vsel %vm941_vm3, %v1936_v30, 0 }
 0xd23   :  { %v4624_v34 = vpop.eup %3804  ;;  %3611 = vmatpush3.bf16.msra.mxu1 %v2465_v32  ;;  %v2342_v29 = vpop.xlane.xlu1 %2341  ;;  %v2379_v1 = vsel %vm417_vm2, %v4621_v31, 0.0 }
 0xd24   :  { %v2350_v35 = vsub.f32 %v2318_v6, %v2342_v29  ;;  %2380 = vadd.xlane.f32.xlu0 %v2379_v1  ;;  %v2376_v36 = vsel %vm417_vm2, %v4624_v34, 0.0  ;;  %3622 = vmatprep.subr.bf16.mxu1 %v3966_v0 }
 0xd25   :  { %2377 = vadd.xlane.f32.xlu1 %v2376_v36 }
 0xd26   :  { %v2365_v37 = vmul.f32 1.442695, %v2350_v35 }
 0xd27   :  { %v1920_v48 = vpop.permute.xlu1 %1919 }
 0xd28   :  { %3810 = vpow2.f32 %v2365_v37  ;;  %v1937_v46 = vpack.c.bf16 %v1920_v48, %v1920_v48 }
 0xd2a   :  { %v4631_v39 = vpop.eup %3806  ;;  %v2511_v17 = vsel %vm941_vm3, %v1937_v46, 0 }
 0xd2b   :  { %v2382_v38 = vsel %vm417_vm2, %v4631_v39, 0.0  ;;  %v4635_v40 = vpop.eup %3808 }
 0xd2c   :  { %2383 = vadd.xlane.f32.xlu1 %v2382_v38  ;;  %v2385_v41 = vsel %vm417_vm2, %v4635_v40, 0.0 }
 0xd30   :  { %2386 = vadd.xlane.f32.xlu1 %v2385_v41 }
 0xd32   :  { %v4639_v42 = vpop.eup %3810 }
 0xd33   :  { %v2388_v44 = vsel %vm417_vm2, %v4639_v42, 0.0 }
 0xd34   :  { %2389 = vadd.xlane.f32.xlu1 %v2388_v44 }
 0xd3a   :  { %1926 = vrot.lane.b32.xlu0 %v4514_v8, %s3968_s8 }
 0xd3e   :  { %1932 = vrot.lane.b32.xlu0 %v4514_v8, %s3969_s12 }
 0xd45   :  { %1929 = vrot.lane.b32.xlu1 %v4514_v8, %s3970_s1 }
 0xd50   :  { %v2369_v45 = vpop.xlane.xlu0 %2368 }
 0xd51   :  { %3812 = vrcp.f32 %v2369_v45 }
 0xd54   :  { %v1923_v50 = vpop.permute.xlu0 %1922 }
 0xd55   :  { %v1938_v56 = vpack.c.bf16 %v1923_v50, %v1923_v50 }
 0xd57   :  { %v2557_v53 = vsel %vm941_vm3, %v1938_v56, 0 }
 0xd5b   :  { %v3813_v58 = vpop.eup %3812 }
 0xd5c   :  { %v2399_v47 = vmul.f32 %v3813_v58, %v4610_v59 }
 0xd5e   :  { %v2407_v49 = vpack.c.bf16 %v2399_v47, %v2399_v47 }
 0xd60   :  { %3607 = vmatmul.mubr.msk.bf16.vlgmr.msra.gmra.mrb[64].mxu0 %vm417_vm2, %v2407_v49  ;;  %v3748_v49 = vld [vmem:[#allocation7 + $0x10] sm:$0xff]  }
 0xd61   :  { %3617 = vmatpush3.bf16.msra.mxu0 %v2511_v17  ;;  %3618 = vmatprep.mubr.msk.bf16.mxu0 %vm3967_vm0, %v3966_v0 }
 0xd62   :  { %3628 = vmatprep.subr.bf16.mxu0 %v3966_v0 }
 0xda9   :  { %v2372_v51 = vpop.xlane.xlu1 %2371 }
 0xdaa   :  { %3814 = vrcp.f32 %v2372_v51 }
 0xdad   :  { %v2375_v52 = vpop.xlane.xlu0 %2374 }
 0xdae   :  { %3816 = vrcp.f32 %v2375_v52  ;;  %v3749_v52 = vld [vmem:[#allocation7 + $0x18] sm:$0xff]  }
 0xdb1   :  { %v2381_v54 = vpop.xlane.xlu0 %2380 }
 0xdb2   :  { %3818 = vrcp.f32 %v2381_v54  ;;  %v2378_v55 = vpop.xlane.xlu1 %2377 }
 0xdb3   :  { %3820 = vrcp.f32 %v2378_v55 }
 0xdb4   :  { %v3815_v6 = vpop.eup %3814 }
 0xdb5   :  { %v2400_v33 = vmul.f32 %v3815_v6, %v4616_v22  ;;  %v1927_v26 = vpop.permute.xlu0 %1926 }
 0xdb6   :  { %v1940_v10 = vpack.c.bf16 %v1927_v26, %v1927_v26 }
 0xdb7   :  { %v2408_v19 = vpack.c.bf16 %v2400_v33, %v2400_v33 }
 0xdb8   :  { %v3817_v61 = vpop.eup %3816  ;;  %v2649_v14 = vsel %vm941_vm3, %v1940_v10, 0 }
 0xdb9   :  { %v2401_v62 = vmul.f32 %v3817_v61, %v3801_v27  ;;  %3613 = vmatmul.mubr.msk.bf16.vlgmr.msra.gmra.mrb[68].mxu1 %vm417_vm2, %v2408_v19  ;;  %v2384_v59 = vpop.xlane.xlu1 %2383  ;;  %v1933_v18 = vpop.permute.xlu0 %1932 }
 0xdba   :  { %3623 = vmatpush3.bf16.msra.mxu1 %v2557_v53  ;;  %3624 = vmatprep.mubr.msk.bf16.mxu1 %vm3967_vm0, %v3966_v0  ;;  %3822 = vrcp.f32 %v2384_v59  ;;  %v1942_v12 = vpack.c.bf16 %v1933_v18, %v1933_v18 }
 0xdbb   :  { %v2409_v2 = vpack.c.bf16 %v2401_v62, %v2401_v62  ;;  %3634 = vmatprep.subr.bf16.mxu1 %v3966_v0 }
 0xdbc   :  { %v3819_v4 = vpop.eup %3818  ;;  %v2741_v11 = vsel %vm941_vm3, %v1942_v12, 0 }
 0xdbd   :  { %v3821_v3 = vpop.eup %3820  ;;  %3619 = vmatmul.mubr.msk.bf16.vlgmr.msra.gmra.mrb[68].mxu0 %vm417_vm2, %v2409_v2  ;;  %v2387_v8 = vpop.xlane.xlu1 %2386  ;;  %v2403_v13 = vmul.f32 %v3819_v4, %v4621_v31 }
 0xdbe   :  { %v2402_v7 = vmul.f32 %v3821_v3, %v4624_v34  ;;  %3629 = vmatpush3.bf16.msra.mxu0 %v2603_v5  ;;  %3630 = vmatprep.mubr.msk.bf16.mxu0 %vm3967_vm0, %v3966_v0  ;;  %3824 = vrcp.f32 %v2387_v8 }
 0xdbf   :  { %3640 = vmatprep.subr.bf16.mxu0 %v3966_v0  ;;  %v2411_v21 = vpack.c.bf16 %v2403_v13, %v2403_v13 }
 0xdc0   :  { %v2410_v9 = vpack.c.bf16 %v2402_v7, %v2402_v7 }
 0xdc1   :  { %v2390_v16 = vpop.xlane.xlu1 %2389 }
 0xdc2   :  { %3625 = vmatmul.mubr.msk.bf16.vlgmr.msra.gmra.mrb[72].mxu1 %vm417_vm2, %v2410_v9  ;;  %3826 = vrcp.f32 %v2390_v16 }
 0xdc3   :  { %3635 = vmatpush3.bf16.msra.mxu1 %v2649_v14  ;;  %3636 = vmatprep.mubr.msk.bf16.mxu1 %vm3967_vm0, %v3966_v0 }
 0xdc4   :  { %3646 = vmatprep.subr.bf16.mxu1 %v3966_v0  ;;  %v3823_v22 = vpop.eup %3822 }
 0xdc5   :  { %3631 = vmatmul.mubr.msk.bf16.vlgmr.msra.gmra.mrb[72].mxu0 %vm417_vm2, %v2411_v21  ;;  %v2404_v57 = vmul.f32 %v3823_v22, %v4631_v39  ;;  %v1930_v23 = vpop.permute.xlu1 %1929 }
 0xdc6   :  { %3642 = vmatprep.mubr.msk.bf16.mxu0 %vm3967_vm0, %v3966_v0  ;;  %v1941_v24 = vpack.c.bf16 %v1930_v23, %v1930_v23 }
 0xdc7   :  { %v2412_v25 = vpack.c.bf16 %v2404_v57, %v2404_v57 }
 0xdc8   :  { %v3825_v27 = vpop.eup %3824  ;;  %v2695_v28 = vsel %vm941_vm3, %v1941_v24, 0 }
 0xdc9   :  { %v2405_v15 = vmul.f32 %v3825_v27, %v4635_v40  ;;  %3641 = vmatpush3.bf16.msra.mxu0 %v2695_v28  ;;  %v3248_v27 = vld [vmem:[%s4783_s9 + $0x1] ss:$0 sm:$0xff] }
 0xdca   :  { %3637 = vmatmul.mubr.msk.bf16.vlgmr.msra.gmra.mrb[76].mxu1 %vm417_vm2, %v2412_v25  ;;  %3652 = vmatprep.subr.bf16.mxu0 %v3966_v0 }
 0xdcb   :  { %3647 = vmatpush3.bf16.msra.mxu1 %v2741_v11  ;;  %3648 = vmatprep.mubr.msk.bf16.mxu1 %vm3967_vm0, %v3966_v0  ;;  %v2413_v20 = vpack.c.bf16 %v2405_v15, %v2405_v15 }
 0xdcc   :  { %3660 = vmatprep.subr.bf16.mxu1 %v3966_v0  ;;  %v3827_v30 = vpop.eup %3826 }
 0xdcd   :  { %v2406_v31 = vmul.f32 %v3827_v30, %v4639_v42  ;;  %3643 = vmatmul.mubr.msk.bf16.vlgmr.msra.gmra.mrb[76].mxu0 %vm417_vm2, %v2413_v20 }
 0xdce   :  { %3656 = vmatprep.mubr.msk.bf16.mxu0 %vm3967_vm0, %v3966_v0  ;;  %3653 = vmatpush3.bf16.msra.mxu0 %v3748_v49 }
 0xdcf   :  { %v2414_v32 = vpack.c.bf16 %v2406_v31, %v2406_v31  ;;  %3654 = vmatprep.subr.bf16.mxu0 %v3966_v0 }
 0xdd2   :  { %3649 = vmatmul.mubr.msk.bf16.vlgmr.msra.gmra.mrb[80].mxu1 %vm417_vm2, %v2414_v32  ;;  %3655 = vmatpush3.bf16.msra.mxu0 %v3749_v52 }
 0xdd3   :  { %3664 = vmatprep.mubr.msk.bf16.mxu1 %vm3967_vm0, %v3966_v0  ;;  %3668 = vmatprep.subr.bf16.mxu0 %v3966_v0 }
 0xe33   :  { %v2455_v34 = vpop.f32.mrb[64].mxu0 }
 0xe34   :  { %v3608_v29 = vpop.f32.mrb[65].mxu0 }
 0xe35   :  { %v2458_v1 = vpop.f32.mrb[66].mxu0 }
 0xe36   :  { %v3609_v35 = vpop.f32.mrb[67].mxu0 }
 0xe8c   :  { %v2501_v36 = vpop.f32.mrb[68].mxu1 }
 0xe8d   :  { %v3614_v37 = vpop.f32.mrb[69].mxu1 }
 0xe8e   :  { %v2504_v39 = vpop.f32.mrb[70].mxu1 }
 0xe8f   :  { %v3615_v38 = vpop.f32.mrb[71].mxu1 }
 0xe90   :  { %v2547_v40 = vpop.f32.mrb[68].mxu0 }
 0xe91   :  { %v3620_v41 = vpop.f32.mrb[69].mxu0 }
 0xe92   :  { %v2550_v42 = vpop.f32.mrb[70].mxu0 }
 0xe93   :  { %v3621_v44 = vpop.f32.mrb[71].mxu0 }
 0xe95   :  { %v2593_v45 = vpop.f32.mrb[72].mxu1 }
 0xe96   :  { %v3626_v48 = vpop.f32.mrb[73].mxu1 }
 0xe97   :  { %v2596_v58 = vpop.f32.mrb[74].mxu1  ;;  %v3752_v48 = vld [vmem:[%s4788_s14 + $0x20] sm:$0xff]  }
 0xe98   :  { %v3627_v46 = vpop.f32.mrb[75].mxu1  ;;  %v2639_v47 = vpop.f32.mrb[72].mxu0  ;;  %v3753_v58 = vld [vmem:[%s4788_s14 + $0x28] sm:$0xff]  }
 0xe99   :  { %v3632_v17 = vpop.f32.mrb[73].mxu0 }
 0xe9a   :  { %v2642_v50 = vpop.f32.mrb[74].mxu0 }
 0xe9b   :  { %v3633_v51 = vpop.f32.mrb[75].mxu0 }
 0xe9d   :  { %v2685_v54 = vpop.f32.mrb[76].mxu1 }
 0xe9e   :  { %v3713_v55 = vpack.i.bf16 %v2685_v54, %v2501_v36  ;;  %v3638_v6 = vpop.f32.mrb[77].mxu1 }
 0xe9f   :  { %v2688_v56 = vpop.f32.mrb[78].mxu1 }
 0xea0   :  { %3714 = vrot.lane.b32.xlu1 %v3713_v55, %s3961_s0  ;;  %v3639_v33 = vpop.f32.mrb[79].mxu1  ;;  %v2731_v19 = vpop.f32.mrb[76].mxu0  ;;  %v3254_v55 = vld [vmem:[%s4784_s10 + $0x1] ss:$0 sm:$0xff] }
 0xea1   :  { %v3718_v61 = vpack.i.bf16 %v2731_v19, %v2547_v40  ;;  %v3644_v53 = vpop.f32.mrb[77].mxu0  ;;  %v3255_v19 = vld [vmem:[%s4785_s11 + $0x1] ss:$0 sm:$0xff] }
 0xea2   :  { %v2734_v62 = vpop.f32.mrb[78].mxu0 }
 0xea3   :  { %3719 = vrot.lane.b32.xlu0 %v3718_v61, %s3957_s23  ;;  %v3645_v63 = vpop.f32.mrb[79].mxu0 }
 0xea5   :  { %v2777_v59 = vpop.f32.mrb[80].mxu1 }
 0xea6   :  { %v3723_v26 = vpack.i.bf16 %v2777_v59, %v2593_v45  ;;  %v3650_v2 = vpop.f32.mrb[81].mxu1  ;;  %v3750_v45 = vld [vmem:[#allocation8 + $0x10] sm:$0xff]   ;;  %v3754_v59 = vld [vmem:[%s4788_s14 + $0x30] sm:$0xff]  }
 0xea7   :  { %v2780_v4 = vpop.f32.mrb[82].mxu1  ;;  %3661 = vmatpush3.bf16.msra.mxu1 %v3750_v45  ;;  %v3257_v2 = vld [vmem:[%s4787_s13 + $0x1] ss:$0 sm:$0xff] }
 0xea8   :  { %3724 = vrot.lane.b32.xlu1 %v3723_v26, %s3972_s18  ;;  %v3651_v3 = vpop.f32.mrb[83].mxu1  ;;  %3662 = vmatprep.subr.bf16.mxu1 %v3966_v0  ;;  %v3755_v26 = vld [vmem:[%s4788_s14 + $0x38] sm:$0xff]   ;;  %v3279_v45 = vld [vmem:[%s4823_s20 + $0x1] ss:$0 sm:$0xff] }
 0xf12   :  { %v3715_v5 = vpop.permute.xlu1 %3714 }
 0xf13   :  { %v3717_v10 = vunpack.i.h.bf16 %v3715_v5  ;;  %v3716_v8 = vunpack.i.l.bf16 %v3715_v5 }
 0xf15   :  { %v3720_v7 = vpop.permute.xlu0 %3719  ;;  %v2810_v16 = vsel %vm417_vm2, %v2639_v47, %v3717_v10  ;;  %v2795_v18 = vsel %vm417_vm2, %v2455_v34, %v3716_v8 }
 0xf16   :  { %v3722_v13 = vunpack.i.h.bf16 %v3720_v7  ;;  %v3721_v9 = vunpack.i.l.bf16 %v3720_v7 }
 0xf18   :  { %v2796_v12 = vsel %vm1320_vm10, %v2795_v18, %v3721_v9  ;;  %v2811_v57 = vsel %vm1320_vm10, %v2810_v16, %v3722_v13 }
 0xf1a   :  { %v3725_v14 = vpop.permute.xlu1 %3724 }
 0xf1b   :  { %v3727_v21 = vunpack.i.h.bf16 %v3725_v14  ;;  %v3726_v22 = vunpack.i.l.bf16 %v3725_v14 }
 0xf1d   :  { %v2812_v23 = vsel %vm1322_vm12, %v2811_v57, %v3727_v21  ;;  %v2797_v24 = vsel %vm1322_vm12, %v2796_v12, %v3726_v22 }
 0xf1e   :  { %v2813_v25 = vpack.c.bf16 %v2812_v23, %v2797_v24 }
 0xf20   :  { %3657 = vmatmul.mubr.msk.bf16.vlgmr.msra.gmra.mrb[80].mxu0 %vm158_vm1, %v2813_v25 }
 0xf21   :  { %3676 = vmatprep.mubr.msk.bf16.mxu0 %vm3967_vm0, %v3966_v0  ;;  %3669 = vmatpush3.bf16.msra.mxu0 %v3752_v48 }
 0xf22   :  { %3670 = vmatprep.subr.bf16.mxu0 %v3966_v0 }
 0xf25   :  { %3671 = vmatpush3.bf16.msra.mxu0 %v3753_v58 }
 0xf26   :  { %3672 = vmatprep.subr.bf16.mxu0 %v3966_v0 }
 0xf29   :  { %3673 = vmatpush3.bf16.msra.mxu0 %v3754_v59 }
 0xf2a   :  { %3674 = vmatprep.subr.bf16.mxu0 %v3966_v0  ;;  %v3270_v0 = vld [vmem:[%s4789_s15 + $0x1] ss:$0 sm:$0xff] }
 0xf2d   :  { %3675 = vmatpush3.bf16.msra.mxu0 %v3755_v26 }
 0xff3   :  { %v2876_v28 = vpop.f32.mrb[80].mxu0 }
 0xff4   :  { %v2877_v11 = vadd.f32 %v3248_v27, %v2876_v28  ;;  %v3658_v15 = vpop.f32.mrb[81].mxu0 }
 0xff5   :  { %v2879_v20 = vpop.f32.mrb[82].mxu0 }
 0xff6   :  { %v2880_v30 = vadd.f32 %v3248_v27, %v2879_v20  ;;  %v3659_v31 = vpop.f32.mrb[83].mxu0  ;;  %v2883_v32 = vadd.f32 %v2877_v11, %v4483_v43 }
 0xff8   :  { %v2889_v34 = vsel %vm158_vm1, %v2883_v32, 0.0  ;;  %v2884_v29 = vadd.f32 %v2880_v30, %v4485_v60  ;;  %v3751_v60 = vld [vmem:[#allocation8 + $0x18] sm:$0xff]  }
 0xff9   :  { %2890 = vadd.xlane.f32.xlu0 %v2889_v34  ;;  %3663 = vmatpush3.bf16.msra.mxu1 %v3751_v60 }
 0xffa   :  { %v2892_v1 = vsel %vm158_vm1, %v2884_v29, 0.0 }
 0xffb   :  { %2893 = vadd.xlane.f32.xlu1 %v2892_v1 }
0x1086   :  { %v2891_v35 = vpop.xlane.xlu0 %2890 }
0x1087   :  { %v2895_v36 = vmul.f32 0.03125, %v2891_v35 }
0x1088   :  { %v2894_v37 = vpop.xlane.xlu1 %2893 }
0x1089   :  { %v2897_v39 = vsub.f32 %v2883_v32, %v2895_v36  ;;  %v2896_v38 = vmul.f32 0.03125, %v2894_v37 }
0x108b   :  { %v2898_v40 = vsub.f32 %v2884_v29, %v2896_v38  ;;  %v2899_v41 = vmul.f32 %v2897_v39, %v2897_v39 }
0x108d   :  { %v2901_v42 = vsel %vm158_vm1, %v2899_v41, 0.0  ;;  %v2900_v44 = vmul.f32 %v2898_v40, %v2898_v40 }
0x108e   :  { %2902 = vadd.xlane.f32.xlu0 %v2901_v42  ;;  %v3278_v42 = vld [vmem:[%s4790_s16 + $0x1] ss:$0 sm:$0xff] }
0x108f   :  { %v2904_v43 = vsel %vm158_vm1, %v2900_v44, 0.0 }
0x1092   :  { %2905 = vadd.xlane.f32.xlu0 %v2904_v43 }
0x111b   :  { %v2903_v46 = vpop.xlane.xlu0 %2902 }
0x111c   :  { %v2907_v47 = vmul.f32 0.03125, %v2903_v46 }
0x111e   :  { %v2909_v49 = vadd.f32 1e-05, %v2907_v47 }
0x111f   :  { %v2906_v17 = vpop.xlane.xlu0 %2905 }
0x1120   :  { %3828 = vrsqrt.f32 %v2909_v49  ;;  %v2908_v50 = vmul.f32 0.03125, %v2906_v17 }
0x1122   :  { %v2910_v51 = vadd.f32 1e-05, %v2908_v50 }
0x1124   :  { %3830 = vrsqrt.f32 %v2910_v51 }
0x112a   :  { %v3829_v52 = vpop.eup %3828 }
0x112b   :  { %v2913_v54 = vmul.f32 %v3829_v52, %v2897_v39 }
0x112d   :  { %v2921_v56 = vmul.f32 %v3254_v55, %v2913_v54 }
0x112e   :  { %v3831_v6 = vpop.eup %3830 }
0x112f   :  { %v2914_v33 = vmul.f32 %v3831_v6, %v2898_v40  ;;  %v2929_v53 = vadd.f32 %v3255_v19, %v2921_v56 }
0x1131   :  { %v2922_v61 = vmul.f32 %v3254_v55, %v2914_v33 }
0x1133   :  { %v2930_v62 = vadd.f32 %v3255_v19, %v2922_v61 }
0x1135   :  { %v2931_v63 = vpack.c.bf16 %v2930_v62, %v2929_v53 }
0x1137   :  { %3665 = vmatmul.mubr.msk.bf16.vlgmr.msra.gmra.mrb[84].mxu1 %vm158_vm1, %v2931_v63 }
0x120a   :  { %v2994_v4 = vpop.f32.mrb[84].mxu1 }
0x120b   :  { %v2995_v3 = vadd.f32 %v3257_v2, %v2994_v4  ;;  %v3666_v5 = vpop.f32.mrb[85].mxu1 }
0x120c   :  { %v2997_v7 = vpop.f32.mrb[86].mxu1 }
0x120d   :  { %v2998_v10 = vadd.f32 %v3257_v2, %v2997_v7  ;;  %v3667_v8 = vpop.f32.mrb[87].mxu1  ;;  %v3001_v13 = vmax.f32 %v2995_v3, 0.0 }
0x120f   :  { %v3002_v9 = vmax.f32 %v2998_v10, 0.0 }
0x1211   :  { %v3003_v14 = vpack.c.bf16 %v3002_v9, %v3001_v13 }
0x1213   :  { %3677 = vmatmul.mubr.msk.bf16.vlgmr.msra.gmra.mrb[84].mxu0 %vm1564_vm14, %v3003_v14 }
0x12e6   :  { %v3082_v16 = vpop.f32.mrb[84].mxu0 }
0x12e7   :  { %v3083_v18 = vadd.f32 %v3270_v0, %v3082_v16  ;;  %v3678_v21 = vpop.f32.mrb[85].mxu0 }
0x12e8   :  { %v3085_v22 = vpop.f32.mrb[86].mxu0 }
0x12e9   :  { %v3086_v12 = vadd.f32 %v3270_v0, %v3085_v22  ;;  %v3679_v57 = vpop.f32.mrb[87].mxu0  ;;  %v3089_v23 = vadd.f32 %v3083_v18, %v2929_v53 }
0x12eb   :  { %v3095_v24 = vsel %vm158_vm1, %v3089_v23, 0.0  ;;  %v3090_v25 = vadd.f32 %v3086_v12, %v2930_v62 }
0x12ec   :  { %3096 = vadd.xlane.f32.xlu1 %v3095_v24 }
0x12ed   :  { %v3098_v27 = vsel %vm158_vm1, %v3090_v25, 0.0 }
0x12ee   :  { %3099 = vadd.xlane.f32.xlu0 %v3098_v27 }
0x1379   :  { %v3097_v28 = vpop.xlane.xlu1 %3096 }
0x137a   :  { %v3101_v11 = vmul.f32 0.03125, %v3097_v28 }
0x137b   :  { %v3100_v15 = vpop.xlane.xlu0 %3099 }
0x137c   :  { %v3103_v20 = vsub.f32 %v3089_v23, %v3101_v11  ;;  %v3102_v30 = vmul.f32 0.03125, %v3100_v15 }
0x137e   :  { %v3104_v31 = vsub.f32 %v3090_v25, %v3102_v30  ;;  %v3105_v32 = vmul.f32 %v3103_v20, %v3103_v20 }
0x1380   :  { %v3107_v34 = vsel %vm158_vm1, %v3105_v32, 0.0  ;;  %v3106_v29 = vmul.f32 %v3104_v31, %v3104_v31 }
0x1381   :  { %3108 = vadd.xlane.f32.xlu1 %v3107_v34 }
0x1382   :  { %v3110_v1 = vsel %vm158_vm1, %v3106_v29, 0.0 }
0x1383   :  { %3111 = vadd.xlane.f32.xlu0 %v3110_v1 }
0x140e   :  { %v3109_v35 = vpop.xlane.xlu1 %3108 }
0x140f   :  { %v3113_v36 = vmul.f32 0.03125, %v3109_v35 }
0x1410   :  { %v3112_v37 = vpop.xlane.xlu0 %3111 }
0x1411   :  { %v3115_v39 = vadd.f32 1e-05, %v3113_v36  ;;  %v3114_v38 = vmul.f32 0.03125, %v3112_v37 }
0x1413   :  { %3832 = vrsqrt.f32 %v3115_v39  ;;  %v3116_v40 = vadd.f32 1e-05, %v3114_v38 }
0x1415   :  { %3834 = vrsqrt.f32 %v3116_v40 }
0x141d   :  { %v3833_v41 = vpop.eup %3832 }
0x141e   :  { %v3119_v44 = vmul.f32 %v3833_v41, %v3103_v20 }
0x141f   :  { %v3835_v43 = vpop.eup %3834 }
0x1420   :  { %v3120_v60 = vmul.f32 %v3835_v43, %v3104_v31  ;;  %v3127_v48 = vmul.f32 %v3278_v42, %v3119_v44 }
0x1422   :  { %v3128_v58 = vmul.f32 %v3278_v42, %v3120_v60  ;;  %v3135_v46 = vadd.f32 %v3279_v45, %v3127_v48 }
0x1424   :  { %v3136_v47 = vadd.f32 %v3279_v45, %v3128_v58  ;;  %3137 = vst.msk [vmem:[#allocation10] sm:$0xff] %vm158_vm1, %v3135_v46 }
0x1426   :  { %3138 = vst.msk [vmem:[#allocation10 + $0x8] sm:$0xff] %vm158_vm1, %v3136_v47 }
0x1427   :  { %3937 = shalt.err (!%p3934_p8)
}
0x1428   :  { %s4824_s25 = sld [smem:[#allocation19_spill]] }
0x142e   :  { %s3938_s27 = scalar_lea.hbm %s4824_s25, 256 }
0x142f   :  { %p3939_p9 = scmp.ne.s32.totalorder %s4824_s25, %s3938_s27  ;;  %p3942_p10 = scmp.lt.u32.totalorder %s3938_s27, %s4824_s25 }
0x1431   :  { %p3944_p11 = pnand %p3942_p10, %p3939_p9 }
0x1433   :  { %3947 = shalt.err (!%p3944_p11)
}
0x1434   :  { %s4825_s9 = smov 128  }
0x1435   :  { %3150 = dma.vmem_to_hbm [thread:$0]  %s3145_s28, 256, %s4824_s25, [#allocation4], %s4825_s9, %s4825_s9, %s3961_s0  }
0x1436   :  { %3954 = dma.done.wait [#allocation4], 256  }
0x1437   :  { %3955 = vsyncadd [#allocation4], 4294967040 }
0x1438   :  { %3154 = vsyncpa [#allocation3], 1 }
0x1439   :  { %3155 = vsyncpa [#allocation6], 1 }
0x143a   :  { %3156 = vsyncpa [#allocation9], 1 }
0x143b   :  { %3157 = vsyncpa [#allocation4], 1 }

</bundles_post_ra>
